<compile_context>
chip_gen: v5e
topology: v5e:2x2
jax: 0.10.0
libtpu: 0.0.40
codegen_flags: <defaults>
</compile_context>

<pallas_src>
import functools

import jax
import jax.numpy as jnp
from jax.experimental import pallas as pl
from jax.experimental.pallas import tpu as pltpu


def _round_up(x, m):
    return ((x + m - 1) // m) * m


def resnext_block_kernel(x_ref, w1_ref, w2_ref, w3_ref, *rest, H, W, has_proj):
    # x_ref : (1, Ptot, Cin)  one batch element; spatially zero-padded image,
    #                         flattened row-major over (H+2, W+2), zero tail rows
    # w1_ref: (Cin, GW)       conv1 1x1 weight, [in, out], f32
    # w2_ref: (9, GW, GW)     grouped conv2 3x3 weight, dense block-diag, bf16
    # w3_ref: (GW, Cout)      conv3 1x1 weight, [in, out], f32
    # ws_ref: (Cin, Cout)     shortcut 1x1 projection weight (only if has_proj)
    # o_ref : (1, H*W, Cout)
    # h1_ref: (Ptot, GW)      f32 scratch, conv1 output in padded-row layout
    # acc_ref:(H*(W+2), GW)   f32 scratch, conv2 accumulator (padded-row cols)
    if has_proj:
        ws_ref, o_ref, h1_ref, acc_ref = rest
    else:
        o_ref, h1_ref, acc_ref = rest

    Wp = W + 2
    HW2 = H * Wp                 # padded-row output length (2 garbage cols/row)

    # conv1 (1x1) + ReLU on the padded layout.  Halo rows of x are zero, so
    # their conv1 output is exactly zero -> the 3x3 "same" padding is free.
    xp = x_ref[0]                                               # (Ptot, Cin) f32
    h1 = jnp.maximum(
        jnp.dot(xp, w1_ref[...], preferred_element_type=jnp.float32), 0.0)
    h1_ref[...] = h1             # single aligned, unmasked full store

    # grouped conv2 (3x3, padding=1, stride=1): 9 contiguous row-window matmuls
    # against dense block-diagonal per-tap weights, bf16 operands, f32
    # accumulation into an explicit VMEM scratch (no re-zeroing: tap 0 inits).
    for t in range(9):                                          # unrolled
        dy, dx = divmod(t, 3)
        off = dy * Wp + dx
        win = h1_ref[off:off + HW2, :].astype(jnp.bfloat16)     # (HW2, GW)
        part = jnp.dot(win, w2_ref[t], preferred_element_type=jnp.float32)
        if t == 0:
            acc_ref[...] = part
        else:
            acc_ref[...] += part

    h2 = jnp.maximum(acc_ref[...], 0.0)                         # (HW2, GW) f32

    # conv3 (1x1) + shortcut + final ReLU, still in padded-row layout.
    out = jnp.dot(h2, w3_ref[...], preferred_element_type=jnp.float32)
    # Interior (non-halo) rows of the padded input: output row j = y*Wp + x
    # corresponds to padded x row j + Wp + 1.
    x_in = x_ref[0, Wp + 1:Wp + 1 + HW2, :]                     # (HW2, Cin)
    if has_proj:
        out = out + jnp.dot(x_in, ws_ref[...],
                            preferred_element_type=jnp.float32)
    else:
        out = out + x_in            # identity shortcut (Cin == Cout)
    out = jnp.maximum(out, 0.0)

    # Strip the 2 garbage halo columns per image row and store.  Destinations
    # are Cout-wide (lane-dense) and sublane-aligned (offsets y*W, W mult of 8).
    for y in range(H):
        o_ref[0, y * W:(y + 1) * W, :] = (
            out[y * Wp:y * Wp + W, :].astype(o_ref.dtype))


def resnext_block(x, w1, w2_dense, w3, ws=None):
    """x: (B, H, W, Cin) NHWC.  Returns (B, H, W, Cout).

    w1: (Cin, GW)         conv1 1x1 weight ([in, out])
    w2_dense: (9, GW, GW) grouped 3x3 weight, dense block-diagonal per tap
    w3: (GW, Cout)        conv3 1x1 weight ([in, out])
    ws: (Cin, Cout)       shortcut 1x1 projection; None -> identity (Cin==Cout)
    """
    # TODO(synk): stride > 1 (strided conv2 + strided shortcut conv) not implemented.
    # TODO(synk): for large B on single-core chips, pack several batch elements
    #             per grid step to amortize per-step overhead.
    B, H, W, Cin = x.shape
    GW = w1.shape[1]
    Cout = w3.shape[1]
    has_proj = ws is not None
    if not has_proj and Cin != Cout:
        raise ValueError(
            f"identity shortcut requires Cin == Cout (got {Cin} vs {Cout}); "
            "pass a projection weight ws")

    Wp = W + 2
    P = (H + 2) * Wp
    HW2 = H * Wp
    # +2 rows so the last tap window (start 2*Wp+2, length HW2) stays in
    # bounds; round up to a sublane multiple.
    Ptot = _round_up(P + 2, 8)

    # Zero-pad spatially in the wrapper (gives the conv halo; ReLU(0)=0 keeps
    # it zero through conv1), flatten row-major, zero tail rows.
    xp = jnp.pad(x, ((0, 0), (1, 1), (1, 1), (0, 0))).reshape(B, P, Cin)
    xp = jnp.pad(xp, ((0, 0), (0, Ptot - P), (0, 0)))

    w2_bf16 = w2_dense.astype(jnp.bfloat16)

    kernel = functools.partial(resnext_block_kernel, H=H, W=W,
                               has_proj=has_proj)

    in_specs = [
        pl.BlockSpec((1, Ptot, Cin), lambda b: (b, 0, 0)),
        pl.BlockSpec((Cin, GW), lambda b: (0, 0)),
        pl.BlockSpec((9, GW, GW), lambda b: (0, 0, 0)),
        pl.BlockSpec((GW, Cout), lambda b: (0, 0)),
    ]
    args = [xp, w1, w2_bf16, w3]
    if has_proj:
        in_specs.append(pl.BlockSpec((Cin, Cout), lambda b: (0, 0)))
        args.append(ws)

    out_flat = pl.pallas_call(
        kernel,
        out_shape=jax.ShapeDtypeStruct((B, H * W, Cout), x.dtype),
        grid_spec=pltpu.PrefetchScalarGridSpec(
            num_scalar_prefetch=0,
            grid=(B,),
            in_specs=in_specs,
            out_specs=pl.BlockSpec((1, H * W, Cout), lambda b: (b, 0, 0)),
            scratch_shapes=[
                pltpu.VMEM((Ptot, GW), jnp.float32),    # h1, padded-row layout
                pltpu.VMEM((HW2, GW), jnp.float32),     # conv2 accumulator
            ],
        ),
        compiler_params=pltpu.CompilerParams(
            dimension_semantics=("parallel",)),
    )(*args)
    return out_flat.reshape(B, H, W, Cout)


def grouped3x3_to_dense_taps(w_hwio, groups):
    """(3, 3, Cin/groups, Cout) grouped-conv weight -> (9, Cin, Cout) dense
    block-diagonal per-tap weights (zeros off the group-diagonal blocks)."""
    kh, kw, gin, cout = w_hwio.shape
    cin = gin * groups
    gout = cout // groups
    w_r = w_hwio.reshape(kh * kw, gin, cout)
    dense = jnp.zeros((kh * kw, cin, cout), w_hwio.dtype)
    for g in range(groups):
        dense = dense.at[:, g * gin:(g + 1) * gin, g * gout:(g + 1) * gout].set(
            w_r[:, :, g * gout:(g + 1) * gout])
    return dense


def ref_block(x, w1, w2_hwio, w3, ws, groups):
    """Pure-JAX f32 reference of the PyTorch Block.forward (NHWC, stride=1)."""
    h1 = jax.nn.relu(jnp.einsum("bhwc,cd->bhwd", x, w1))
    h2 = jax.nn.relu(jax.lax.conv_general_dilated(
        h1, w2_hwio, window_strides=(1, 1), padding="SAME",
        dimension_numbers=("NHWC", "HWIO", "NHWC"),
        feature_group_count=groups))
    h3 = jnp.einsum("bhwc,cd->bhwd", h2, w3)
    sc = jnp.einsum("bhwc,cd->bhwd", x, ws)
    return jax.nn.relu(h3 + sc)


if __name__ == "__main__":
    # Module defaults: cardinality=32, bottleneck_width=4, stride=1
    #   group_width = 128, out channels = expansion * group_width = 256
    B, H, W = 2, 16, 16
    in_planes, cardinality, bottleneck_width, expansion = 64, 32, 4, 2
    GW = cardinality * bottleneck_width          # 128
    Cout = expansion * GW                        # 256 (projection shortcut used)

    key = jax.random.PRNGKey(0)
    kx, k1, k2, k3, ks = jax.random.split(key, 5)

    x = jax.random.normal(kx, (B, H, W, in_planes), jnp.float32)

    def uinit(k, shape, fan_in):
        bound = 1.0 / (fan_in ** 0.5)
        return jax.random.uniform(k, shape, jnp.float32, -bound, bound)

    w1 = uinit(k1, (in_planes, GW), in_planes)                       # conv1 1x1
    w2_hwio = uinit(k2, (3, 3, GW // cardinality, GW),
                    9 * (GW // cardinality))                          # grouped 3x3
    w3 = uinit(k3, (GW, Cout), GW)                                   # conv3 1x1
    ws = uinit(ks, (in_planes, Cout), in_planes)                     # shortcut 1x1

    w2_dense = grouped3x3_to_dense_taps(w2_hwio, cardinality)        # (9, GW, GW)

    out = resnext_block(x, w1, w2_dense, w3, ws)
    out = jax.block_until_ready(out)

    ref = ref_block(x, w1, w2_hwio, w3, ws, cardinality)
    assert out.shape == (B, H, W, Cout)
    # Tolerance loosened vs the f32 version because conv2 (the dominant matmul)
    # now runs with bf16 operands (f32 accumulation); observed error is ~1e-3.
    assert jnp.allclose(out, ref, atol=5e-2, rtol=5e-2), \
        float(jnp.max(jnp.abs(out - ref)))

    print("KERNEL_OK")
</pallas_src>

<mosaic_0001>
module attributes {stable_mosaic.version = 11 : i64} {
  func.func @resnext_block_kernel(%arg0: i32, %arg1: memref<1x328x64xf32, #tpu.memory_space<vmem>>, %arg2: memref<64x128xf32, #tpu.memory_space<vmem>>, %arg3: memref<9x128x128xbf16, #tpu.memory_space<vmem>>, %arg4: memref<128x256xf32, #tpu.memory_space<vmem>>, %arg5: memref<64x256xf32, #tpu.memory_space<vmem>>, %arg6: memref<1x256x256xf32, #tpu.memory_space<vmem>>, %arg7: memref<328x128xf32, #tpu.memory_space<vmem>>, %arg8: memref<288x128xf32, #tpu.memory_space<vmem>>) attributes {dimension_semantics = [#tpu.dimension_semantics<parallel>], iteration_bounds = array<i64: 2>, scalar_prefetch = 0 : i64, scratch_operands = 2 : i64, tpu.core_type = #tpu.core_type<tc>, window_params = [{transform_indices = @transform_0, window_bounds = array<i64: 1, 328, 64>}, {pipeline_mode = #tpu.pipeline_mode<synchronous>, transform_indices = @transform_1, window_bounds = array<i64: 64, 128>}, {pipeline_mode = #tpu.pipeline_mode<synchronous>, transform_indices = @transform_2, window_bounds = array<i64: 9, 128, 128>}, {pipeline_mode = #tpu.pipeline_mode<synchronous>, transform_indices = @transform_3, window_bounds = array<i64: 128, 256>}, {pipeline_mode = #tpu.pipeline_mode<synchronous>, transform_indices = @transform_4, window_bounds = array<i64: 64, 256>}, {transform_indices = @transform_5, window_bounds = array<i64: 1, 256, 256>}]} {
    %c0 = arith.constant 0 : index
    %c0_0 = arith.constant 0 : index
    %c0_1 = arith.constant 0 : index
    %0 = vector.load %arg1[%c0, %c0_0, %c0_1] : memref<1x328x64xf32, #tpu.memory_space<vmem>>, vector<1x328x64xf32>
    %1 = vector.shape_cast %0 : vector<1x328x64xf32> to vector<328x64xf32>
    %c0_2 = arith.constant 0 : index
    %c0_3 = arith.constant 0 : index
    %2 = vector.load %arg2[%c0_2, %c0_3] : memref<64x128xf32, #tpu.memory_space<vmem>>, vector<64x128xf32>
    %cst = arith.constant dense<0.000000e+00> : vector<328x128xf32>
    %3 = tpu.matmul %1, %2, %cst {dimension_numbers = #tpu.dot_dimension_numbers<[1], [0], [0], [1], [0, 0, 1, 1], [], []>} : vector<328x64xf32>, vector<64x128xf32>, vector<328x128xf32> -> vector<328x128xf32>
    %cst_4 = arith.constant 0.000000e+00 : f32
    %4 = vector.broadcast %cst_4 : f32 to vector<328x128xf32>
    %5 = arith.maximumf %3, %4 : vector<328x128xf32>
    %c0_5 = arith.constant 0 : index
    %c0_6 = arith.constant 0 : index
    %6 = vector.load %arg7[%c0_5, %c0_6] : memref<328x128xf32, #tpu.memory_space<vmem>>, vector<328x128xf32>
    tpu.vector_store %arg7[%c0_5, %c0_6], %5 {strides = array<i32>} : memref<328x128xf32, #tpu.memory_space<vmem>>, vector<328x128xf32>,
    %c0_7 = arith.constant 0 : index
    %c0_8 = arith.constant 0 : index
    %7 = vector.load %arg7[%c0_7, %c0_8] : memref<328x128xf32, #tpu.memory_space<vmem>>, vector<288x128xf32>
    %8 = arith.truncf %7 : vector<288x128xf32> to vector<288x128xbf16>
    %c0_9 = arith.constant 0 : index
    %c0_10 = arith.constant 0 : index
    %c0_11 = arith.constant 0 : index
    %9 = vector.load %arg3[%c0_9, %c0_10, %c0_11] : memref<9x128x128xbf16, #tpu.memory_space<vmem>>, vector<1x128x128xbf16>
    %10 = vector.shape_cast %9 : vector<1x128x128xbf16> to vector<128x128xbf16>
    %cst_12 = arith.constant dense<0.000000e+00> : vector<288x128xf32>
    %11 = tpu.matmul %8, %10, %cst_12 {dimension_numbers = #tpu.dot_dimension_numbers<[1], [0], [0], [1], [0, 0, 1, 1], [], []>} : vector<288x128xbf16>, vector<128x128xbf16>, vector<288x128xf32> -> vector<288x128xf32>
    %c0_13 = arith.constant 0 : index
    %c0_14 = arith.constant 0 : index
    %12 = vector.load %arg8[%c0_13, %c0_14] : memref<288x128xf32, #tpu.memory_space<vmem>>, vector<288x128xf32>
    tpu.vector_store %arg8[%c0_13, %c0_14], %11 {strides = array<i32>} : memref<288x128xf32, #tpu.memory_space<vmem>>, vector<288x128xf32>,
    %c1 = arith.constant 1 : index
    %c0_15 = arith.constant 0 : index
    %13 = vector.load %arg7[%c1, %c0_15] : memref<328x128xf32, #tpu.memory_space<vmem>>, vector<288x128xf32>
    %14 = arith.truncf %13 : vector<288x128xf32> to vector<288x128xbf16>
    %c1_16 = arith.constant 1 : index
    %c0_17 = arith.constant 0 : index
    %c0_18 = arith.constant 0 : index
    %15 = vector.load %arg3[%c1_16, %c0_17, %c0_18] : memref<9x128x128xbf16, #tpu.memory_space<vmem>>, vector<1x128x128xbf16>
    %16 = vector.shape_cast %15 : vector<1x128x128xbf16> to vector<128x128xbf16>
    %cst_19 = arith.constant dense<0.000000e+00> : vector<288x128xf32>
    %17 = tpu.matmul %14, %16, %cst_19 {dimension_numbers = #tpu.dot_dimension_numbers<[1], [0], [0], [1], [0, 0, 1, 1], [], []>} : vector<288x128xbf16>, vector<128x128xbf16>, vector<288x128xf32> -> vector<288x128xf32>
    %c0_20 = arith.constant 0 : index
    %c0_21 = arith.constant 0 : index
    %18 = vector.load %arg8[%c0_20, %c0_21] : memref<288x128xf32, #tpu.memory_space<vmem>>, vector<288x128xf32>
    %19 = arith.addf %18, %17 : vector<288x128xf32>
    %c0_22 = arith.constant 0 : index
    %c0_23 = arith.constant 0 : index
    %20 = vector.load %arg8[%c0_22, %c0_23] : memref<288x128xf32, #tpu.memory_space<vmem>>, vector<288x128xf32>
    tpu.vector_store %arg8[%c0_22, %c0_23], %19 {strides = array<i32>} : memref<288x128xf32, #tpu.memory_space<vmem>>, vector<288x128xf32>,
    %c2 = arith.constant 2 : index
    %c0_24 = arith.constant 0 : index
    %21 = vector.load %arg7[%c2, %c0_24] : memref<328x128xf32, #tpu.memory_space<vmem>>, vector<288x128xf32>
    %22 = arith.truncf %21 : vector<288x128xf32> to vector<288x128xbf16>
    %c2_25 = arith.constant 2 : index
    %c0_26 = arith.constant 0 : index
    %c0_27 = arith.constant 0 : index
    %23 = vector.load %arg3[%c2_25, %c0_26, %c0_27] : memref<9x128x128xbf16, #tpu.memory_space<vmem>>, vector<1x128x128xbf16>
    %24 = vector.shape_cast %23 : vector<1x128x128xbf16> to vector<128x128xbf16>
    %cst_28 = arith.constant dense<0.000000e+00> : vector<288x128xf32>
    %25 = tpu.matmul %22, %24, %cst_28 {dimension_numbers = #tpu.dot_dimension_numbers<[1], [0], [0], [1], [0, 0, 1, 1], [], []>} : vector<288x128xbf16>, vector<128x128xbf16>, vector<288x128xf32> -> vector<288x128xf32>
    %c0_29 = arith.constant 0 : index
    %c0_30 = arith.constant 0 : index
    %26 = vector.load %arg8[%c0_29, %c0_30] : memref<288x128xf32, #tpu.memory_space<vmem>>, vector<288x128xf32>
    %27 = arith.addf %26, %25 : vector<288x128xf32>
    %c0_31 = arith.constant 0 : index
    %c0_32 = arith.constant 0 : index
    %28 = vector.load %arg8[%c0_31, %c0_32] : memref<288x128xf32, #tpu.memory_space<vmem>>, vector<288x128xf32>
    tpu.vector_store %arg8[%c0_31, %c0_32], %27 {strides = array<i32>} : memref<288x128xf32, #tpu.memory_space<vmem>>, vector<288x128xf32>,
    %c18 = arith.constant 18 : index
    %c0_33 = arith.constant 0 : index
    %29 = vector.load %arg7[%c18, %c0_33] : memref<328x128xf32, #tpu.memory_space<vmem>>, vector<288x128xf32>
    %30 = arith.truncf %29 : vector<288x128xf32> to vector<288x128xbf16>
    %c3 = arith.constant 3 : index
    %c0_34 = arith.constant 0 : index
    %c0_35 = arith.constant 0 : index
    %31 = vector.load %arg3[%c3, %c0_34, %c0_35] : memref<9x128x128xbf16, #tpu.memory_space<vmem>>, vector<1x128x128xbf16>
    %32 = vector.shape_cast %31 : vector<1x128x128xbf16> to vector<128x128xbf16>
    %cst_36 = arith.constant dense<0.000000e+00> : vector<288x128xf32>
    %33 = tpu.matmul %30, %32, %cst_36 {dimension_numbers = #tpu.dot_dimension_numbers<[1], [0], [0], [1], [0, 0, 1, 1], [], []>} : vector<288x128xbf16>, vector<128x128xbf16>, vector<288x128xf32> -> vector<288x128xf32>
    %c0_37 = arith.constant 0 : index
    %c0_38 = arith.constant 0 : index
    %34 = vector.load %arg8[%c0_37, %c0_38] : memref<288x128xf32, #tpu.memory_space<vmem>>, vector<288x128xf32>
    %35 = arith.addf %34, %33 : vector<288x128xf32>
    %c0_39 = arith.constant 0 : index
    %c0_40 = arith.constant 0 : index
    %36 = vector.load %arg8[%c0_39, %c0_40] : memref<288x128xf32, #tpu.memory_space<vmem>>, vector<288x128xf32>
    tpu.vector_store %arg8[%c0_39, %c0_40], %35 {strides = array<i32>} : memref<288x128xf32, #tpu.memory_space<vmem>>, vector<288x128xf32>,
    %c19 = arith.constant 19 : index
    %c0_41 = arith.constant 0 : index
    %37 = vector.load %arg7[%c19, %c0_41] : memref<328x128xf32, #tpu.memory_space<vmem>>, vector<288x128xf32>
    %38 = arith.truncf %37 : vector<288x128xf32> to vector<288x128xbf16>
    %c4 = arith.constant 4 : index
    %c0_42 = arith.constant 0 : index
    %c0_43 = arith.constant 0 : index
    %39 = vector.load %arg3[%c4, %c0_42, %c0_43] : memref<9x128x128xbf16, #tpu.memory_space<vmem>>, vector<1x128x128xbf16>
    %40 = vector.shape_cast %39 : vector<1x128x128xbf16> to vector<128x128xbf16>
    %cst_44 = arith.constant dense<0.000000e+00> : vector<288x128xf32>
    %41 = tpu.matmul %38, %40, %cst_44 {dimension_numbers = #tpu.dot_dimension_numbers<[1], [0], [0], [1], [0, 0, 1, 1], [], []>} : vector<288x128xbf16>, vector<128x128xbf16>, vector<288x128xf32> -> vector<288x128xf32>
    %c0_45 = arith.constant 0 : index
    %c0_46 = arith.constant 0 : index
    %42 = vector.load %arg8[%c0_45, %c0_46] : memref<288x128xf32, #tpu.memory_space<vmem>>, vector<288x128xf32>
    %43 = arith.addf %42, %41 : vector<288x128xf32>
    %c0_47 = arith.constant 0 : index
    %c0_48 = arith.constant 0 : index
    %44 = vector.load %arg8[%c0_47, %c0_48] : memref<288x128xf32, #tpu.memory_space<vmem>>, vector<288x128xf32>
    tpu.vector_store %arg8[%c0_47, %c0_48], %43 {strides = array<i32>} : memref<288x128xf32, #tpu.memory_space<vmem>>, vector<288x128xf32>,
    %c20 = arith.constant 20 : index
    %c0_49 = arith.constant 0 : index
    %45 = vector.load %arg7[%c20, %c0_49] : memref<328x128xf32, #tpu.memory_space<vmem>>, vector<288x128xf32>
    %46 = arith.truncf %45 : vector<288x128xf32> to vector<288x128xbf16>
    %c5 = arith.constant 5 : index
    %c0_50 = arith.constant 0 : index
    %c0_51 = arith.constant 0 : index
    %47 = vector.load %arg3[%c5, %c0_50, %c0_51] : memref<9x128x128xbf16, #tpu.memory_space<vmem>>, vector<1x128x128xbf16>
    %48 = vector.shape_cast %47 : vector<1x128x128xbf16> to vector<128x128xbf16>
    %cst_52 = arith.constant dense<0.000000e+00> : vector<288x128xf32>
    %49 = tpu.matmul %46, %48, %cst_52 {dimension_numbers = #tpu.dot_dimension_numbers<[1], [0], [0], [1], [0, 0, 1, 1], [], []>} : vector<288x128xbf16>, vector<128x128xbf16>, vector<288x128xf32> -> vector<288x128xf32>
    %c0_53 = arith.constant 0 : index
    %c0_54 = arith.constant 0 : index
    %50 = vector.load %arg8[%c0_53, %c0_54] : memref<288x128xf32, #tpu.memory_space<vmem>>, vector<288x128xf32>
    %51 = arith.addf %50, %49 : vector<288x128xf32>
    %c0_55 = arith.constant 0 : index
    %c0_56 = arith.constant 0 : index
    %52 = vector.load %arg8[%c0_55, %c0_56] : memref<288x128xf32, #tpu.memory_space<vmem>>, vector<288x128xf32>
    tpu.vector_store %arg8[%c0_55, %c0_56], %51 {strides = array<i32>} : memref<288x128xf32, #tpu.memory_space<vmem>>, vector<288x128xf32>,
    %c36 = arith.constant 36 : index
    %c0_57 = arith.constant 0 : index
    %53 = vector.load %arg7[%c36, %c0_57] : memref<328x128xf32, #tpu.memory_space<vmem>>, vector<288x128xf32>
    %54 = arith.truncf %53 : vector<288x128xf32> to vector<288x128xbf16>
    %c6 = arith.constant 6 : index
    %c0_58 = arith.constant 0 : index
    %c0_59 = arith.constant 0 : index
    %55 = vector.load %arg3[%c6, %c0_58, %c0_59] : memref<9x128x128xbf16, #tpu.memory_space<vmem>>, vector<1x128x128xbf16>
    %56 = vector.shape_cast %55 : vector<1x128x128xbf16> to vector<128x128xbf16>
    %cst_60 = arith.constant dense<0.000000e+00> : vector<288x128xf32>
    %57 = tpu.matmul %54, %56, %cst_60 {dimension_numbers = #tpu.dot_dimension_numbers<[1], [0], [0], [1], [0, 0, 1, 1], [], []>} : vector<288x128xbf16>, vector<128x128xbf16>, vector<288x128xf32> -> vector<288x128xf32>
    %c0_61 = arith.constant 0 : index
    %c0_62 = arith.constant 0 : index
    %58 = vector.load %arg8[%c0_61, %c0_62] : memref<288x128xf32, #tpu.memory_space<vmem>>, vector<288x128xf32>
    %59 = arith.addf %58, %57 : vector<288x128xf32>
    %c0_63 = arith.constant 0 : index
    %c0_64 = arith.constant 0 : index
    %60 = vector.load %arg8[%c0_63, %c0_64] : memref<288x128xf32, #tpu.memory_space<vmem>>, vector<288x128xf32>
    tpu.vector_store %arg8[%c0_63, %c0_64], %59 {strides = array<i32>} : memref<288x128xf32, #tpu.memory_space<vmem>>, vector<288x128xf32>,
    %c37 = arith.constant 37 : index
    %c0_65 = arith.constant 0 : index
    %61 = vector.load %arg7[%c37, %c0_65] : memref<328x128xf32, #tpu.memory_space<vmem>>, vector<288x128xf32>
    %62 = arith.truncf %61 : vector<288x128xf32> to vector<288x128xbf16>
    %c7 = arith.constant 7 : index
    %c0_66 = arith.constant 0 : index
    %c0_67 = arith.constant 0 : index
    %63 = vector.load %arg3[%c7, %c0_66, %c0_67] : memref<9x128x128xbf16, #tpu.memory_space<vmem>>, vector<1x128x128xbf16>
    %64 = vector.shape_cast %63 : vector<1x128x128xbf16> to vector<128x128xbf16>
    %cst_68 = arith.constant dense<0.000000e+00> : vector<288x128xf32>
    %65 = tpu.matmul %62, %64, %cst_68 {dimension_numbers = #tpu.dot_dimension_numbers<[1], [0], [0], [1], [0, 0, 1, 1], [], []>} : vector<288x128xbf16>, vector<128x128xbf16>, vector<288x128xf32> -> vector<288x128xf32>
    %c0_69 = arith.constant 0 : index
    %c0_70 = arith.constant 0 : index
    %66 = vector.load %arg8[%c0_69, %c0_70] : memref<288x128xf32, #tpu.memory_space<vmem>>, vector<288x128xf32>
    %67 = arith.addf %66, %65 : vector<288x128xf32>
    %c0_71 = arith.constant 0 : index
    %c0_72 = arith.constant 0 : index
    %68 = vector.load %arg8[%c0_71, %c0_72] : memref<288x128xf32, #tpu.memory_space<vmem>>, vector<288x128xf32>
    tpu.vector_store %arg8[%c0_71, %c0_72], %67 {strides = array<i32>} : memref<288x128xf32, #tpu.memory_space<vmem>>, vector<288x128xf32>,
    %c38 = arith.constant 38 : index
    %c0_73 = arith.constant 0 : index
    %69 = vector.load %arg7[%c38, %c0_73] : memref<328x128xf32, #tpu.memory_space<vmem>>, vector<288x128xf32>
    %70 = arith.truncf %69 : vector<288x128xf32> to vector<288x128xbf16>
    %c8 = arith.constant 8 : index
    %c0_74 = arith.constant 0 : index
    %c0_75 = arith.constant 0 : index
    %71 = vector.load %arg3[%c8, %c0_74, %c0_75] : memref<9x128x128xbf16, #tpu.memory_space<vmem>>, vector<1x128x128xbf16>
    %72 = vector.shape_cast %71 : vector<1x128x128xbf16> to vector<128x128xbf16>
    %cst_76 = arith.constant dense<0.000000e+00> : vector<288x128xf32>
    %73 = tpu.matmul %70, %72, %cst_76 {dimension_numbers = #tpu.dot_dimension_numbers<[1], [0], [0], [1], [0, 0, 1, 1], [], []>} : vector<288x128xbf16>, vector<128x128xbf16>, vector<288x128xf32> -> vector<288x128xf32>
    %c0_77 = arith.constant 0 : index
    %c0_78 = arith.constant 0 : index
    %74 = vector.load %arg8[%c0_77, %c0_78] : memref<288x128xf32, #tpu.memory_space<vmem>>, vector<288x128xf32>
    %75 = arith.addf %74, %73 : vector<288x128xf32>
    %c0_79 = arith.constant 0 : index
    %c0_80 = arith.constant 0 : index
    %76 = vector.load %arg8[%c0_79, %c0_80] : memref<288x128xf32, #tpu.memory_space<vmem>>, vector<288x128xf32>
    tpu.vector_store %arg8[%c0_79, %c0_80], %75 {strides = array<i32>} : memref<288x128xf32, #tpu.memory_space<vmem>>, vector<288x128xf32>,
    %c0_81 = arith.constant 0 : index
    %c0_82 = arith.constant 0 : index
    %77 = vector.load %arg8[%c0_81, %c0_82] : memref<288x128xf32, #tpu.memory_space<vmem>>, vector<288x128xf32>
    %cst_83 = arith.constant 0.000000e+00 : f32
    %78 = vector.broadcast %cst_83 : f32 to vector<288x128xf32>
    %79 = arith.maximumf %77, %78 : vector<288x128xf32>
    %c0_84 = arith.constant 0 : index
    %c0_85 = arith.constant 0 : index
    %80 = vector.load %arg4[%c0_84, %c0_85] : memref<128x256xf32, #tpu.memory_space<vmem>>, vector<128x256xf32>
    %cst_86 = arith.constant dense<0.000000e+00> : vector<288x256xf32>
    %81 = tpu.matmul %79, %80, %cst_86 {dimension_numbers = #tpu.dot_dimension_numbers<[1], [0], [0], [1], [0, 0, 1, 1], [], []>} : vector<288x128xf32>, vector<128x256xf32>, vector<288x256xf32> -> vector<288x256xf32>
    %c0_87 = arith.constant 0 : index
    %c19_88 = arith.constant 19 : index
    %c0_89 = arith.constant 0 : index
    %82 = vector.load %arg1[%c0_87, %c19_88, %c0_89] : memref<1x328x64xf32, #tpu.memory_space<vmem>>, vector<1x288x64xf32>
    %83 = vector.shape_cast %82 : vector<1x288x64xf32> to vector<288x64xf32>
    %c0_90 = arith.constant 0 : index
    %c0_91 = arith.constant 0 : index
    %84 = vector.load %arg5[%c0_90, %c0_91] : memref<64x256xf32, #tpu.memory_space<vmem>>, vector<64x256xf32>
    %cst_92 = arith.constant dense<0.000000e+00> : vector<288x256xf32>
    %85 = tpu.matmul %83, %84, %cst_92 {dimension_numbers = #tpu.dot_dimension_numbers<[1], [0], [0], [1], [0, 0, 1, 1], [], []>} : vector<288x64xf32>, vector<64x256xf32>, vector<288x256xf32> -> vector<288x256xf32>
    %86 = arith.addf %81, %85 : vector<288x256xf32>
    %cst_93 = arith.constant 0.000000e+00 : f32
    %87 = vector.broadcast %cst_93 : f32 to vector<288x256xf32>
    %88 = arith.maximumf %86, %87 : vector<288x256xf32>
    %89 = vector.extract_strided_slice %88 {offsets = [0, 0], sizes = [16, 256], strides = [1, 1]} : vector<288x256xf32> to vector<16x256xf32>
    %c0_94 = arith.constant 0 : index
    %c0_95 = arith.constant 0 : index
    %c0_96 = arith.constant 0 : index
    %90 = vector.load %arg6[%c0_94, %c0_95, %c0_96] : memref<1x256x256xf32, #tpu.memory_space<vmem>>, vector<1x16x256xf32>
    %91 = vector.shape_cast %90 : vector<1x16x256xf32> to vector<16x256xf32>
    %92 = vector.shape_cast %89 : vector<16x256xf32> to vector<1x16x256xf32>
    tpu.vector_store %arg6[%c0_94, %c0_95, %c0_96], %92 {strides = array<i32>} : memref<1x256x256xf32, #tpu.memory_space<vmem>>, vector<1x16x256xf32>,
    %93 = vector.extract_strided_slice %88 {offsets = [18, 0], sizes = [16, 256], strides = [1, 1]} : vector<288x256xf32> to vector<16x256xf32>
    %c0_97 = arith.constant 0 : index
    %c16 = arith.constant 16 : index
    %c0_98 = arith.constant 0 : index
    %94 = vector.load %arg6[%c0_97, %c16, %c0_98] : memref<1x256x256xf32, #tpu.memory_space<vmem>>, vector<1x16x256xf32>
    %95 = vector.shape_cast %94 : vector<1x16x256xf32> to vector<16x256xf32>
    %96 = vector.shape_cast %93 : vector<16x256xf32> to vector<1x16x256xf32>
    tpu.vector_store %arg6[%c0_97, %c16, %c0_98], %96 {strides = array<i32>} : memref<1x256x256xf32, #tpu.memory_space<vmem>>, vector<1x16x256xf32>,
    %97 = vector.extract_strided_slice %88 {offsets = [36, 0], sizes = [16, 256], strides = [1, 1]} : vector<288x256xf32> to vector<16x256xf32>
    %c0_99 = arith.constant 0 : index
    %c32 = arith.constant 32 : index
    %c0_100 = arith.constant 0 : index
    %98 = vector.load %arg6[%c0_99, %c32, %c0_100] : memref<1x256x256xf32, #tpu.memory_space<vmem>>, vector<1x16x256xf32>
    %99 = vector.shape_cast %98 : vector<1x16x256xf32> to vector<16x256xf32>
    %100 = vector.shape_cast %97 : vector<16x256xf32> to vector<1x16x256xf32>
    tpu.vector_store %arg6[%c0_99, %c32, %c0_100], %100 {strides = array<i32>} : memref<1x256x256xf32, #tpu.memory_space<vmem>>, vector<1x16x256xf32>,
    %101 = vector.extract_strided_slice %88 {offsets = [54, 0], sizes = [16, 256], strides = [1, 1]} : vector<288x256xf32> to vector<16x256xf32>
    %c0_101 = arith.constant 0 : index
    %c48 = arith.constant 48 : index
    %c0_102 = arith.constant 0 : index
    %102 = vector.load %arg6[%c0_101, %c48, %c0_102] : memref<1x256x256xf32, #tpu.memory_space<vmem>>, vector<1x16x256xf32>
    %103 = vector.shape_cast %102 : vector<1x16x256xf32> to vector<16x256xf32>
    %104 = vector.shape_cast %101 : vector<16x256xf32> to vector<1x16x256xf32>
    tpu.vector_store %arg6[%c0_101, %c48, %c0_102], %104 {strides = array<i32>} : memref<1x256x256xf32, #tpu.memory_space<vmem>>, vector<1x16x256xf32>,
    %105 = vector.extract_strided_slice %88 {offsets = [72, 0], sizes = [16, 256], strides = [1, 1]} : vector<288x256xf32> to vector<16x256xf32>
    %c0_103 = arith.constant 0 : index
    %c64 = arith.constant 64 : index
    %c0_104 = arith.constant 0 : index
    %106 = vector.load %arg6[%c0_103, %c64, %c0_104] : memref<1x256x256xf32, #tpu.memory_space<vmem>>, vector<1x16x256xf32>
    %107 = vector.shape_cast %106 : vector<1x16x256xf32> to vector<16x256xf32>
    %108 = vector.shape_cast %105 : vector<16x256xf32> to vector<1x16x256xf32>
    tpu.vector_store %arg6[%c0_103, %c64, %c0_104], %108 {strides = array<i32>} : memref<1x256x256xf32, #tpu.memory_space<vmem>>, vector<1x16x256xf32>,
    %109 = vector.extract_strided_slice %88 {offsets = [90, 0], sizes = [16, 256], strides = [1, 1]} : vector<288x256xf32> to vector<16x256xf32>
    %c0_105 = arith.constant 0 : index
    %c80 = arith.constant 80 : index
    %c0_106 = arith.constant 0 : index
    %110 = vector.load %arg6[%c0_105, %c80, %c0_106] : memref<1x256x256xf32, #tpu.memory_space<vmem>>, vector<1x16x256xf32>
    %111 = vector.shape_cast %110 : vector<1x16x256xf32> to vector<16x256xf32>
    %112 = vector.shape_cast %109 : vector<16x256xf32> to vector<1x16x256xf32>
    tpu.vector_store %arg6[%c0_105, %c80, %c0_106], %112 {strides = array<i32>} : memref<1x256x256xf32, #tpu.memory_space<vmem>>, vector<1x16x256xf32>,
    %113 = vector.extract_strided_slice %88 {offsets = [108, 0], sizes = [16, 256], strides = [1, 1]} : vector<288x256xf32> to vector<16x256xf32>
    %c0_107 = arith.constant 0 : index
    %c96 = arith.constant 96 : index
    %c0_108 = arith.constant 0 : index
    %114 = vector.load %arg6[%c0_107, %c96, %c0_108] : memref<1x256x256xf32, #tpu.memory_space<vmem>>, vector<1x16x256xf32>
    %115 = vector.shape_cast %114 : vector<1x16x256xf32> to vector<16x256xf32>
    %116 = vector.shape_cast %113 : vector<16x256xf32> to vector<1x16x256xf32>
    tpu.vector_store %arg6[%c0_107, %c96, %c0_108], %116 {strides = array<i32>} : memref<1x256x256xf32, #tpu.memory_space<vmem>>, vector<1x16x256xf32>,
    %117 = vector.extract_strided_slice %88 {offsets = [126, 0], sizes = [16, 256], strides = [1, 1]} : vector<288x256xf32> to vector<16x256xf32>
    %c0_109 = arith.constant 0 : index
    %c112 = arith.constant 112 : index
    %c0_110 = arith.constant 0 : index
    %118 = vector.load %arg6[%c0_109, %c112, %c0_110] : memref<1x256x256xf32, #tpu.memory_space<vmem>>, vector<1x16x256xf32>
    %119 = vector.shape_cast %118 : vector<1x16x256xf32> to vector<16x256xf32>
    %120 = vector.shape_cast %117 : vector<16x256xf32> to vector<1x16x256xf32>
    tpu.vector_store %arg6[%c0_109, %c112, %c0_110], %120 {strides = array<i32>} : memref<1x256x256xf32, #tpu.memory_space<vmem>>, vector<1x16x256xf32>,
    %121 = vector.extract_strided_slice %88 {offsets = [144, 0], sizes = [16, 256], strides = [1, 1]} : vector<288x256xf32> to vector<16x256xf32>
    %c0_111 = arith.constant 0 : index
    %c128 = arith.constant 128 : index
    %c0_112 = arith.constant 0 : index
    %122 = vector.load %arg6[%c0_111, %c128, %c0_112] : memref<1x256x256xf32, #tpu.memory_space<vmem>>, vector<1x16x256xf32>
    %123 = vector.shape_cast %122 : vector<1x16x256xf32> to vector<16x256xf32>
    %124 = vector.shape_cast %121 : vector<16x256xf32> to vector<1x16x256xf32>
    tpu.vector_store %arg6[%c0_111, %c128, %c0_112], %124 {strides = array<i32>} : memref<1x256x256xf32, #tpu.memory_space<vmem>>, vector<1x16x256xf32>,
    %125 = vector.extract_strided_slice %88 {offsets = [162, 0], sizes = [16, 256], strides = [1, 1]} : vector<288x256xf32> to vector<16x256xf32>
    %c0_113 = arith.constant 0 : index
    %c144 = arith.constant 144 : index
    %c0_114 = arith.constant 0 : index
    %126 = vector.load %arg6[%c0_113, %c144, %c0_114] : memref<1x256x256xf32, #tpu.memory_space<vmem>>, vector<1x16x256xf32>
    %127 = vector.shape_cast %126 : vector<1x16x256xf32> to vector<16x256xf32>
    %128 = vector.shape_cast %125 : vector<16x256xf32> to vector<1x16x256xf32>
    tpu.vector_store %arg6[%c0_113, %c144, %c0_114], %128 {strides = array<i32>} : memref<1x256x256xf32, #tpu.memory_space<vmem>>, vector<1x16x256xf32>,
    %129 = vector.extract_strided_slice %88 {offsets = [180, 0], sizes = [16, 256], strides = [1, 1]} : vector<288x256xf32> to vector<16x256xf32>
    %c0_115 = arith.constant 0 : index
    %c160 = arith.constant 160 : index
    %c0_116 = arith.constant 0 : index
    %130 = vector.load %arg6[%c0_115, %c160, %c0_116] : memref<1x256x256xf32, #tpu.memory_space<vmem>>, vector<1x16x256xf32>
    %131 = vector.shape_cast %130 : vector<1x16x256xf32> to vector<16x256xf32>
    %132 = vector.shape_cast %129 : vector<16x256xf32> to vector<1x16x256xf32>
    tpu.vector_store %arg6[%c0_115, %c160, %c0_116], %132 {strides = array<i32>} : memref<1x256x256xf32, #tpu.memory_space<vmem>>, vector<1x16x256xf32>,
    %133 = vector.extract_strided_slice %88 {offsets = [198, 0], sizes = [16, 256], strides = [1, 1]} : vector<288x256xf32> to vector<16x256xf32>
    %c0_117 = arith.constant 0 : index
    %c176 = arith.constant 176 : index
    %c0_118 = arith.constant 0 : index
    %134 = vector.load %arg6[%c0_117, %c176, %c0_118] : memref<1x256x256xf32, #tpu.memory_space<vmem>>, vector<1x16x256xf32>
    %135 = vector.shape_cast %134 : vector<1x16x256xf32> to vector<16x256xf32>
    %136 = vector.shape_cast %133 : vector<16x256xf32> to vector<1x16x256xf32>
    tpu.vector_store %arg6[%c0_117, %c176, %c0_118], %136 {strides = array<i32>} : memref<1x256x256xf32, #tpu.memory_space<vmem>>, vector<1x16x256xf32>,
    %137 = vector.extract_strided_slice %88 {offsets = [216, 0], sizes = [16, 256], strides = [1, 1]} : vector<288x256xf32> to vector<16x256xf32>
    %c0_119 = arith.constant 0 : index
    %c192 = arith.constant 192 : index
    %c0_120 = arith.constant 0 : index
    %138 = vector.load %arg6[%c0_119, %c192, %c0_120] : memref<1x256x256xf32, #tpu.memory_space<vmem>>, vector<1x16x256xf32>
    %139 = vector.shape_cast %138 : vector<1x16x256xf32> to vector<16x256xf32>
    %140 = vector.shape_cast %137 : vector<16x256xf32> to vector<1x16x256xf32>
    tpu.vector_store %arg6[%c0_119, %c192, %c0_120], %140 {strides = array<i32>} : memref<1x256x256xf32, #tpu.memory_space<vmem>>, vector<1x16x256xf32>,
    %141 = vector.extract_strided_slice %88 {offsets = [234, 0], sizes = [16, 256], strides = [1, 1]} : vector<288x256xf32> to vector<16x256xf32>
    %c0_121 = arith.constant 0 : index
    %c208 = arith.constant 208 : index
    %c0_122 = arith.constant 0 : index
    %142 = vector.load %arg6[%c0_121, %c208, %c0_122] : memref<1x256x256xf32, #tpu.memory_space<vmem>>, vector<1x16x256xf32>
    %143 = vector.shape_cast %142 : vector<1x16x256xf32> to vector<16x256xf32>
    %144 = vector.shape_cast %141 : vector<16x256xf32> to vector<1x16x256xf32>
    tpu.vector_store %arg6[%c0_121, %c208, %c0_122], %144 {strides = array<i32>} : memref<1x256x256xf32, #tpu.memory_space<vmem>>, vector<1x16x256xf32>,
    %145 = vector.extract_strided_slice %88 {offsets = [252, 0], sizes = [16, 256], strides = [1, 1]} : vector<288x256xf32> to vector<16x256xf32>
    %c0_123 = arith.constant 0 : index
    %c224 = arith.constant 224 : index
    %c0_124 = arith.constant 0 : index
    %146 = vector.load %arg6[%c0_123, %c224, %c0_124] : memref<1x256x256xf32, #tpu.memory_space<vmem>>, vector<1x16x256xf32>
    %147 = vector.shape_cast %146 : vector<1x16x256xf32> to vector<16x256xf32>
    %148 = vector.shape_cast %145 : vector<16x256xf32> to vector<1x16x256xf32>
    tpu.vector_store %arg6[%c0_123, %c224, %c0_124], %148 {strides = array<i32>} : memref<1x256x256xf32, #tpu.memory_space<vmem>>, vector<1x16x256xf32>,
    %149 = vector.extract_strided_slice %88 {offsets = [270, 0], sizes = [16, 256], strides = [1, 1]} : vector<288x256xf32> to vector<16x256xf32>
    %c0_125 = arith.constant 0 : index
    %c240 = arith.constant 240 : index
    %c0_126 = arith.constant 0 : index
    %150 = vector.load %arg6[%c0_125, %c240, %c0_126] : memref<1x256x256xf32, #tpu.memory_space<vmem>>, vector<1x16x256xf32>
    %151 = vector.shape_cast %150 : vector<1x16x256xf32> to vector<16x256xf32>
    %152 = vector.shape_cast %149 : vector<16x256xf32> to vector<1x16x256xf32>
    tpu.vector_store %arg6[%c0_125, %c240, %c0_126], %152 {strides = array<i32>} : memref<1x256x256xf32, #tpu.memory_space<vmem>>, vector<1x16x256xf32>,
    return
  }
  func.func @transform_0(%arg0: i32) -> (i32, i32, i32) {
    %c0_i32 = arith.constant 0 : i32
    %c0_i32_0 = arith.constant 0 : i32
    %c0_i32_1 = arith.constant 0 : i32
    return %arg0, %c0_i32, %c0_i32_0 : i32, i32, i32
  }
  func.func @transform_1(%arg0: i32) -> (i32, i32) {
    %c0_i32 = arith.constant 0 : i32
    %c0_i32_0 = arith.constant 0 : i32
    %c0_i32_1 = arith.constant 0 : i32
    return %c0_i32, %c0_i32_0 : i32, i32
  }
  func.func @transform_2(%arg0: i32) -> (i32, i32, i32) {
    %c0_i32 = arith.constant 0 : i32
    %c0_i32_0 = arith.constant 0 : i32
    %c0_i32_1 = arith.constant 0 : i32
    %c0_i32_2 = arith.constant 0 : i32
    return %c0_i32, %c0_i32_0, %c0_i32_1 : i32, i32, i32
  }
  func.func @transform_3(%arg0: i32) -> (i32, i32) {
    %c0_i32 = arith.constant 0 : i32
    %c0_i32_0 = arith.constant 0 : i32
    %c0_i32_1 = arith.constant 0 : i32
    return %c0_i32, %c0_i32_0 : i32, i32
  }
  func.func @transform_4(%arg0: i32) -> (i32, i32) {
    %c0_i32 = arith.constant 0 : i32
    %c0_i32_0 = arith.constant 0 : i32
    %c0_i32_1 = arith.constant 0 : i32
    return %c0_i32, %c0_i32_0 : i32, i32
  }
  func.func @transform_5(%arg0: i32) -> (i32, i32, i32) {
    %c0_i32 = arith.constant 0 : i32
    %c0_i32_0 = arith.constant 0 : i32
    %c0_i32_1 = arith.constant 0 : i32
    return %arg0, %c0_i32, %c0_i32_0 : i32, i32, i32
  }
}

</mosaic_0001>

<bundles_post_ra>
// kernel: tpu_custom_call.1
= control target key start
LH: loop header
LB: loop body
LE: loop exit
PB: predicated region body
PF: predicated region fallthrough
CT: control target
= control target key end

     0   :  { %10 = vsyncpa [#allocation5], 0  ;;  %s7190_s0 = inlined_call_operand.vmem [shape: f32[2,328,64], index: 0, kind: input, shape index: {}]   ;;  %s7191_s1 = inlined_call_operand.vmem [shape: f32[64,128], index: 1, kind: input, shape index: {}]   ;;  %s7192_s2 = inlined_call_operand.vmem [shape: bf16[9,128,128], index: 2, kind: input, shape index: {}]   ;;  %s7193_s3 = inlined_call_operand.vmem [shape: f32[128,256], index: 3, kind: input, shape index: {}]   ;;  %s7194_s4 = inlined_call_operand.vmem [shape: f32[64,256], index: 4, kind: input, shape index: {}]   ;;  %s7195_s5 = inlined_call_operand.hbm [shape: f32[2,256,256], index: 5, kind: output, shape index: {}]  }
   0x1   :  { %12 = vsyncpa [#allocation5 + $0x1], 0  ;;  %s5476_s18 = smov 0   ;;  %s5478_s19 = smov 0  }
   0x2   :  { %s5480_s20 = smov 0   ;;  %s5482_s21 = smov 0  }
   0x3 LB: > { %s5497_s22 = sadd.s32 4294967295, %s5442_s21   ;;  %s4684_s23 = sadd.s32 4294967294, %s5442_s21   ;;  %s5442_s21 = sphi %s5482_s21, %s7367_s21   ;;  %s5438_s20 = sphi %s5480_s20, %s7366_s20   ;;  %s5434_s19 = sphi %s5478_s19, %s7365_s19   ;;  %s5430_s18 = sphi %s5476_s18, %s7364_s18  }
   0x4   : > { %s5501_s24 = sadd.s32 1, %s5442_s21   ;;  %s135_s25 = sadd.s32 1, %s5438_s20 }
   0x5   : > { %s132_s26 = ssub.s32 %s5442_s21, %s5501_s24  ;;  %p145_p0 = scmp.ne.s32.totalorder %s5438_s20, %s5434_s19 }
   0x6   : > { %p133_p1 = scmp.eq.s32.totalorder %s132_s26, 0  ;;  %p146_p2 = scmp.eq.s32.totalorder %s5497_s22, 1 }
   0x7   : > { %p151_p3 = scmp.ne.s32.totalorder %s5434_s19, %s5430_s18  ;;  %p152_p4 = scmp.eq.s32.totalorder %s4684_s23, 1 }
   0x8   : > { %s5512_s27 = scalar_select %p133_p1, %s5438_s20, %s135_s25  }
   0x9   : > { %p5514_p5 = por %p146_p2, %p145_p0  ;;  %p5518_p6 = por %p152_p4, %p151_p3 }
   0xa   : > { %p4687_p7 = scmp.ge.s32.totalorder %s5442_s21, 1  ;;  %p190_p8 = scmp.lt.s32.totalorder %s5442_s21, 3 }
   0xc   : > { %p191_p9 = pnand %p4687_p7, %p190_p8 }
   0xe   : > { %194 = sbr.rel (%p191_p9) target bundleno = 1469 (0x5bd), region = 40 }
  0x13   : > { %v271_v0 = vld [vmem:[%s7191_s1 + $0x38] sm:$0xff]  ;;  %v270_v1 = vld [vmem:[%s7191_s1 + $0x30] sm:$0xff]  ;;  %p218_p10 = scmp.lt.s32.totalorder %s5497_s22, 1  ;;  %v269_v2 = vld [vmem:[%s7191_s1 + $0x28] sm:$0xff]  ;;  %vm272_vm0 = vcmask 523264   ;;  %vm4325_vm1 = vcmask 1045504  }
  0x14   : > { %404 = vmatpush.msra.mxu0 %v271_v0  ;;  %v268_v3 = vld [vmem:[%s7191_s1 + $0x20] sm:$0xff]  ;;  %v267_v4 = vld [vmem:[%s7191_s1 + $0x18] sm:$0xff]  ;;  %v266_v5 = vld [vmem:[%s7191_s1 + $0x10] sm:$0xff]  ;;  %vm4348_vm2 = vcmask 1043456   ;;  %vm4371_vm3 = vcmask 1041408   ;;  %s5296_s14 = sshll.u32 %s5497_s22, 9 }
  0x15   : > { %s219_s11 = scalar_select %p218_p10, %s5497_s22, 1  ;;  %v265_v6 = vld [vmem:[%s7191_s1 + $0x8] sm:$0xff]  ;;  %v264_v7 = vld [vmem:[%s7191_s1] sm:$0xff]  ;;  %v5231_v18 = vld [vmem:[%s7192_s2 + $0x38] sm:$0xff] }
  0x16   : > { %405 = vmatpush.msra.mxu0 %v270_v1  ;;  %736 = vmatpush.bf16.msra.mxu1 %v5231_v18  ;;  %v5230_v20 = vld [vmem:[%s7192_s2 + $0x30] sm:$0xff]  ;;  %v5229_v21 = vld [vmem:[%s7192_s2 + $0x28] sm:$0xff]  ;;  %v5228_v23 = vld [vmem:[%s7192_s2 + $0x20] sm:$0xff]  ;;  %s4618_s17 = scalar_lea.hbm %s7195_s5, %s5296_s14  ;;  %s5400_s9 = scalar_lea.hbm %s7195_s5, 1024 }
  0x17   : > { %s5337_s16 = smul.u32 328, %s219_s11  ;;  %v5247_v24 = vld [vmem:[%s7192_s2 + $0xb8] sm:$0xff]  ;;  %v5246_v27 = vld [vmem:[%s7192_s2 + $0xb0] sm:$0xff]  ;;  %v5245_v29 = vld [vmem:[%s7192_s2 + $0xa8] sm:$0xff]  ;;  %s4621_s25 = sshll.u32 %s4618_s17, 4  ;;  %s4622_s25 = int_to_ptr.hbm [resolvable:$true] %s4621_s25 }
  0x18   : > { %406 = vmatpush.msra.mxu0 %v269_v2  ;;  %v5227_v25 = vld [vmem:[%s7192_s2 + $0x18] sm:$0xff]  ;;  %1316 = vmatpush.bf16.msra.mxu3 %v5247_v24  ;;  %v5226_v28 = vld [vmem:[%s7192_s2 + $0x10] sm:$0xff]  ;;  %v5225_v30 = vld [vmem:[%s7192_s2 + $0x8] sm:$0xff]  ;;  %s5394_s26 = sshra.s32 %s4622_s25, 4  ;;  %s5395_s26 = int_to_ptr.hbm [resolvable:$true] %s5394_s26 }
  0x19   : > { %s5550_s7 = scalar_lea.vmem %s7190_s0, %s5337_s16  ;;  %v5244_v32 = vld [vmem:[%s7192_s2 + $0xa0] sm:$0xff]  ;;  %v5243_v34 = vld [vmem:[%s7192_s2 + $0x98] sm:$0xff]  ;;  %v5242_v36 = vld [vmem:[%s7192_s2 + $0x90] sm:$0xff]  ;;  %s5396_s30 = scalar_lea.hbm %s5395_s26, 512 }
  0x1a   : > { %407 = vmatpush.msra.mxu0 %v268_v3  ;;  %v223_v8 = vld [vmem:[%s5550_s7] sm:$0xff]  ;;  %v224_v9 = vld [vmem:[%s5550_s7 + $0x8] sm:$0xff]  ;;  %v225_v10 = vld [vmem:[%s5550_s7 + $0x10] sm:$0xff]  ;;  %737 = vmatpush.bf16.msra.mxu1 %v5230_v20  ;;  %p5397_p11 = scmp.ne.s32.totalorder %s5395_s26, %s5396_s30  ;;  %p5401_p0 = scmp.lt.s32.totalorder %s5395_s26, %s7195_s5 }
  0x1b   : > { %v226_v11 = vld [vmem:[%s5550_s7 + $0x18] sm:$0xff]  ;;  %v227_v12 = vld [vmem:[%s5550_s7 + $0x20] sm:$0xff]  ;;  %v228_v13 = vld [vmem:[%s5550_s7 + $0x28] sm:$0xff]  ;;  %p5402_p1 = scmp.lt.s32.totalorder %s5400_s9, %s5396_s30 }
  0x1c   : > { %408 = vmatpush.msra.mxu0 %v267_v4  ;;  %v229_v14 = vld [vmem:[%s5550_s7 + $0x30] sm:$0xff]  ;;  %v230_v15 = vld [vmem:[%s5550_s7 + $0x38] sm:$0xff]  ;;  %v231_v16 = vld [vmem:[%s5550_s7 + $0x40] sm:$0xff]  ;;  %1317 = vmatpush.bf16.msra.mxu3 %v5246_v27  ;;  %p5398_p12 = pnand %p5397_p11, %p5514_p5 }
  0x1d   : > { %v232_v17 = vld [vmem:[%s5550_s7 + $0x48] sm:$0xff]  ;;  %v233_v19 = vld [vmem:[%s5550_s7 + $0x50] sm:$0xff]  ;;  %v234_v22 = vld [vmem:[%s5550_s7 + $0x58] sm:$0xff]  ;;  %p5403_p2 = por %p5402_p1, %p5401_p0 }
  0x1e   : > { %409 = vmatpush.msra.mxu0 %v266_v5  ;;  %738 = vmatpush.bf16.msra.mxu1 %v5229_v21  ;;  %v235_v26 = vld [vmem:[%s5550_s7 + $0x60] sm:$0xff]  ;;  %v236_v31 = vld [vmem:[%s5550_s7 + $0x68] sm:$0xff]  ;;  %v237_v35 = vld [vmem:[%s5550_s7 + $0x70] sm:$0xff]  ;;  %p5399_p13 = pneg %p5398_p12 }
  0x1f   : > { %v5224_v33 = vld [vmem:[%s7192_s2] sm:$0xff]  ;;  %v5241_v37 = vld [vmem:[%s7192_s2 + $0x88] sm:$0xff]  ;;  %v238_v38 = vld [vmem:[%s5550_s7 + $0x78] sm:$0xff] }
  0x20   : > { %410 = vmatpush.msra.mxu0 %v265_v6  ;;  %1318 = vmatpush.bf16.msra.mxu3 %v5245_v29  ;;  %v5240_v39 = vld [vmem:[%s7192_s2 + $0x80] sm:$0xff]  ;;  %v240_v44 = vld [vmem:[%s5550_s7 + $0x88] sm:$0xff]  ;;  %v241_v48 = vld [vmem:[%s5550_s7 + $0x90] sm:$0xff]  ;;  %p5404_p3 = pnand %p5403_p2, %p5399_p13 }
  0x21   : > { %v239_v41 = vld [vmem:[%s5550_s7 + $0x80] sm:$0xff]  ;;  %v242_v51 = vld [vmem:[%s5550_s7 + $0x98] sm:$0xff]  ;;  %v244_v61 = vld [vmem:[%s5550_s7 + $0xa8] sm:$0xff] }
  0x22   : > { %411 = vmatpush.msra.mxu0 %v264_v7  ;;  %739 = vmatpush.bf16.msra.mxu1 %v5228_v23  ;;  %v243_v58 = vld [vmem:[%s5550_s7 + $0xa0] sm:$0xff]  ;;  %v245_v4 = vld [vmem:[%s5550_s7 + $0xb0] sm:$0xff]  ;;  %v246_v7 = vld [vmem:[%s5550_s7 + $0xb8] sm:$0xff] }
  0x23   : > { %4690 = vmatmul.msk.f32.vlgmr.msra.gmra.mxu0 %vm272_vm0, %v223_v8  ;;  %v249_v24 = vld [vmem:[%s5550_s7 + $0xd0] sm:$0xff]  ;;  %v250_v27 = vld [vmem:[%s5550_s7 + $0xd8] sm:$0xff] }
  0x24   : > { %1319 = vmatpush.bf16.msra.mxu3 %v5244_v32 }
  0x26   : > { %740 = vmatpush.bf16.msra.mxu1 %v5227_v25 }
  0x28   : > { %1320 = vmatpush.bf16.msra.mxu3 %v5243_v34 }
  0x2a   : > { %741 = vmatpush.bf16.msra.mxu1 %v5226_v28 }
  0x2b   : > { %4691 = vmatmul.msk.f32.gmra.mxu0 %vm272_vm0, %v224_v9 }
  0x2c   : > { %1321 = vmatpush.bf16.msra.mxu3 %v5242_v36  ;;  %v5238_v36 = vld [vmem:[%s7192_s2 + $0x70] sm:$0xff] }
  0x2e   : > { %742 = vmatpush.bf16.msra.mxu1 %v5225_v30 }
  0x30   : > { %1322 = vmatpush.bf16.msra.mxu3 %v5241_v37 }
  0x32   : > { %743 = vmatpush.bf16.msra.mxu1 %v5224_v33  ;;  %v5239_v33 = vld [vmem:[%s7192_s2 + $0x78] sm:$0xff] }
  0x33   : > { %4692 = vmatmul.msk.f32.gmra.mxu0 %vm272_vm0, %v225_v10  ;;  %5297 = vmatpush.bf16.msra.mxu2 %v5239_v33 }
  0x34   : > { %1323 = vmatpush.bf16.msra.mxu3 %v5240_v39  ;;  %990 = vmatpush.bf16.msrb.mxu0 %v5239_v33 }
  0x37   : > { %5298 = vmatpush.bf16.msra.mxu2 %v5238_v36 }
  0x38   : > { %991 = vmatpush.bf16.msrb.mxu0 %v5238_v36 }
  0x3b   : > { %4693 = vmatmul.msk.f32.gmra.mxu0 %vm272_vm0, %v226_v11 }
  0x43   : > { %4694 = vmatmul.msk.f32.gmra.mxu0 %vm272_vm0, %v227_v12 }
  0x4b   : > { %4695 = vmatmul.msk.f32.gmra.mxu0 %vm272_vm0, %v228_v13 }
  0x53   : > { %4696 = vmatmul.msk.f32.gmra.mxu0 %vm272_vm0, %v229_v14  ;;  %v247_v14 = vld [vmem:[%s5550_s7 + $0xc0] sm:$0xff] }
  0x5b   : > { %4697 = vmatmul.msk.f32.gmra.mxu0 %vm272_vm0, %v230_v15 }
  0x63   : > { %4698 = vmatmul.msk.f32.gmra.mxu0 %vm272_vm0, %v231_v16 }
  0x6b   : > { %4699 = vmatmul.msk.f32.gmra.mxu0 %vm272_vm0, %v232_v17  ;;  %v248_v17 = vld [vmem:[%s5550_s7 + $0xc8] sm:$0xff] }
  0x73   : > { %4700 = vmatmul.msk.f32.gmra.mxu0 %vm272_vm0, %v233_v19 }
  0x7b   : > { %4701 = vmatmul.msk.f32.gmra.mxu0 %vm272_vm0, %v234_v22 }
  0x83   : > { %4702 = vmatmul.msk.f32.gmra.mxu0 %vm272_vm0, %v235_v26 }
  0x8b   : > { %4703 = vmatmul.msk.f32.gmra.mxu0 %vm272_vm0, %v236_v31 }
  0x93   : > { %4704 = vmatmul.msk.f32.gmra.mxu0 %vm272_vm0, %v237_v35  ;;  %v251_v35 = vld [vmem:[%s5550_s7 + $0xe0] sm:$0xff] }
  0x9b   : > { %4705 = vmatmul.msk.f32.gmra.mxu0 %vm272_vm0, %v238_v38  ;;  %v5237_v38 = vld [vmem:[%s7192_s2 + $0x68] sm:$0xff] }
  0x9c   : > { %5299 = vmatpush.bf16.msra.mxu2 %v5237_v38  ;;  %992 = vmatpush.bf16.msrb.mxu0 %v5237_v38 }
  0xa0   : > { %v413_v40 = vpop.f32.mrf.mxu0 }
  0xa1   : > { %v536_v42 = vmax.f32 %v413_v40, 0.0  ;;  %v252_v40 = vld [vmem:[%s5550_s7 + $0xe8] sm:$0xff] }
  0xa3   : > { %577 = vst [vmem:[#allocation2] sm:$0xff] %v536_v42  ;;  %4706 = vmatmul.msk.f32.gmra.mxu0 %vm272_vm0, %v239_v41  ;;  %v5236_v41 = vld [vmem:[%s7192_s2 + $0x60] sm:$0xff] }
  0xa4   : > { %5300 = vmatpush.bf16.msra.mxu2 %v5236_v41  ;;  %993 = vmatpush.bf16.msrb.mxu0 %v5236_v41 }
  0xa8   : > { %v416_v43 = vpop.f32.mrf.mxu0 }
  0xa9   : > { %v537_v45 = vmax.f32 %v416_v43, 0.0 }
  0xab   : > { %578 = vst [vmem:[#allocation2 + $0x8] sm:$0xff] %v537_v45  ;;  %4707 = vmatmul.msk.f32.gmra.mxu0 %vm272_vm0, %v240_v44  ;;  %v654_v46 = vpack.c.bf16 %v537_v45, %v536_v42 }
  0xad   : > { %744 = vmatmul.bf16.vlgmr.msra.gmra.mxu1 %v654_v46 }
  0xb0   : > { %v419_v47 = vpop.f32.mrf.mxu0 }
  0xb1   : > { %v538_v49 = vmax.f32 %v419_v47, 0.0  ;;  %v5235_v47 = vld [vmem:[%s7192_s2 + $0x58] sm:$0xff] }
  0xb2   : > { %v1197_v53 = vld [vmem:[#allocation2 + $0x2] sm:$0xff]  ;;  %5301 = vmatpush.bf16.msra.mxu2 %v5235_v47  ;;  %994 = vmatpush.bf16.msrb.mxu0 %v5235_v47 }
  0xb3   : > { %579 = vst [vmem:[#allocation2 + $0x10] sm:$0xff] %v538_v49  ;;  %4708 = vmatmul.msk.f32.gmra.mxu0 %vm272_vm0, %v241_v48 }
  0xb8   : > { %v422_v50 = vpop.f32.mrf.mxu0 }
  0xb9   : > { %v539_v52 = vmax.f32 %v422_v50, 0.0  ;;  %v5234_v50 = vld [vmem:[%s7192_s2 + $0x50] sm:$0xff] }
  0xba   : > { %v1198_v54 = vld [vmem:[#allocation2 + $0xa] sm:$0xff]  ;;  %5302 = vmatpush.bf16.msra.mxu2 %v5234_v50  ;;  %995 = vmatpush.bf16.msrb.mxu0 %v5234_v50 }
  0xbb   : > { %580 = vst [vmem:[#allocation2 + $0x18] sm:$0xff] %v539_v52  ;;  %4709 = vmatmul.msk.f32.gmra.mxu0 %vm272_vm0, %v242_v51  ;;  %v1233_v55 = vpack.c.bf16 %v1198_v54, %v1197_v53  ;;  %v655_v56 = vpack.c.bf16 %v539_v52, %v538_v49  ;;  %v253_v49 = vld [vmem:[%s5550_s7 + $0xf0] sm:$0xff]  ;;  %v5233_v52 = vld [vmem:[%s7192_s2 + $0x48] sm:$0xff]  ;;  %v254_v54 = vld [vmem:[%s5550_s7 + $0xf8] sm:$0xff] }
  0xbd   : > { %1324 = vmatmul.bf16.vlgmr.msra.gmra.mxu3 %v1233_v55  ;;  %749 = vmatmul.bf16.gmra.mxu1 %v655_v56  ;;  %v5232_v55 = vld [vmem:[%s7192_s2 + $0x40] sm:$0xff] }
  0xbe   : > { %5303 = vmatpush.bf16.msra.mxu2 %v5233_v52  ;;  %996 = vmatpush.bf16.msrb.mxu0 %v5233_v52 }
  0xc0   : > { %v425_v57 = vpop.f32.mrf.mxu0 }
  0xc1   : > { %v540_v59 = vmax.f32 %v425_v57, 0.0 }
  0xc2   : > { %v1199_v63 = vld [vmem:[#allocation2 + $0x12] sm:$0xff]  ;;  %5304 = vmatpush.bf16.msra.mxu2 %v5232_v55  ;;  %997 = vmatpush.bf16.msrb.mxu0 %v5232_v55 }
  0xc3   : > { %581 = vst [vmem:[#allocation2 + $0x20] sm:$0xff] %v540_v59  ;;  %4710 = vmatmul.msk.f32.gmra.mxu0 %vm272_vm0, %v243_v58 }
  0xc8   : > { %v428_v60 = vpop.f32.mrf.mxu0 }
  0xc9   : > { %v541_v62 = vmax.f32 %v428_v60, 0.0 }
  0xca   : > { %v1200_v0 = vld [vmem:[#allocation2 + $0x1a] sm:$0xff] }
  0xcb   : > { %582 = vst [vmem:[#allocation2 + $0x28] sm:$0xff] %v541_v62  ;;  %4711 = vmatmul.msk.f32.gmra.mxu0 %vm272_vm0, %v244_v61  ;;  %v1234_v1 = vpack.c.bf16 %v1200_v0, %v1199_v63  ;;  %v656_v2 = vpack.c.bf16 %v541_v62, %v540_v59  ;;  %v5263_v61 = vld [vmem:[%s7192_s2 + $0x138] sm:$0xff]  ;;  %v255_v63 = vld [vmem:[%s5550_s7 + $0x100] sm:$0xff] }
  0xcc   : > { %1968 = vmatpush.bf16.msrb.mxu2 %v5263_v61 }
  0xcd   : > { %1329 = vmatmul.bf16.gmra.mxu3 %v1234_v1  ;;  %754 = vmatmul.bf16.gmra.mxu1 %v656_v2  ;;  %v5271_v1 = vld [vmem:[%s7192_s2 + $0x178] sm:$0xff] }
  0xce   : > { %v5255_v2 = vld [vmem:[%s7192_s2 + $0xf8] sm:$0xff]  ;;  %2294 = vmatpush.bf16.msrb.mxu3 %v5271_v1 }
  0xcf   : > { %1642 = vmatpush.bf16.msrb.mxu1 %v5255_v2 }
  0xd0   : > { %v431_v3 = vpop.f32.mrf.mxu0 }
  0xd1   : > { %v542_v5 = vmax.f32 %v431_v3, 0.0 }
  0xd2   : > { %v1201_v9 = vld [vmem:[#allocation2 + $0x22] sm:$0xff] }
  0xd3   : > { %583 = vst [vmem:[#allocation2 + $0x30] sm:$0xff] %v542_v5  ;;  %4712 = vmatmul.msk.f32.gmra.mxu0 %vm272_vm0, %v245_v4  ;;  %v256_v4 = vld [vmem:[%s5550_s7 + $0x108] sm:$0xff] }
  0xd8   : > { %v434_v6 = vpop.f32.mrf.mxu0 }
  0xd9   : > { %v543_v8 = vmax.f32 %v434_v6, 0.0 }
  0xda   : > { %v1202_v10 = vld [vmem:[#allocation2 + $0x2a] sm:$0xff] }
  0xdb   : > { %584 = vst [vmem:[#allocation2 + $0x38] sm:$0xff] %v543_v8  ;;  %4713 = vmatmul.msk.f32.gmra.mxu0 %vm272_vm0, %v246_v7  ;;  %v1235_v11 = vpack.c.bf16 %v1202_v10, %v1201_v9  ;;  %v657_v12 = vpack.c.bf16 %v543_v8, %v542_v5 }
  0xdd   : > { %1334 = vmatmul.bf16.gmra.mxu3 %v1235_v11  ;;  %759 = vmatmul.bf16.gmra.mxu1 %v657_v12  ;;  %v257_v12 = vld [vmem:[%s5550_s7 + $0x110] sm:$0xff] }
  0xe0   : > { %v437_v13 = vpop.f32.mrf.mxu0 }
  0xe1   : > { %v544_v15 = vmax.f32 %v437_v13, 0.0 }
  0xe2   : > { %v1203_v19 = vld [vmem:[#allocation2 + $0x32] sm:$0xff] }
  0xe3   : > { %585 = vst [vmem:[#allocation2 + $0x40] sm:$0xff] %v544_v15  ;;  %4714 = vmatmul.msk.f32.gmra.mxu0 %vm272_vm0, %v247_v14 }
  0xe8   : > { %v440_v16 = vpop.f32.mrf.mxu0 }
  0xe9   : > { %v545_v18 = vmax.f32 %v440_v16, 0.0 }
  0xea   : > { %v1204_v20 = vld [vmem:[#allocation2 + $0x3a] sm:$0xff] }
  0xeb   : > { %586 = vst [vmem:[#allocation2 + $0x48] sm:$0xff] %v545_v18  ;;  %4715 = vmatmul.msk.f32.gmra.mxu0 %vm272_vm0, %v248_v17  ;;  %v1236_v21 = vpack.c.bf16 %v1204_v20, %v1203_v19  ;;  %v658_v22 = vpack.c.bf16 %v545_v18, %v544_v15  ;;  %v5262_v15 = vld [vmem:[%s7192_s2 + $0x130] sm:$0xff]  ;;  %v258_v17 = vld [vmem:[%s5550_s7 + $0x118] sm:$0xff] }
  0xec   : > { %1969 = vmatpush.bf16.msrb.mxu2 %v5262_v15 }
  0xed   : > { %1339 = vmatmul.bf16.gmra.mxu3 %v1236_v21  ;;  %764 = vmatmul.bf16.gmra.mxu1 %v658_v22 }
  0xf0   : > { %v443_v23 = vpop.f32.mrf.mxu0 }
  0xf1   : > { %v546_v25 = vmax.f32 %v443_v23, 0.0 }
  0xf2   : > { %v1205_v29 = vld [vmem:[#allocation2 + $0x42] sm:$0xff] }
  0xf3   : > { %587 = vst [vmem:[#allocation2 + $0x50] sm:$0xff] %v546_v25  ;;  %4716 = vmatmul.msk.f32.gmra.mxu0 %vm272_vm0, %v249_v24 }
  0xf8   : > { %v446_v26 = vpop.f32.mrf.mxu0 }
  0xf9   : > { %v547_v28 = vmax.f32 %v446_v26, 0.0 }
  0xfa   : > { %v1206_v30 = vld [vmem:[#allocation2 + $0x4a] sm:$0xff] }
  0xfb   : > { %588 = vst [vmem:[#allocation2 + $0x58] sm:$0xff] %v547_v28  ;;  %4717 = vmatmul.msk.f32.gmra.mxu0 %vm272_vm0, %v250_v27  ;;  %v1237_v31 = vpack.c.bf16 %v1206_v30, %v1205_v29  ;;  %v659_v32 = vpack.c.bf16 %v547_v28, %v546_v25  ;;  %v259_v29 = vld [vmem:[%s5550_s7 + $0x120] sm:$0xff] }
  0xfd   : > { %1344 = vmatmul.bf16.gmra.mxu3 %v1237_v31  ;;  %769 = vmatmul.bf16.gmra.mxu1 %v659_v32  ;;  %v5261_v32 = vld [vmem:[%s7192_s2 + $0x128] sm:$0xff] }
  0xfe   : > { %1970 = vmatpush.bf16.msrb.mxu2 %v5261_v32  ;;  %v874_v32 = vld [vmem:[#allocation2 + $0x19] sm:$0xff] }
 0x100   : > { %v449_v34 = vpop.f32.mrf.mxu0 }
 0x101   : > { %v548_v37 = vmax.f32 %v449_v34, 0.0 }
 0x102   : > { %v1207_v43 = vld [vmem:[#allocation2 + $0x52] sm:$0xff] }
 0x103   : > { %589 = vst [vmem:[#allocation2 + $0x60] sm:$0xff] %v548_v37  ;;  %4718 = vmatmul.msk.f32.gmra.mxu0 %vm272_vm0, %v251_v35  ;;  %v260_v35 = vld [vmem:[%s5550_s7 + $0x128] sm:$0xff] }
 0x108   : > { %v452_v39 = vpop.f32.mrf.mxu0 }
 0x109   : > { %v549_v42 = vmax.f32 %v452_v39, 0.0 }
 0x10a   : > { %v1208_v44 = vld [vmem:[#allocation2 + $0x5a] sm:$0xff] }
 0x10b   : > { %590 = vst [vmem:[#allocation2 + $0x68] sm:$0xff] %v549_v42  ;;  %4719 = vmatmul.msk.f32.gmra.mxu0 %vm272_vm0, %v252_v40  ;;  %v1238_v45 = vpack.c.bf16 %v1208_v44, %v1207_v43  ;;  %v660_v46 = vpack.c.bf16 %v549_v42, %v548_v37 }
 0x10d   : > { %1349 = vmatmul.bf16.gmra.mxu3 %v1238_v45  ;;  %774 = vmatmul.bf16.gmra.mxu1 %v660_v46  ;;  %v5270_v45 = vld [vmem:[%s7192_s2 + $0x170] sm:$0xff] }
 0x10e   : > { %v5254_v46 = vld [vmem:[%s7192_s2 + $0xf0] sm:$0xff]  ;;  %2295 = vmatpush.bf16.msrb.mxu3 %v5270_v45 }
 0x10f   : > { %1643 = vmatpush.bf16.msrb.mxu1 %v5254_v46 }
 0x110   : > { %v455_v48 = vpop.f32.mrf.mxu0 }
 0x111   : > { %v550_v51 = vmax.f32 %v455_v48, 0.0 }
 0x112   : > { %v1209_v57 = vld [vmem:[#allocation2 + $0x62] sm:$0xff] }
 0x113   : > { %591 = vst [vmem:[#allocation2 + $0x70] sm:$0xff] %v550_v51  ;;  %4720 = vmatmul.msk.f32.gmra.mxu0 %vm272_vm0, %v253_v49  ;;  %v261_v49 = vld [vmem:[%s5550_s7 + $0x130] sm:$0xff] }
 0x118   : > { %v458_v53 = vpop.f32.mrf.mxu0 }
 0x119   : > { %v551_v56 = vmax.f32 %v458_v53, 0.0 }
 0x11a   : > { %v1210_v58 = vld [vmem:[#allocation2 + $0x6a] sm:$0xff] }
 0x11b   : > { %592 = vst [vmem:[#allocation2 + $0x78] sm:$0xff] %v551_v56  ;;  %4721 = vmatmul.msk.f32.gmra.mxu0 %vm272_vm0, %v254_v54  ;;  %v1239_v59 = vpack.c.bf16 %v1210_v58, %v1209_v57  ;;  %v661_v60 = vpack.c.bf16 %v551_v56, %v550_v51  ;;  %v262_v54 = vld [vmem:[%s5550_s7 + $0x138] sm:$0xff] }
 0x11d   : > { %1354 = vmatmul.bf16.gmra.mxu3 %v1239_v59  ;;  %779 = vmatmul.bf16.gmra.mxu1 %v661_v60 }
 0x120   : > { %v461_v62 = vpop.f32.mrf.mxu0 }
 0x121   : > { %v552_v0 = vmax.f32 %v461_v62, 0.0 }
 0x122   : > { %v1211_v6 = vld [vmem:[#allocation2 + $0x72] sm:$0xff] }
 0x123   : > { %593 = vst [vmem:[#allocation2 + $0x80] sm:$0xff] %v552_v0  ;;  %4722 = vmatmul.msk.f32.gmra.mxu0 %vm272_vm0, %v255_v63 }
 0x128   : > { %v464_v3 = vpop.f32.mrf.mxu0 }
 0x129   : > { %v553_v5 = vmax.f32 %v464_v3, 0.0  ;;  %v263_v3 = vld [vmem:[%s5550_s7 + $0x140] sm:$0xff] }
 0x12a   : > { %v1212_v7 = vld [vmem:[#allocation2 + $0x7a] sm:$0xff]  ;;  %v5703_v8 = vpop.f32.mrf.mxu1 }
 0x12b   : > { %594 = vst [vmem:[#allocation2 + $0x88] sm:$0xff] %v553_v5  ;;  %4723 = vmatmul.msk.f32.gmra.mxu0 %vm272_vm0, %v256_v4  ;;  %v1240_v9 = vpack.c.bf16 %v1212_v7, %v1211_v6  ;;  %v662_v10 = vpack.c.bf16 %v553_v5, %v552_v0  ;;  %v5260_v0 = vld [vmem:[%s7192_s2 + $0x120] sm:$0xff]  ;;  %v872_v6 = vld [vmem:[#allocation2 + $0x9] sm:$0xff] }
 0x12c   : > { %1971 = vmatpush.bf16.msrb.mxu2 %v5260_v0 }
 0x12d   : > { %1359 = vmatmul.bf16.gmra.mxu3 %v1240_v9  ;;  %784 = vmatmul.bf16.gmra.mxu1 %v662_v10  ;;  %v871_v10 = vld [vmem:[#allocation2 + $0x1] sm:$0xff] }
 0x130   : > { %v467_v11 = vpop.f32.mrf.mxu0 }
 0x131   : > { %v554_v13 = vmax.f32 %v467_v11, 0.0 }
 0x132   : > { %v5707_v14 = vpop.f32.mrf.mxu1  ;;  %v887_v19 = vld [vmem:[#allocation2 + $0x81] sm:$0xff] }
 0x133   : > { %595 = vst [vmem:[#allocation2 + $0x90] sm:$0xff] %v554_v13  ;;  %4724 = vmatmul.msk.f32.gmra.mxu0 %vm272_vm0, %v257_v12  ;;  %v1213_v21 = vld [vmem:[#allocation2 + $0x82] sm:$0xff]  ;;  %v907_v12 = vpack.c.bf16 %v872_v6, %v871_v10 }
 0x138   : > { %v470_v16 = vpop.f32.mrf.mxu0 }
 0x139   : > { %v555_v18 = vmax.f32 %v470_v16, 0.0 }
 0x13a   : > { %v888_v20 = vld [vmem:[#allocation2 + $0x89] sm:$0xff]  ;;  %v5714_v23 = vpop.f32.mrf.mxu1 }
 0x13b   : > { %v1214_v22 = vld [vmem:[#allocation2 + $0x8a] sm:$0xff]  ;;  %596 = vst [vmem:[#allocation2 + $0x98] sm:$0xff] %v555_v18  ;;  %4725 = vmatmul.msk.f32.gmra.mxu0 %vm272_vm0, %v258_v17  ;;  %v915_v24 = vpack.c.bf16 %v888_v20, %v887_v19  ;;  %v663_v26 = vpack.c.bf16 %v555_v18, %v554_v13 }
 0x13c   : > { %v1241_v25 = vpack.c.bf16 %v1214_v22, %v1213_v21  ;;  %v5259_v22 = vld [vmem:[%s7192_s2 + $0x118] sm:$0xff] }
 0x13d   : > { %1038 = vmatmul.bf16.vlgmr.msra.gmra.mxu2 %v915_v24  ;;  %789 = vmatmul.bf16.gmra.mxu1 %v663_v26  ;;  %v5269_v24 = vld [vmem:[%s7192_s2 + $0x168] sm:$0xff] }
 0x13e   : > { %1364 = vmatmul.bf16.gmra.mxu3 %v1241_v25  ;;  %v5253_v25 = vld [vmem:[%s7192_s2 + $0xe8] sm:$0xff]  ;;  %1972 = vmatpush.bf16.msrb.mxu2 %v5259_v22 }
 0x13f   : > { %2296 = vmatpush.bf16.msrb.mxu3 %v5269_v24  ;;  %1644 = vmatpush.bf16.msrb.mxu1 %v5253_v25  ;;  %v877_v24 = vld [vmem:[#allocation2 + $0x31] sm:$0xff] }
 0x140   : > { %v473_v27 = vpop.f32.mrf.mxu0  ;;  %v5717_v28 = vpop.f32.mrf.mxu3 }
 0x141   : > { %v556_v30 = vmax.f32 %v473_v27, 0.0 }
 0x142   : > { %v5720_v31 = vpop.f32.mrf.mxu1  ;;  %v889_v37 = vld [vmem:[#allocation2 + $0x91] sm:$0xff] }
 0x143   : > { %597 = vst [vmem:[#allocation2 + $0xa0] sm:$0xff] %v556_v30  ;;  %4726 = vmatmul.msk.f32.gmra.mxu0 %vm272_vm0, %v259_v29  ;;  %v1215_v39 = vld [vmem:[#allocation2 + $0x92] sm:$0xff] }
 0x148   : > { %v476_v33 = vpop.f32.mrf.mxu0  ;;  %v5726_v34 = vpop.f32.mrf.mxu3 }
 0x149   : > { %v557_v36 = vmax.f32 %v476_v33, 0.0 }
 0x14a   : > { %v890_v38 = vld [vmem:[#allocation2 + $0x99] sm:$0xff]  ;;  %v5729_v41 = vpop.f32.mrf.mxu1 }
 0x14b   : > { %v1216_v40 = vld [vmem:[#allocation2 + $0x9a] sm:$0xff]  ;;  %598 = vst [vmem:[#allocation2 + $0xa8] sm:$0xff] %v557_v36  ;;  %4727 = vmatmul.msk.f32.gmra.mxu0 %vm272_vm0, %v260_v35  ;;  %v916_v42 = vpack.c.bf16 %v890_v38, %v889_v37  ;;  %v664_v44 = vpack.c.bf16 %v557_v36, %v556_v30  ;;  %v873_v36 = vld [vmem:[#allocation2 + $0x11] sm:$0xff] }
 0x14c   : > { %v1242_v43 = vpack.c.bf16 %v1216_v40, %v1215_v39  ;;  %v908_v38 = vpack.c.bf16 %v874_v32, %v873_v36 }
 0x14d   : > { %1043 = vmatmul.bf16.gmra.mxu2 %v916_v42  ;;  %794 = vmatmul.bf16.gmra.mxu1 %v664_v44 }
 0x14e   : > { %1369 = vmatmul.bf16.gmra.mxu3 %v1242_v43 }
 0x150   : > { %v479_v47 = vpop.f32.mrf.mxu0  ;;  %v5738_v48 = vpop.f32.mrf.mxu3 }
 0x151   : > { %v558_v50 = vmax.f32 %v479_v47, 0.0 }
 0x152   : > { %v5741_v51 = vpop.f32.mrf.mxu1  ;;  %v891_v56 = vld [vmem:[#allocation2 + $0xa1] sm:$0xff] }
 0x153   : > { %599 = vst [vmem:[#allocation2 + $0xb0] sm:$0xff] %v558_v50  ;;  %4728 = vmatmul.msk.f32.gmra.mxu0 %vm272_vm0, %v261_v49  ;;  %v1217_v58 = vld [vmem:[#allocation2 + $0xa2] sm:$0xff] }
 0x158   : > { %v482_v52 = vpop.f32.mrf.mxu0  ;;  %v5744_v53 = vpop.f32.mrf.mxu3 }
 0x159   : > { %v559_v55 = vmax.f32 %v482_v52, 0.0 }
 0x15a   : > { %v892_v57 = vld [vmem:[#allocation2 + $0xa9] sm:$0xff]  ;;  %v5747_v60 = vpop.f32.mrf.mxu1 }
 0x15b   : > { %v1218_v59 = vld [vmem:[#allocation2 + $0xaa] sm:$0xff]  ;;  %600 = vst [vmem:[#allocation2 + $0xb8] sm:$0xff] %v559_v55  ;;  %4729 = vmatmul.msk.f32.gmra.mxu0 %vm272_vm0, %v262_v54  ;;  %v917_v61 = vpack.c.bf16 %v892_v57, %v891_v56  ;;  %v665_v63 = vpack.c.bf16 %v559_v55, %v558_v50 }
 0x15c   : > { %v1243_v62 = vpack.c.bf16 %v1218_v59, %v1217_v58  ;;  %v5258_v55 = vld [vmem:[%s7192_s2 + $0x110] sm:$0xff]  ;;  %v875_v59 = vld [vmem:[#allocation2 + $0x21] sm:$0xff] }
 0x15d   : > { %1048 = vmatmul.bf16.gmra.mxu2 %v917_v61  ;;  %799 = vmatmul.bf16.gmra.mxu1 %v665_v63  ;;  %v876_v56 = vld [vmem:[#allocation2 + $0x29] sm:$0xff] }
 0x15e   : > { %1374 = vmatmul.bf16.gmra.mxu3 %v1243_v62  ;;  %1973 = vmatpush.bf16.msrb.mxu2 %v5258_v55  ;;  %v909_v62 = vpack.c.bf16 %v876_v56, %v875_v59  ;;  %v880_v55 = vld [vmem:[#allocation2 + $0x49] sm:$0xff]  ;;  %v879_v59 = vld [vmem:[#allocation2 + $0x41] sm:$0xff] }
 0x160   : > { %v485_v1 = vpop.f32.mrf.mxu0  ;;  %v5753_v2 = vpop.f32.mrf.mxu3 }
 0x161   : > { %v560_v4 = vmax.f32 %v485_v1, 0.0 }
 0x162   : > { %v5756_v5 = vpop.f32.mrf.mxu1  ;;  %v893_v13 = vld [vmem:[#allocation2 + $0xb1] sm:$0xff] }
 0x163   : > { %601 = vst [vmem:[#allocation2 + $0xc0] sm:$0xff] %v560_v4  ;;  %4730 = vmatmul.msk.f32.gmra.mxu0 %vm272_vm0, %v263_v3  ;;  %v1219_v16 = vld [vmem:[#allocation2 + $0xb2] sm:$0xff] }
 0x168   : > { %v488_v7 = vpop.f32.mrf.mxu0  ;;  %v5759_v9 = vpop.f32.mrf.mxu3 }
 0x169   : > { %v561_v11 = vmax.f32 %v488_v7, 0.0 }
 0x16a   : > { %v894_v15 = vld [vmem:[#allocation2 + $0xb9] sm:$0xff]  ;;  %v5761_v18 = vpop.f32.mrf.mxu1 }
 0x16b   : > { %v1220_v17 = vld [vmem:[#allocation2 + $0xba] sm:$0xff]  ;;  %602 = vst [vmem:[#allocation2 + $0xc8] sm:$0xff] %v561_v11  ;;  %998 = vmatmul.bf16.vlgmr.msrb.gmra.mxu0 %v907_v12  ;;  %v918_v19 = vpack.c.bf16 %v894_v15, %v893_v13  ;;  %v666_v21 = vpack.c.bf16 %v561_v11, %v560_v4 }
 0x16c   : > { %v1244_v20 = vpack.c.bf16 %v1220_v17, %v1219_v16  ;;  %v5268_v16 = vld [vmem:[%s7192_s2 + $0x160] sm:$0xff] }
 0x16d   : > { %1053 = vmatmul.bf16.gmra.mxu2 %v918_v19  ;;  %804 = vmatmul.bf16.gmra.mxu1 %v666_v21  ;;  %v5252_v17 = vld [vmem:[%s7192_s2 + $0xe0] sm:$0xff]  ;;  %v5257_v19 = vld [vmem:[%s7192_s2 + $0x108] sm:$0xff] }
 0x16e   : > { %1379 = vmatmul.bf16.gmra.mxu3 %v1244_v20  ;;  %1645 = vmatpush.bf16.msrb.mxu1 %v5252_v17  ;;  %v878_v20 = vld [vmem:[#allocation2 + $0x39] sm:$0xff] }
 0x16f   : > { %2297 = vmatpush.bf16.msrb.mxu3 %v5268_v16  ;;  %1974 = vmatpush.bf16.msrb.mxu2 %v5257_v19  ;;  %v5256_v16 = vld [vmem:[%s7192_s2 + $0x100] sm:$0xff]  ;;  %v5279_v17 = vld [vmem:[%s7192_s2 + $0x1b8] sm:$0xff] }
 0x170   : > { %v491_v26 = vpop.f32.mrf.mxu0  ;;  %v5772_v27 = vpop.f32.mrf.mxu3  ;;  %v5267_v19 = vld [vmem:[%s7192_s2 + $0x158] sm:$0xff]  ;;  %2620 = vmatpush.bf16.msra.mxu0 %v5279_v17 }
 0x171   : > { %v562_v29 = vmax.f32 %v491_v26, 0.0  ;;  %v910_v26 = vpack.c.bf16 %v878_v20, %v877_v24  ;;  %v5278_v20 = vld [vmem:[%s7192_s2 + $0x1b0] sm:$0xff] }
 0x172   : > { %v5774_v30 = vpop.f32.mrf.mxu1  ;;  %v895_v39 = vld [vmem:[#allocation2 + $0xc1] sm:$0xff] }
 0x173   : > { %603 = vst [vmem:[#allocation2 + $0xd0] sm:$0xff] %v562_v29  ;;  %v1221_v42 = vld [vmem:[#allocation2 + $0xc2] sm:$0xff]  ;;  %1975 = vmatpush.bf16.msrb.mxu2 %v5256_v16  ;;  %2298 = vmatpush.bf16.msrb.mxu3 %v5267_v19 }
 0x174   : > { %2621 = vmatpush.bf16.msra.mxu0 %v5278_v20 }
 0x178   : > { %v494_v33 = vpop.f32.mrf.mxu0  ;;  %v5776_v35 = vpop.f32.mrf.mxu3 }
 0x179   : > { %v563_v37 = vmax.f32 %v494_v33, 0.0 }
 0x17a   : > { %v896_v40 = vld [vmem:[#allocation2 + $0xc9] sm:$0xff]  ;;  %v5778_v44 = vpop.f32.mrf.mxu1 }
 0x17b   : > { %v1222_v43 = vld [vmem:[#allocation2 + $0xca] sm:$0xff]  ;;  %604 = vst [vmem:[#allocation2 + $0xd8] sm:$0xff] %v563_v37  ;;  %1003 = vmatmul.bf16.gmra.mxu0 %v908_v38  ;;  %v919_v45 = vpack.c.bf16 %v896_v40, %v895_v39  ;;  %v667_v47 = vpack.c.bf16 %v563_v37, %v562_v29 }
 0x17c   : > { %v1245_v46 = vpack.c.bf16 %v1222_v43, %v1221_v42  ;;  %v5251_v42 = vld [vmem:[%s7192_s2 + $0xd8] sm:$0xff] }
 0x17d   : > { %1058 = vmatmul.bf16.gmra.mxu2 %v919_v45  ;;  %809 = vmatmul.bf16.gmra.mxu1 %v667_v47  ;;  %v5250_v47 = vld [vmem:[%s7192_s2 + $0xd0] sm:$0xff] }
 0x17e   : > { %1384 = vmatmul.bf16.gmra.mxu3 %v1245_v46  ;;  %1646 = vmatpush.bf16.msrb.mxu1 %v5251_v42  ;;  %v5276_v42 = vld [vmem:[%s7192_s2 + $0x1a0] sm:$0xff] }
 0x180   : > { %v497_v49 = vpop.f32.mrf.mxu0  ;;  %v5780_v50 = vpop.f32.mrf.mxu3 }
 0x181   : > { %v564_v52 = vmax.f32 %v497_v49, 0.0 }
 0x182   : > { %v5782_v54 = vpop.f32.mrf.mxu1  ;;  %v897_v63 = vld [vmem:[#allocation2 + $0xd1] sm:$0xff]  ;;  %1647 = vmatpush.bf16.msrb.mxu1 %v5250_v47 }
 0x183   : > { %605 = vst [vmem:[#allocation2 + $0xe0] sm:$0xff] %v564_v52  ;;  %v1223_v1 = vld [vmem:[#allocation2 + $0xd2] sm:$0xff] }
 0x188   : > { %v500_v57 = vpop.f32.mrf.mxu0  ;;  %v5787_v58 = vpop.f32.mrf.mxu3 }
 0x189   : > { %v565_v61 = vmax.f32 %v500_v57, 0.0 }
 0x18a   : > { %v898_v0 = vld [vmem:[#allocation2 + $0xd9] sm:$0xff]  ;;  %v5789_v4 = vpop.f32.mrf.mxu1 }
 0x18b   : > { %v1224_v3 = vld [vmem:[#allocation2 + $0xda] sm:$0xff]  ;;  %606 = vst [vmem:[#allocation2 + $0xe8] sm:$0xff] %v565_v61  ;;  %1008 = vmatmul.bf16.gmra.mxu0 %v909_v62  ;;  %v920_v6 = vpack.c.bf16 %v898_v0, %v897_v63  ;;  %v668_v10 = vpack.c.bf16 %v565_v61, %v564_v52  ;;  %v5249_v52 = vld [vmem:[%s7192_s2 + $0xc8] sm:$0xff]  ;;  %v911_v62 = vpack.c.bf16 %v880_v55, %v879_v59 }
 0x18c   : > { %v1246_v7 = vpack.c.bf16 %v1224_v3, %v1223_v1  ;;  %1648 = vmatpush.bf16.msrb.mxu1 %v5249_v52  ;;  %v5248_v0 = vld [vmem:[%s7192_s2 + $0xc0] sm:$0xff] }
 0x18d   : > { %1063 = vmatmul.bf16.gmra.mxu2 %v920_v6  ;;  %814 = vmatmul.bf16.gmra.mxu1 %v668_v10  ;;  %v5264_v52 = vld [vmem:[%s7192_s2 + $0x140] sm:$0xff] }
 0x18e   : > { %1389 = vmatmul.bf16.gmra.mxu3 %v1246_v7 }
 0x190   : > { %v503_v11 = vpop.f32.mrf.mxu0  ;;  %v5791_v12 = vpop.f32.mrf.mxu3  ;;  %1649 = vmatpush.bf16.msrb.mxu1 %v5248_v0 }
 0x191   : > { %v566_v13 = vmax.f32 %v503_v11, 0.0 }
 0x192   : > { %v5793_v15 = vpop.f32.mrf.mxu1  ;;  %v899_v29 = vld [vmem:[#allocation2 + $0xe1] sm:$0xff] }
 0x193   : > { %607 = vst [vmem:[#allocation2 + $0xf0] sm:$0xff] %v566_v13  ;;  %v1225_v33 = vld [vmem:[#allocation2 + $0xe2] sm:$0xff] }
 0x198   : > { %v506_v21 = vpop.f32.mrf.mxu0  ;;  %v5804_v22 = vpop.f32.mrf.mxu3 }
 0x199   : > { %v567_v25 = vmax.f32 %v506_v21, 0.0 }
 0x19a   : > { %v900_v32 = vld [vmem:[#allocation2 + $0xe9] sm:$0xff]  ;;  %v5806_v37 = vpop.f32.mrf.mxu1 }
 0x19b   : > { %v1226_v36 = vld [vmem:[#allocation2 + $0xea] sm:$0xff]  ;;  %608 = vst [vmem:[#allocation2 + $0xf8] sm:$0xff] %v567_v25  ;;  %1013 = vmatmul.bf16.gmra.mxu0 %v910_v26  ;;  %v921_v38 = vpack.c.bf16 %v900_v32, %v899_v29  ;;  %v669_v40 = vpack.c.bf16 %v567_v25, %v566_v13 }
 0x19c   : > { %v1247_v39 = vpack.c.bf16 %v1226_v36, %v1225_v33  ;;  %v5266_v26 = vld [vmem:[%s7192_s2 + $0x150] sm:$0xff]  ;;  %v5277_v32 = vld [vmem:[%s7192_s2 + $0x1a8] sm:$0xff]  ;;  %v882_v36 = vld [vmem:[#allocation2 + $0x59] sm:$0xff] }
 0x19d   : > { %1068 = vmatmul.bf16.gmra.mxu2 %v921_v38  ;;  %819 = vmatmul.bf16.gmra.mxu1 %v669_v40  ;;  %v5265_v33 = vld [vmem:[%s7192_s2 + $0x148] sm:$0xff]  ;;  %v881_v40 = vld [vmem:[#allocation2 + $0x51] sm:$0xff] }
 0x19e   : > { %1394 = vmatmul.bf16.gmra.mxu3 %v1247_v39  ;;  %2622 = vmatpush.bf16.msra.mxu0 %v5277_v32 }
 0x19f   : > { %2299 = vmatpush.bf16.msrb.mxu3 %v5266_v26 }
 0x1a0   : > { %v509_v43 = vpop.f32.mrf.mxu0  ;;  %v5811_v45 = vpop.f32.mrf.mxu3 }
 0x1a1   : > { %v568_v46 = vmax.f32 %v509_v43, 0.0 }
 0x1a2   : > { %v5816_v49 = vpop.f32.mrf.mxu1  ;;  %v901_v63 = vld [vmem:[#allocation2 + $0xf1] sm:$0xff]  ;;  %2623 = vmatpush.bf16.msra.mxu0 %v5276_v42 }
 0x1a3   : > { %609 = vst [vmem:[#allocation2 + $0x100] sm:$0xff] %v568_v46  ;;  %v1227_v3 = vld [vmem:[#allocation2 + $0xf2] sm:$0xff]  ;;  %2300 = vmatpush.bf16.msrb.mxu3 %v5265_v33  ;;  %v883_v33 = vld [vmem:[#allocation2 + $0x61] sm:$0xff] }
 0x1a7   : > { %2301 = vmatpush.bf16.msrb.mxu3 %v5264_v52 }
 0x1a8   : > { %v512_v56 = vpop.f32.mrf.mxu0  ;;  %v5821_v57 = vpop.f32.mrf.mxu3 }
 0x1a9   : > { %v569_v61 = vmax.f32 %v512_v56, 0.0 }
 0x1aa   : > { %v902_v1 = vld [vmem:[#allocation2 + $0xf9] sm:$0xff]  ;;  %v785_v7 = vpop.f32.mrf.mxu1 }
 0x1ab   : > { %v1228_v6 = vld [vmem:[#allocation2 + $0xfa] sm:$0xff]  ;;  %610 = vst [vmem:[#allocation2 + $0x108] sm:$0xff] %v569_v61  ;;  %1018 = vmatmul.bf16.gmra.mxu0 %v911_v62  ;;  %v922_v10 = vpack.c.bf16 %v902_v1, %v901_v63  ;;  %v670_v13 = vpack.c.bf16 %v569_v61, %v568_v46  ;;  %v912_v46 = vpack.c.bf16 %v882_v36, %v881_v40 }
 0x1ac   : > { %v1248_v11 = vpack.c.bf16 %v1228_v6, %v1227_v3  ;;  %v5275_v1 = vld [vmem:[%s7192_s2 + $0x198] sm:$0xff]  ;;  %v5272_v36 = vld [vmem:[%s7192_s2 + $0x180] sm:$0xff] }
 0x1ad   : > { %1073 = vmatmul.bf16.gmra.mxu2 %v922_v10  ;;  %824 = vmatmul.bf16.gmra.mxu1 %v670_v13  ;;  %v5295_v3 = vld [vmem:[%s7192_s2 + $0x238] sm:$0xff] }
 0x1ae   : > { %1399 = vmatmul.bf16.gmra.mxu3 %v1248_v11  ;;  %3272 = vmatpush.bf16.msra.mxu2 %v5295_v3  ;;  %v5274_v11 = vld [vmem:[%s7192_s2 + $0x190] sm:$0xff] }
 0x1af   : > { %2624 = vmatpush.bf16.msra.mxu0 %v5275_v1 }
 0x1b0   : > { %v515_v21 = vpop.f32.mrf.mxu0  ;;  %v5838_v24 = vpop.f32.mrf.mxu3 }
 0x1b1   : > { %v570_v25 = vmax.f32 %v515_v21, 0.0  ;;  %v5273_v21 = vld [vmem:[%s7192_s2 + $0x188] sm:$0xff] }
 0x1b2   : > { %v787_v29 = vpop.f32.mrf.mxu1  ;;  %v903_v47 = vld [vmem:[#allocation2 + $0x101] sm:$0xff] }
 0x1b3   : > { %611 = vst [vmem:[#allocation2 + $0x110] sm:$0xff] %v570_v25  ;;  %v1229_v56 = vld [vmem:[#allocation2 + $0x102] sm:$0xff]  ;;  %2625 = vmatpush.bf16.msra.mxu0 %v5274_v11 }
 0x1b7   : > { %2626 = vmatpush.bf16.msra.mxu0 %v5273_v21 }
 0x1b8   : > { %v518_v38 = vpop.f32.mrf.mxu0  ;;  %v5849_v39 = vpop.f32.mrf.mxu3 }
 0x1b9   : > { %v571_v43 = vmax.f32 %v518_v38, 0.0 }
 0x1ba   : > { %v904_v55 = vld [vmem:[#allocation2 + $0x109] sm:$0xff]  ;;  %v790_v63 = vpop.f32.mrf.mxu1 }
 0x1bb   : > { %v1230_v59 = vld [vmem:[#allocation2 + $0x10a] sm:$0xff]  ;;  %612 = vst [vmem:[#allocation2 + $0x118] sm:$0xff] %v571_v43  ;;  %1023 = vmatmul.bf16.gmra.mxu0 %v912_v46  ;;  %v923_v61 = vpack.c.bf16 %v904_v55, %v903_v47  ;;  %v671_v0 = vpack.c.bf16 %v571_v43, %v570_v25  ;;  %v1524_v46 = vld [vmem:[#allocation2 + $0x1a] sm:$0xff] }
 0x1bc   : > { %v1249_v62 = vpack.c.bf16 %v1230_v59, %v1229_v56  ;;  %v884_v25 = vld [vmem:[#allocation2 + $0x69] sm:$0xff]  ;;  %2627 = vmatpush.bf16.msra.mxu0 %v5272_v36 }
 0x1bd   : > { %1078 = vmatmul.bf16.gmra.mxu2 %v923_v61  ;;  %829 = vmatmul.bf16.gmra.mxu1 %v671_v0  ;;  %v913_v42 = vpack.c.bf16 %v884_v25, %v883_v33  ;;  %v1523_v0 = vld [vmem:[#allocation2 + $0x12] sm:$0xff]  ;;  %v2176_v33 = vld [vmem:[#allocation2 + $0x1c] sm:$0xff] }
 0x1be   : > { %1404 = vmatmul.bf16.gmra.mxu3 %v1249_v62  ;;  %v1559_v1 = vpack.c.bf16 %v1524_v46, %v1523_v0  ;;  %v2175_v46 = vld [vmem:[#allocation2 + $0x14] sm:$0xff] }
 0x1c0   : > { %v521_v6 = vpop.f32.mrf.mxu0  ;;  %v1039_v10 = vpop.f32.mrf.mxu2 }
 0x1c1   : > { %v572_v13 = vmax.f32 %v521_v6, 0.0  ;;  %v1141_v16 = vadd.f32 %v1039_v10, %v785_v7  ;;  %v1365_v17 = vpop.f32.mrf.mxu3 }
 0x1c2   : > { %v792_v20 = vpop.f32.mrf.mxu1  ;;  %v905_v43 = vld [vmem:[#allocation2 + $0x111] sm:$0xff] }
 0x1c3   : > { %613 = vst [vmem:[#allocation2 + $0x120] sm:$0xff] %v572_v13  ;;  %v5866_v19 = vadd.f32 %v1365_v17, %v1141_v16  ;;  %v1231_v52 = vld [vmem:[#allocation2 + $0x112] sm:$0xff] }
 0x1c4   : > { %v886_v17 = vld [vmem:[#allocation2 + $0x79] sm:$0xff] }
 0x1c5   : > { %7214 = vst [vmem:[#allocation7_spill] sm:$0xff] %v5866_v19 }
 0x1c8   : > { %v524_v26 = vpop.f32.mrf.mxu0  ;;  %v1041_v32 = vpop.f32.mrf.mxu2 }
 0x1c9   : > { %v573_v7 = vmax.f32 %v524_v26, 0.0  ;;  %v1142_v38 = vadd.f32 %v1041_v32, %v787_v29  ;;  %v1367_v40 = vpop.f32.mrf.mxu3  ;;  %v885_v26 = vld [vmem:[#allocation2 + $0x71] sm:$0xff]  ;;  %v1850_v32 = vld [vmem:[#allocation2 + $0x1b] sm:$0xff] }
 0x1ca   : > { %v906_v47 = vld [vmem:[#allocation2 + $0x119] sm:$0xff]  ;;  %v795_v62 = vpop.f32.mrf.mxu1 }
 0x1cb   : > { %v1232_v55 = vld [vmem:[#allocation2 + $0x11a] sm:$0xff]  ;;  %614 = vst [vmem:[#allocation2 + $0x128] sm:$0xff] %v573_v7  ;;  %v5874_v56 = vadd.f32 %v1367_v40, %v1142_v38  ;;  %1028 = vmatmul.bf16.gmra.mxu0 %v913_v42  ;;  %v924_v59 = vpack.c.bf16 %v906_v47, %v905_v43  ;;  %v914_v40 = vpack.c.bf16 %v886_v17, %v885_v26  ;;  %v1526_v42 = vld [vmem:[#allocation2 + $0x2a] sm:$0xff] }
 0x1cc   : > { %v1250_v61 = vpack.c.bf16 %v1232_v55, %v1231_v52  ;;  %v1849_v43 = vld [vmem:[#allocation2 + $0x13] sm:$0xff]  ;;  %v2211_v52 = vpack.c.bf16 %v2176_v33, %v2175_v46  ;;  %v2501_v26 = vld [vmem:[#allocation2 + $0x24] sm:$0xff] }
 0x1cd   : > { %7215 = vst [vmem:[#allocation8_spill] sm:$0xff] %v5874_v56  ;;  %1083 = vmatmul.bf16.gmra.mxu2 %v924_v59  ;;  %1650 = vmatmul.bf16.vlgmr.msrb.gmra.mxu1 %v1559_v1  ;;  %v1885_v47 = vpack.c.bf16 %v1850_v32, %v1849_v43  ;;  %v1525_v59 = vld [vmem:[#allocation2 + $0x22] sm:$0xff]  ;;  %v2502_v17 = vld [vmem:[#allocation2 + $0x2c] sm:$0xff] }
 0x1ce   : > { %1409 = vmatmul.bf16.gmra.mxu3 %v1250_v61  ;;  %v1560_v61 = vpack.c.bf16 %v1526_v42, %v1525_v59  ;;  %v1852_v32 = vld [vmem:[#allocation2 + $0x2b] sm:$0xff] }
 0x1cf   : > { %v1527_v46 = vld [vmem:[#allocation2 + $0x32] sm:$0xff] }
 0x1d0   : > { %v527_v29 = vpop.f32.mrf.mxu0  ;;  %v1044_v3 = vpop.f32.mrf.mxu2 }
 0x1d1   : > { %v574_v6 = vmax.f32 %v527_v29, 0.0  ;;  %v1143_v10 = vadd.f32 %v1044_v3, %v790_v63  ;;  %v1370_v11 = vpop.f32.mrf.mxu3 }
 0x1d2   : > { %v797_v16 = vpop.f32.mrf.mxu1 }
 0x1d3   : > { %615 = vst [vmem:[#allocation2 + $0x130] sm:$0xff] %v574_v6  ;;  %v5876_v13 = vadd.f32 %v1370_v11, %v1143_v10  ;;  %v5294_v11 = vld [vmem:[%s7192_s2 + $0x230] sm:$0xff] }
 0x1d4   : > { %3273 = vmatpush.bf16.msra.mxu2 %v5294_v11  ;;  %v2503_v11 = vld [vmem:[#allocation2 + $0x34] sm:$0xff] }
 0x1d5   : > { %7216 = vst [vmem:[#allocation9_spill] sm:$0xff] %v5876_v13 }
 0x1d8   : > { %v530_v21 = vpop.f32.mrf.mxu0  ;;  %v1046_v25 = vpop.f32.mrf.mxu2 }
 0x1d9   : > { %v575_v7 = vmax.f32 %v530_v21, 0.0  ;;  %v1144_v36 = vadd.f32 %v1046_v25, %v792_v20  ;;  %v1372_v38 = vpop.f32.mrf.mxu3 }
 0x1da   : > { %v800_v55 = vpop.f32.mrf.mxu1 }
 0x1db   : > { %616 = vst [vmem:[#allocation2 + $0x138] sm:$0xff] %v575_v7  ;;  %v5878_v63 = vadd.f32 %v1372_v38, %v1144_v36  ;;  %1033 = vmatmul.bf16.gmra.mxu0 %v914_v40  ;;  %v2537_v36 = vpack.c.bf16 %v2502_v17, %v2501_v26  ;;  %v1851_v38 = vld [vmem:[#allocation2 + $0x23] sm:$0xff]  ;;  %v1854_v17 = vld [vmem:[#allocation2 + $0x3b] sm:$0xff] }
 0x1dc   : > { %v1886_v42 = vpack.c.bf16 %v1852_v32, %v1851_v38  ;;  %v1529_v38 = vld [vmem:[#allocation2 + $0x42] sm:$0xff] }
 0x1dd   : > { %7217 = vst [vmem:[#allocation10_spill] sm:$0xff] %v5878_v63  ;;  %1976 = vmatmul.bf16.vlgmr.msrb.gmra.mxu2 %v1885_v47  ;;  %1655 = vmatmul.bf16.gmra.mxu1 %v1560_v61  ;;  %v1862_v63 = vld [vmem:[#allocation2 + $0x7b] sm:$0xff] }
 0x1de   : > { %2302 = vmatmul.bf16.vlgmr.msrb.gmra.mxu3 %v2211_v52 }
 0x1e0   : > { %v533_v0 = vpop.f32.mrf.mxu0  ;;  %v1049_v1 = vpop.f32.mrf.mxu2 }
 0x1e1   : > { %v576_v20 = vmax.f32 %v533_v0, 0.0  ;;  %v1145_v29 = vadd.f32 %v1049_v1, %v795_v62  ;;  %v1375_v3 = vpop.f32.mrf.mxu3  ;;  %v1528_v62 = vld [vmem:[#allocation2 + $0x3a] sm:$0xff] }
 0x1e2   : > { %v802_v10 = vpop.f32.mrf.mxu1  ;;  %v1561_v47 = vpack.c.bf16 %v1528_v62, %v1527_v46 }
 0x1e3   : > { %617 = vst [vmem:[#allocation2 + $0x140] sm:$0xff] %v576_v20  ;;  %v5880_v6 = vadd.f32 %v1375_v3, %v1145_v29  ;;  %v2504_v20 = vld [vmem:[#allocation2 + $0x3c] sm:$0xff] }
 0x1e4   : > { %v2538_v32 = vpack.c.bf16 %v2504_v20, %v2503_v11  ;;  %v5293_v20 = vld [vmem:[%s7192_s2 + $0x228] sm:$0xff] }
 0x1e5   : > { %7218 = vst [vmem:[#allocation11_spill] sm:$0xff] %v5880_v6  ;;  %3274 = vmatpush.bf16.msra.mxu2 %v5293_v20 }
 0x1e8   : > { %v5885_v21 = vpop.f32.mrf.mxu0  ;;  %v1051_v25 = vpop.f32.mrf.mxu2 }
 0x1e9   : > { %v1146_v33 = vadd.f32 %v1051_v25, %v797_v16  ;;  %v1377_v7 = vpop.f32.mrf.mxu3 }
 0x1ea   : > { %v805_v43 = vpop.f32.mrf.mxu1 }
 0x1eb   : > { %v5887_v40 = vadd.f32 %v1377_v7, %v1146_v33  ;;  %2628 = vmatmul.bf16.vlgmr.msra.gmra.mxu0 %v2537_v36  ;;  %v1530_v33 = vld [vmem:[#allocation2 + $0x4a] sm:$0xff]  ;;  %v1853_v7 = vld [vmem:[#allocation2 + $0x33] sm:$0xff] }
 0x1ec   : > { %v1887_v62 = vpack.c.bf16 %v1854_v17, %v1853_v7 }
 0x1ed   : > { %7219 = vst [vmem:[#allocation12_spill] sm:$0xff] %v5887_v40  ;;  %1981 = vmatmul.bf16.gmra.mxu2 %v1886_v42  ;;  %1660 = vmatmul.bf16.gmra.mxu1 %v1561_v47  ;;  %v1562_v42 = vpack.c.bf16 %v1530_v33, %v1529_v38 }
 0x1ee   : > { %2307 = vmatmul.bf16.gmra.mxu3 %v2537_v36 }
 0x1f0   : > { %v5889_v52 = vpop.f32.mrf.mxu0  ;;  %v1054_v59 = vpop.f32.mrf.mxu2 }
 0x1f1   : > { %v1147_v61 = vadd.f32 %v1054_v59, %v800_v55  ;;  %v1380_v0 = vpop.f32.mrf.mxu3 }
 0x1f2   : > { %v807_v1 = vpop.f32.mrf.mxu1 }
 0x1f3   : > { %v5891_v16 = vadd.f32 %v1380_v0, %v1147_v61 }
 0x1f5   : > { %7220 = vst [vmem:[#allocation13_spill] sm:$0xff] %v5891_v16 }
 0x1f8   : > { %v5893_v29 = vpop.f32.mrf.mxu0  ;;  %v1056_v3 = vpop.f32.mrf.mxu2 }
 0x1f9   : > { %v1148_v25 = vadd.f32 %v1056_v3, %v802_v10  ;;  %v1382_v26 = vpop.f32.mrf.mxu3  ;;  %v2506_v3 = vld [vmem:[#allocation2 + $0x4c] sm:$0xff] }
 0x1fa   : > { %v810_v55 = vpop.f32.mrf.mxu1 }
 0x1fb   : > { %v5895_v36 = vadd.f32 %v1382_v26, %v1148_v25  ;;  %2633 = vmatmul.bf16.gmra.mxu0 %v2538_v32  ;;  %v2505_v25 = vld [vmem:[#allocation2 + $0x44] sm:$0xff] }
 0x1fc   : > { %v1856_v26 = vld [vmem:[#allocation2 + $0x4b] sm:$0xff]  ;;  %v2539_v7 = vpack.c.bf16 %v2506_v3, %v2505_v25 }
 0x1fd   : > { %7221 = vst [vmem:[#allocation14_spill] sm:$0xff] %v5895_v36  ;;  %1986 = vmatmul.bf16.gmra.mxu2 %v1887_v62  ;;  %1665 = vmatmul.bf16.gmra.mxu1 %v1562_v42  ;;  %v1532_v62 = vld [vmem:[#allocation2 + $0x5a] sm:$0xff] }
 0x1fe   : > { %2312 = vmatmul.bf16.gmra.mxu3 %v2538_v32 }
 0x200   : > { %v5897_v46 = vpop.f32.mrf.mxu0  ;;  %v1059_v47 = vpop.f32.mrf.mxu2 }
 0x201   : > { %v1149_v59 = vadd.f32 %v1059_v47, %v805_v43  ;;  %v1385_v61 = vpop.f32.mrf.mxu3  ;;  %v1855_v43 = vld [vmem:[#allocation2 + $0x43] sm:$0xff] }
 0x202   : > { %v812_v0 = vpop.f32.mrf.mxu1  ;;  %v1888_v42 = vpack.c.bf16 %v1856_v26, %v1855_v43  ;;  %v1858_v26 = vld [vmem:[#allocation2 + $0x5b] sm:$0xff] }
 0x203   : > { %v5899_v10 = vadd.f32 %v1385_v61, %v1149_v59  ;;  %v1531_v59 = vld [vmem:[#allocation2 + $0x52] sm:$0xff] }
 0x204   : > { %v1563_v61 = vpack.c.bf16 %v1532_v62, %v1531_v59 }
 0x205   : > { %7222 = vst [vmem:[#allocation15_spill] sm:$0xff] %v5899_v10 }
 0x208   : > { %v5904_v11 = vpop.f32.mrf.mxu0  ;;  %v1061_v17 = vpop.f32.mrf.mxu2 }
 0x209   : > { %v1150_v32 = vadd.f32 %v1061_v17, %v807_v1  ;;  %v1387_v33 = vpop.f32.mrf.mxu3  ;;  %v2508_v17 = vld [vmem:[#allocation2 + $0x5c] sm:$0xff] }
 0x20a   : > { %v815_v47 = vpop.f32.mrf.mxu1 }
 0x20b   : > { %v5906_v38 = vadd.f32 %v1387_v33, %v1150_v32  ;;  %2638 = vmatmul.bf16.gmra.mxu0 %v2539_v7  ;;  %v2507_v33 = vld [vmem:[#allocation2 + $0x54] sm:$0xff] }
 0x20c   : > { %v2540_v62 = vpack.c.bf16 %v2508_v17, %v2507_v33 }
 0x20d   : > { %7223 = vst [vmem:[#allocation16_spill] sm:$0xff] %v5906_v38  ;;  %1991 = vmatmul.bf16.gmra.mxu2 %v1888_v42  ;;  %1670 = vmatmul.bf16.gmra.mxu1 %v1563_v61  ;;  %v1534_v42 = vld [vmem:[#allocation2 + $0x6a] sm:$0xff] }
 0x20e   : > { %2317 = vmatmul.bf16.gmra.mxu3 %v2539_v7  ;;  %v1857_v7 = vld [vmem:[#allocation2 + $0x53] sm:$0xff] }
 0x20f   : > { %v1889_v61 = vpack.c.bf16 %v1858_v26, %v1857_v7  ;;  %v1860_v26 = vld [vmem:[#allocation2 + $0x6b] sm:$0xff] }
 0x210   : > { %v5908_v20 = vpop.f32.mrf.mxu0  ;;  %v1064_v10 = vpop.f32.mrf.mxu2 }
 0x211   : > { %v1151_v36 = vadd.f32 %v1064_v10, %v810_v55  ;;  %v1390_v16 = vpop.f32.mrf.mxu3  ;;  %v1533_v10 = vld [vmem:[#allocation2 + $0x62] sm:$0xff] }
 0x212   : > { %v817_v3 = vpop.f32.mrf.mxu1 }
 0x213   : > { %v5910_v1 = vadd.f32 %v1390_v16, %v1151_v36  ;;  %v1564_v16 = vpack.c.bf16 %v1534_v42, %v1533_v10 }
 0x215   : > { %7224 = vst [vmem:[#allocation17_spill] sm:$0xff] %v5910_v1 }
 0x218   : > { %v5912_v25 = vpop.f32.mrf.mxu0  ;;  %v1066_v32 = vpop.f32.mrf.mxu2 }
 0x219   : > { %v1152_v43 = vadd.f32 %v1066_v32, %v812_v0  ;;  %v1392_v38 = vpop.f32.mrf.mxu3  ;;  %v2510_v32 = vld [vmem:[#allocation2 + $0x6c] sm:$0xff] }
 0x21a   : > { %v820_v55 = vpop.f32.mrf.mxu1 }
 0x21b   : > { %v5914_v59 = vadd.f32 %v1392_v38, %v1152_v43  ;;  %2643 = vmatmul.bf16.gmra.mxu0 %v2540_v62  ;;  %v2509_v43 = vld [vmem:[#allocation2 + $0x64] sm:$0xff] }
 0x21c   : > { %v2541_v42 = vpack.c.bf16 %v2510_v32, %v2509_v43 }
 0x21d   : > { %7225 = vst [vmem:[#allocation18_spill] sm:$0xff] %v5914_v59  ;;  %1996 = vmatmul.bf16.gmra.mxu2 %v1889_v61  ;;  %1675 = vmatmul.bf16.gmra.mxu1 %v1564_v16  ;;  %v1536_v61 = vld [vmem:[#allocation2 + $0x7a] sm:$0xff] }
 0x21e   : > { %2322 = vmatmul.bf16.gmra.mxu3 %v2540_v62  ;;  %v1859_v62 = vld [vmem:[#allocation2 + $0x63] sm:$0xff] }
 0x21f   : > { %v1890_v16 = vpack.c.bf16 %v1860_v26, %v1859_v62  ;;  %v2512_v26 = vld [vmem:[#allocation2 + $0x7c] sm:$0xff] }
 0x220   : > { %v5916_v36 = vpop.f32.mrf.mxu0  ;;  %v1069_v1 = vpop.f32.mrf.mxu2 }
 0x221   : > { %v1153_v40 = vadd.f32 %v1069_v1, %v815_v47  ;;  %v1395_v6 = vpop.f32.mrf.mxu3  ;;  %v1535_v1 = vld [vmem:[#allocation2 + $0x72] sm:$0xff] }
 0x222   : > { %v822_v17 = vpop.f32.mrf.mxu1 }
 0x223   : > { %v5918_v0 = vadd.f32 %v1395_v6, %v1153_v40  ;;  %v5292_v6 = vld [vmem:[%s7192_s2 + $0x220] sm:$0xff]  ;;  %v1565_v40 = vpack.c.bf16 %v1536_v61, %v1535_v1  ;;  %v1861_v1 = vld [vmem:[#allocation2 + $0x73] sm:$0xff] }
 0x224   : > { %3275 = vmatpush.bf16.msra.mxu2 %v5292_v6 }
 0x225   : > { %7226 = vst [vmem:[#allocation19_spill] sm:$0xff] %v5918_v0  ;;  %v2511_v0 = vld [vmem:[#allocation2 + $0x74] sm:$0xff] }
 0x228   : > { %v5920_v33 = vpop.f32.mrf.mxu0  ;;  %v1071_v38 = vpop.f32.mrf.mxu2 }
 0x229   : > { %v1154_v7 = vadd.f32 %v1071_v38, %v817_v3  ;;  %v1397_v59 = vpop.f32.mrf.mxu3 }
 0x22a   : > { %v825_v47 = vpop.f32.mrf.mxu1 }
 0x22b   : > { %v5922_v10 = vadd.f32 %v1397_v59, %v1154_v7  ;;  %2648 = vmatmul.bf16.gmra.mxu0 %v2541_v42 }
 0x22d   : > { %7227 = vst [vmem:[#allocation20_spill] sm:$0xff] %v5922_v10  ;;  %2001 = vmatmul.bf16.gmra.mxu2 %v1890_v16  ;;  %1680 = vmatmul.bf16.gmra.mxu1 %v1565_v40  ;;  %v2542_v16 = vpack.c.bf16 %v2512_v26, %v2511_v0  ;;  %v1891_v40 = vpack.c.bf16 %v1862_v63, %v1861_v1  ;;  %v5287_v63 = vld [vmem:[%s7192_s2 + $0x1f8] sm:$0xff]  ;;  %v2514_v26 = vld [vmem:[#allocation2 + $0x8c] sm:$0xff] }
 0x22e   : > { %2327 = vmatmul.bf16.gmra.mxu3 %v2541_v42  ;;  %v1538_v42 = vld [vmem:[#allocation2 + $0x8a] sm:$0xff]  ;;  %2946 = vmatpush.bf16.msra.mxu1 %v5287_v63  ;;  %v1540_v1 = vld [vmem:[#allocation2 + $0x9a] sm:$0xff] }
 0x230   : > { %v5927_v3 = vpop.f32.mrf.mxu0  ;;  %v1074_v32 = vpop.f32.mrf.mxu2 }
 0x231   : > { %v1155_v38 = vadd.f32 %v1074_v32, %v820_v55  ;;  %v1400_v43 = vpop.f32.mrf.mxu3  ;;  %v1537_v32 = vld [vmem:[#allocation2 + $0x82] sm:$0xff] }
 0x232   : > { %v827_v7 = vpop.f32.mrf.mxu1 }
 0x233   : > { %v5929_v59 = vadd.f32 %v1400_v43, %v1155_v38  ;;  %v1566_v38 = vpack.c.bf16 %v1538_v42, %v1537_v32 }
 0x235   : > { %7228 = vst [vmem:[#allocation21_spill] sm:$0xff] %v5929_v59 }
 0x238   : > { %v5931_v62 = vpop.f32.mrf.mxu0  ;;  %v1076_v10 = vpop.f32.mrf.mxu2 }
 0x239   : > { %v1156_v13 = vadd.f32 %v1076_v10, %v822_v17  ;;  %v1402_v61 = vpop.f32.mrf.mxu3  ;;  %v1125_v10 = vadd.f32 %v5885_v21, %v5703_v8 }
 0x23a   : > { %v830_v55 = vpop.f32.mrf.mxu1 }
 0x23b   : > { %v5933_v6 = vadd.f32 %v1402_v61, %v1156_v13  ;;  %2653 = vmatmul.bf16.gmra.mxu0 %v2542_v16  ;;  %v3633_v13 = vld [vmem:[%s7194_s4 + $0x70] sm:$0xff]  ;;  %v1451_v32 = vadd.f32 %v5717_v28, %v1125_v10 }
 0x23c   : > { %3751 = vmatpush.msra.mxu3 %v3633_v13 }
 0x23d   : > { %2006 = vmatmul.bf16.gmra.mxu2 %v1891_v40  ;;  %1685 = vmatmul.bf16.gmra.mxu1 %v1566_v38  ;;  %v1863_v40 = vld [vmem:[#allocation2 + $0x83] sm:$0xff] }
 0x23e   : > { %2332 = vmatmul.bf16.gmra.mxu3 %v2542_v16 }
 0x240   : > { %v5935_v43 = vpop.f32.mrf.mxu0  ;;  %v1079_v59 = vpop.f32.mrf.mxu2 }
 0x241   : > { %v1157_v56 = vadd.f32 %v1079_v59, %v825_v47  ;;  %v1405_v19 = vpop.f32.mrf.mxu3 }
 0x242   : > { %v832_v0 = vpop.f32.mrf.mxu1 }
 0x243   : > { %v5937_v17 = vadd.f32 %v1405_v19, %v1157_v56  ;;  %v2513_v19 = vld [vmem:[#allocation2 + $0x84] sm:$0xff] }
 0x244   : > { %v1864_v56 = vld [vmem:[#allocation2 + $0x8b] sm:$0xff]  ;;  %v2543_v42 = vpack.c.bf16 %v2514_v26, %v2513_v19  ;;  %v1126_v26 = vadd.f32 %v5889_v52, %v5707_v14  ;;  %v2515_v52 = vld [vmem:[#allocation2 + $0x94] sm:$0xff] }
 0x245   : > { %7229 = vst [vmem:[#allocation22_spill] sm:$0xff] %v5937_v17  ;;  %v1892_v13 = vpack.c.bf16 %v1864_v56, %v1863_v40  ;;  %v1539_v17 = vld [vmem:[#allocation2 + $0x92] sm:$0xff] }
 0x246   : > { %v1567_v21 = vpack.c.bf16 %v1540_v1, %v1539_v17  ;;  %v1452_v56 = vadd.f32 %v5726_v34, %v1126_v26  ;;  %v2516_v1 = vld [vmem:[#allocation2 + $0x9c] sm:$0xff] }
 0x248   : > { %v5947_v61 = vpop.f32.mrf.mxu0  ;;  %v1081_v47 = vpop.f32.mrf.mxu2 }
 0x249   : > { %v1158_v59 = vadd.f32 %v1081_v47, %v827_v7  ;;  %v1407_v16 = vpop.f32.mrf.mxu3  ;;  %v5291_v7 = vld [vmem:[%s7192_s2 + $0x218] sm:$0xff] }
 0x24a   : > { %v1651_v63 = vpop.f32.mrf.mxu1  ;;  %3276 = vmatpush.bf16.msra.mxu2 %v5291_v7  ;;  %v1865_v7 = vld [vmem:[#allocation2 + $0x93] sm:$0xff] }
 0x24b   : > { %v5950_v38 = vadd.f32 %v1407_v16, %v1158_v59  ;;  %2658 = vmatmul.bf16.gmra.mxu0 %v2543_v42  ;;  %v1777_v8 = vadd.f32 %v1651_v63, %v1451_v32  ;;  %v1866_v32 = vld [vmem:[#allocation2 + $0x9b] sm:$0xff] }
 0x24d   : > { %2011 = vmatmul.bf16.gmra.mxu2 %v1892_v13  ;;  %1690 = vmatmul.bf16.gmra.mxu1 %v1567_v21  ;;  %v2544_v21 = vpack.c.bf16 %v2516_v1, %v2515_v52 }
 0x24e   : > { %2337 = vmatmul.bf16.gmra.mxu3 %v2543_v42  ;;  %v1127_v42 = vadd.f32 %v5893_v29, %v5714_v23 }
 0x250   : > { %v5957_v28 = vpop.f32.mrf.mxu0  ;;  %v1084_v10 = vpop.f32.mrf.mxu2  ;;  %v1453_v34 = vadd.f32 %v5738_v48, %v1127_v42 }
 0x251   : > { %v1159_v47 = vadd.f32 %v1084_v10, %v830_v55  ;;  %v1410_v19 = vpop.f32.mrf.mxu3  ;;  %v1542_v55 = vld [vmem:[#allocation2 + $0xaa] sm:$0xff]  ;;  %v1893_v10 = vpack.c.bf16 %v1866_v32, %v1865_v7 }
 0x252   : > { %v1653_v17 = vpop.f32.mrf.mxu1  ;;  %v2517_v7 = vld [vmem:[#allocation2 + $0xa4] sm:$0xff] }
 0x253   : > { %v5960_v59 = vadd.f32 %v1410_v19, %v1159_v47  ;;  %v1778_v16 = vadd.f32 %v1653_v17, %v1452_v56  ;;  %v1541_v19 = vld [vmem:[#allocation2 + $0xa2] sm:$0xff]  ;;  %v1128_v56 = vadd.f32 %v5897_v46, %v5720_v31 }
 0x254   : > { %v1568_v29 = vpack.c.bf16 %v1542_v55, %v1541_v19  ;;  %v1867_v19 = vld [vmem:[#allocation2 + $0xa3] sm:$0xff] }
 0x255   : > { %v1454_v48 = vadd.f32 %v5744_v53, %v1128_v56 }
 0x258   : > { %v5964_v40 = vpop.f32.mrf.mxu0  ;;  %v1086_v14 = vpop.f32.mrf.mxu2 }
 0x259   : > { %v1160_v13 = vadd.f32 %v1086_v14, %v832_v0  ;;  %v1412_v63 = vpop.f32.mrf.mxu3 }
 0x25a   : > { %v1656_v47 = vpop.f32.mrf.mxu1 }
 0x25b   : > { %v5967_v26 = vadd.f32 %v1412_v63, %v1160_v13  ;;  %2663 = vmatmul.bf16.gmra.mxu0 %v2544_v21  ;;  %v1779_v23 = vadd.f32 %v1656_v47, %v1453_v34  ;;  %v1129_v13 = vadd.f32 %v5904_v11, %v5729_v41  ;;  %v2518_v63 = vld [vmem:[#allocation2 + $0xac] sm:$0xff]  ;;  %v3631_v41 = vld [vmem:[%s7194_s4 + $0x60] sm:$0xff] }
 0x25c   : > { %v1868_v34 = vld [vmem:[#allocation2 + $0xab] sm:$0xff]  ;;  %v2545_v47 = vpack.c.bf16 %v2518_v63, %v2517_v7  ;;  %3752 = vmatpush.msra.mxu3 %v3631_v41 }
 0x25d   : > { %2016 = vmatmul.bf16.gmra.mxu2 %v1893_v10  ;;  %1695 = vmatmul.bf16.gmra.mxu1 %v1568_v29  ;;  %v1455_v53 = vadd.f32 %v5753_v2, %v1129_v13  ;;  %v1894_v56 = vpack.c.bf16 %v1868_v34, %v1867_v19  ;;  %v5286_v11 = vld [vmem:[%s7192_s2 + $0x1f0] sm:$0xff]  ;;  %v1130_v2 = vadd.f32 %v5908_v20, %v5741_v51  ;;  %v2520_v20 = vld [vmem:[#allocation2 + $0xbc] sm:$0xff] }
 0x25e   : > { %2342 = vmatmul.bf16.gmra.mxu3 %v2544_v21  ;;  %2947 = vmatpush.bf16.msra.mxu1 %v5286_v11  ;;  %v5290_v34 = vld [vmem:[%s7192_s2 + $0x210] sm:$0xff]  ;;  %v1131_v51 = vadd.f32 %v5912_v25, %v5747_v60 }
 0x25f   : > { %3277 = vmatpush.bf16.msra.mxu2 %v5290_v34 }
 0x260   : > { %v5971_v0 = vpop.f32.mrf.mxu0  ;;  %v1977_v17 = vpop.f32.mrf.mxu2 }
 0x261   : > { %v2103_v1 = vadd.f32 %v1977_v17, %v1777_v8  ;;  %v2303_v14 = vpop.f32.mrf.mxu3  ;;  %v1544_v8 = vld [vmem:[#allocation2 + $0xba] sm:$0xff] }
 0x262   : > { %v1658_v52 = vpop.f32.mrf.mxu1 }
 0x263   : > { %v2429_v42 = vadd.f32 %v2303_v14, %v2103_v1  ;;  %v1780_v32 = vadd.f32 %v1658_v52, %v1454_v48  ;;  %v1543_v1 = vld [vmem:[#allocation2 + $0xb2] sm:$0xff] }
 0x264   : > { %v1569_v14 = vpack.c.bf16 %v1544_v8, %v1543_v1  ;;  %v1870_v8 = vld [vmem:[#allocation2 + $0xbb] sm:$0xff]  ;;  %v1457_v1 = vadd.f32 %v5772_v27, %v1131_v51  ;;  %v1133_v51 = vadd.f32 %v5920_v33, %v5761_v18 }
 0x268   : > { %v1979_v55 = vpop.f32.mrf.mxu2  ;;  %v2629_v21 = vpop.f32.mrf.mxu0 }
 0x269   : > { %v2104_v31 = vadd.f32 %v1979_v55, %v1778_v16  ;;  %v2305_v46 = vpop.f32.mrf.mxu3  ;;  %v5976_v10 = vadd.f32 %v2629_v21, %v2429_v42  ;;  %v1456_v55 = vadd.f32 %v5759_v9, %v1130_v2  ;;  %v1545_v2 = vld [vmem:[#allocation2 + $0xc2] sm:$0xff] }
 0x26a   : > { %v1661_v17 = vpop.f32.mrf.mxu1 }
 0x26b   : > { %v2430_v29 = vadd.f32 %v2305_v46, %v2104_v31  ;;  %2668 = vmatmul.bf16.gmra.mxu0 %v2545_v47  ;;  %v1781_v16 = vadd.f32 %v1661_v17, %v1455_v53  ;;  %v1869_v17 = vld [vmem:[#allocation2 + $0xb3] sm:$0xff] }
 0x26c   : > { %v1895_v11 = vpack.c.bf16 %v1870_v8, %v1869_v17 }
 0x26d   : > { %2021 = vmatmul.bf16.gmra.mxu2 %v1894_v56  ;;  %1700 = vmatmul.bf16.gmra.mxu1 %v1569_v14  ;;  %v1546_v56 = vld [vmem:[#allocation2 + $0xca] sm:$0xff] }
 0x26e   : > { %2347 = vmatmul.bf16.gmra.mxu3 %v2545_v47  ;;  %v1570_v25 = vpack.c.bf16 %v1546_v56, %v1545_v2 }
 0x270   : > { %v1982_v48 = vpop.f32.mrf.mxu2  ;;  %v2631_v42 = vpop.f32.mrf.mxu0 }
 0x271   : > { %v2105_v52 = vadd.f32 %v1982_v48, %v1779_v23  ;;  %v2308_v13 = vpop.f32.mrf.mxu3  ;;  %v5987_v63 = vadd.f32 %v2631_v42, %v2430_v29  ;;  %v2519_v23 = vld [vmem:[#allocation2 + $0xb4] sm:$0xff] }
 0x272   : > { %v1663_v7 = vpop.f32.mrf.mxu1  ;;  %v2546_v9 = vpack.c.bf16 %v2520_v20, %v2519_v23  ;;  %v2522_v20 = vld [vmem:[#allocation2 + $0xcc] sm:$0xff]  ;;  %v2521_v23 = vld [vmem:[#allocation2 + $0xc4] sm:$0xff] }
 0x273   : > { %v2431_v21 = vadd.f32 %v2308_v13, %v2105_v52  ;;  %v1782_v31 = vadd.f32 %v1663_v7, %v1456_v55 }
 0x278   : > { %v1984_v46 = vpop.f32.mrf.mxu2  ;;  %v2634_v47 = vpop.f32.mrf.mxu0 }
 0x279   : > { %v2106_v19 = vadd.f32 %v1984_v46, %v1780_v32  ;;  %v2310_v53 = vpop.f32.mrf.mxu3  ;;  %v5995_v29 = vadd.f32 %v2634_v47, %v2431_v21  ;;  %v1132_v32 = vadd.f32 %v5916_v36, %v5756_v5  ;;  %v1872_v5 = vld [vmem:[#allocation2 + $0xcb] sm:$0xff] }
 0x27a   : > { %v1666_v14 = vpop.f32.mrf.mxu1 }
 0x27b   : > { %v2432_v41 = vadd.f32 %v2310_v53, %v2106_v19  ;;  %2673 = vmatmul.bf16.gmra.mxu0 %v2546_v9  ;;  %v1783_v60 = vadd.f32 %v1666_v14, %v1457_v1  ;;  %v1458_v27 = vadd.f32 %v5776_v35, %v1132_v32  ;;  %v1548_v53 = vld [vmem:[#allocation2 + $0xda] sm:$0xff]  ;;  %v1459_v35 = vadd.f32 %v5780_v50, %v1133_v51 }
 0x27c   : > { %v1134_v50 = vadd.f32 %v5927_v3, %v5774_v30  ;;  %v1135_v30 = vadd.f32 %v5931_v62, %v5778_v44  ;;  %v2524_v3 = vld [vmem:[#allocation2 + $0xdc] sm:$0xff] }
 0x27d   : > { %2026 = vmatmul.bf16.gmra.mxu2 %v1895_v11  ;;  %1705 = vmatmul.bf16.gmra.mxu1 %v1570_v25  ;;  %v5285_v11 = vld [vmem:[%s7192_s2 + $0x1e8] sm:$0xff] }
 0x27e   : > { %2352 = vmatmul.bf16.gmra.mxu3 %v2546_v9  ;;  %v1871_v9 = vld [vmem:[#allocation2 + $0xc3] sm:$0xff]  ;;  %2948 = vmatpush.bf16.msra.mxu1 %v5285_v11 }
 0x27f   : > { %v1896_v17 = vpack.c.bf16 %v1872_v5, %v1871_v9  ;;  %v1550_v5 = vld [vmem:[#allocation2 + $0xea] sm:$0xff] }
 0x280   : > { %v1987_v48 = vpop.f32.mrf.mxu2  ;;  %v2636_v42 = vpop.f32.mrf.mxu0 }
 0x281   : > { %v2107_v52 = vadd.f32 %v1987_v48, %v1781_v16  ;;  %v2313_v13 = vpop.f32.mrf.mxu3  ;;  %v6000_v55 = vadd.f32 %v2636_v42, %v2432_v41  ;;  %v2547_v16 = vpack.c.bf16 %v2522_v20, %v2521_v23  ;;  %v1547_v41 = vld [vmem:[#allocation2 + $0xd2] sm:$0xff]  ;;  %v1460_v42 = vadd.f32 %v5787_v58, %v1134_v50  ;;  %v1874_v20 = vld [vmem:[#allocation2 + $0xdb] sm:$0xff] }
 0x282   : > { %v1668_v7 = vpop.f32.mrf.mxu1  ;;  %v1571_v33 = vpack.c.bf16 %v1548_v53, %v1547_v41 }
 0x283   : > { %v2433_v21 = vadd.f32 %v2313_v13, %v2107_v52  ;;  %v1784_v34 = vadd.f32 %v1668_v7, %v1458_v27  ;;  %v5289_v27 = vld [vmem:[%s7192_s2 + $0x208] sm:$0xff] }
 0x284   : > { %3278 = vmatpush.bf16.msra.mxu2 %v5289_v27  ;;  %v1552_v27 = vld [vmem:[#allocation2 + $0xfa] sm:$0xff] }
 0x288   : > { %v1989_v46 = vpop.f32.mrf.mxu2  ;;  %v2639_v47 = vpop.f32.mrf.mxu0 }
 0x289   : > { %v2108_v36 = vadd.f32 %v1989_v46, %v1782_v31  ;;  %v2315_v8 = vpop.f32.mrf.mxu3  ;;  %v6005_v19 = vadd.f32 %v2639_v47, %v2433_v21  ;;  %v3629_v31 = vld [vmem:[%s7194_s4 + $0x50] sm:$0xff] }
 0x28a   : > { %v1671_v1 = vpop.f32.mrf.mxu1  ;;  %3753 = vmatpush.msra.mxu3 %v3629_v31 }
 0x28b   : > { %v2434_v56 = vadd.f32 %v2315_v8, %v2108_v36  ;;  %2678 = vmatmul.bf16.gmra.mxu0 %v2547_v16  ;;  %v1785_v18 = vadd.f32 %v1671_v1, %v1459_v35  ;;  %v1873_v36 = vld [vmem:[#allocation2 + $0xd3] sm:$0xff]  ;;  %v1461_v8 = vadd.f32 %v5791_v12, %v1135_v30  ;;  %v1549_v35 = vld [vmem:[#allocation2 + $0xe2] sm:$0xff] }
 0x28c   : > { %v1897_v53 = vpack.c.bf16 %v1874_v20, %v1873_v36  ;;  %v1572_v62 = vpack.c.bf16 %v1550_v5, %v1549_v35  ;;  %v1875_v30 = vld [vmem:[#allocation2 + $0xe3] sm:$0xff] }
 0x28d   : > { %2031 = vmatmul.bf16.gmra.mxu2 %v1896_v17  ;;  %1710 = vmatmul.bf16.gmra.mxu1 %v1571_v33 }
 0x28e   : > { %2357 = vmatmul.bf16.gmra.mxu3 %v2547_v16 }
 0x290   : > { %v1992_v14 = vpop.f32.mrf.mxu2  ;;  %v2641_v2 = vpop.f32.mrf.mxu0 }
 0x291   : > { %v2109_v25 = vadd.f32 %v1992_v14, %v1783_v60  ;;  %v2318_v32 = vpop.f32.mrf.mxu3  ;;  %v6016_v48 = vadd.f32 %v2641_v2, %v2434_v56  ;;  %v2523_v60 = vld [vmem:[#allocation2 + $0xd4] sm:$0xff]  ;;  %v1137_v14 = vadd.f32 %v5947_v61, %v5789_v4  ;;  %v2526_v2 = vld [vmem:[#allocation2 + $0xec] sm:$0xff] }
 0x292   : > { %v1673_v13 = vpop.f32.mrf.mxu1  ;;  %v2548_v58 = vpack.c.bf16 %v2524_v3, %v2523_v60  ;;  %v1551_v60 = vld [vmem:[#allocation2 + $0xf2] sm:$0xff] }
 0x293   : > { %v2435_v52 = vadd.f32 %v2318_v32, %v2109_v25  ;;  %v1786_v21 = vadd.f32 %v1673_v13, %v1460_v42  ;;  %v2525_v42 = vld [vmem:[#allocation2 + $0xe4] sm:$0xff]  ;;  %v1573_v61 = vpack.c.bf16 %v1552_v27, %v1551_v60 }
 0x294   : > { %v2529_v60 = vld [vmem:[#allocation2 + $0x104] sm:$0xff] }
 0x298   : > { %v1994_v7 = vpop.f32.mrf.mxu2  ;;  %v2644_v51 = vpop.f32.mrf.mxu0 }
 0x299   : > { %v2110_v46 = vadd.f32 %v1994_v7, %v1784_v34  ;;  %v2320_v47 = vpop.f32.mrf.mxu3  ;;  %v6024_v23 = vadd.f32 %v2644_v51, %v2435_v52  ;;  %v1136_v34 = vadd.f32 %v5935_v43, %v5782_v54  ;;  %v1876_v54 = vld [vmem:[#allocation2 + $0xeb] sm:$0xff] }
 0x29a   : > { %v1676_v9 = vpop.f32.mrf.mxu1  ;;  %v1898_v7 = vpack.c.bf16 %v1876_v54, %v1875_v30  ;;  %v5282_v30 = vld [vmem:[%s7192_s2 + $0x1d0] sm:$0xff] }
 0x29b   : > { %v2436_v16 = vadd.f32 %v2320_v47, %v2110_v46  ;;  %2683 = vmatmul.bf16.gmra.mxu0 %v2548_v58  ;;  %v1787_v44 = vadd.f32 %v1676_v9, %v1461_v8  ;;  %v1462_v12 = vadd.f32 %v5804_v22, %v1136_v34  ;;  %v1463_v22 = vadd.f32 %v5811_v45, %v1137_v14  ;;  %v2528_v9 = vld [vmem:[#allocation2 + $0xfc] sm:$0xff] }
 0x29d   : > { %2036 = vmatmul.bf16.gmra.mxu2 %v1897_v53  ;;  %1715 = vmatmul.bf16.gmra.mxu1 %v1572_v62  ;;  %v5284_v53 = vld [vmem:[%s7192_s2 + $0x1e0] sm:$0xff] }
 0x29e   : > { %2362 = vmatmul.bf16.gmra.mxu3 %v2548_v58  ;;  %2949 = vmatpush.bf16.msra.mxu1 %v5284_v53  ;;  %v1878_v62 = vld [vmem:[#allocation2 + $0xfb] sm:$0xff] }
 0x2a0   : > { %v1997_v56 = vpop.f32.mrf.mxu2  ;;  %v2646_v17 = vpop.f32.mrf.mxu0 }
 0x2a1   : > { %v2111_v1 = vadd.f32 %v1997_v56, %v1785_v18  ;;  %v2323_v41 = vpop.f32.mrf.mxu3  ;;  %v6029_v33 = vadd.f32 %v2646_v17, %v2436_v16  ;;  %v2549_v18 = vpack.c.bf16 %v2526_v2, %v2525_v42  ;;  %v3627_v16 = vld [vmem:[%s7194_s4 + $0x40] sm:$0xff] }
 0x2a2   : > { %v1678_v11 = vpop.f32.mrf.mxu1  ;;  %3754 = vmatpush.msra.mxu3 %v3627_v16  ;;  %v7230_v16 = vld [vmem:[#allocation7_spill] sm:$0xff] }
 0x2a3   : > { %v2437_v31 = vadd.f32 %v2323_v41, %v2111_v1  ;;  %v1788_v50 = vadd.f32 %v1678_v11, %v1462_v12  ;;  %v1554_v41 = vld [vmem:[#allocation2 + $0x10a] sm:$0xff]  ;;  %v1877_v12 = vld [vmem:[#allocation2 + $0xf3] sm:$0xff] }
 0x2a4   : > { %v1899_v14 = vpack.c.bf16 %v1878_v62, %v1877_v12  ;;  %v3625_v62 = vld [vmem:[%s7194_s4 + $0x30] sm:$0xff] }
 0x2a5   : > { %3755 = vmatpush.msra.mxu3 %v3625_v62  ;;  %v2531_v12 = vld [vmem:[#allocation2 + $0x114] sm:$0xff] }
 0x2a8   : > { %v1999_v25 = vpop.f32.mrf.mxu2  ;;  %v2649_v32 = vpop.f32.mrf.mxu0 }
 0x2a9   : > { %v2112_v43 = vadd.f32 %v1999_v25, %v1786_v21  ;;  %v2325_v52 = vpop.f32.mrf.mxu3  ;;  %v6034_v13 = vadd.f32 %v2649_v32, %v2437_v31  ;;  %v1138_v21 = vadd.f32 %v5957_v28, %v5793_v15  ;;  %v1139_v28 = vadd.f32 %v5964_v40, %v5806_v37  ;;  %v1553_v25 = vld [vmem:[#allocation2 + $0x102] sm:$0xff] }
 0x2aa   : > { %v1681_v51 = vpop.f32.mrf.mxu1  ;;  %v5288_v37 = vld [vmem:[%s7192_s2 + $0x200] sm:$0xff]  ;;  %v1574_v32 = vpack.c.bf16 %v1554_v41, %v1553_v25  ;;  %v1558_v25 = vld [vmem:[#allocation2 + $0x12a] sm:$0xff] }
 0x2ab   : > { %v2438_v3 = vadd.f32 %v2325_v52, %v2112_v43  ;;  %2688 = vmatmul.bf16.gmra.mxu0 %v2549_v18  ;;  %v1789_v4 = vadd.f32 %v1681_v51, %v1463_v22  ;;  %v1464_v45 = vadd.f32 %v5821_v57, %v1138_v21  ;;  %v2527_v57 = vld [vmem:[#allocation2 + $0xf4] sm:$0xff]  ;;  %v1465_v31 = vadd.f32 %v5838_v24, %v1139_v28 }
 0x2ac   : > { %v2550_v1 = vpack.c.bf16 %v2528_v9, %v2527_v57  ;;  %3279 = vmatpush.bf16.msra.mxu2 %v5288_v37  ;;  %v5283_v24 = vld [vmem:[%s7192_s2 + $0x1d8] sm:$0xff]  ;;  %v3623_v37 = vld [vmem:[%s7194_s4 + $0x20] sm:$0xff] }
 0x2ad   : > { %2041 = vmatmul.bf16.gmra.mxu2 %v1898_v7  ;;  %1720 = vmatmul.bf16.gmra.mxu1 %v1573_v61  ;;  %v5281_v7 = vld [vmem:[%s7192_s2 + $0x1c8] sm:$0xff] }
 0x2ae   : > { %2367 = vmatmul.bf16.gmra.mxu3 %v2549_v18  ;;  %2950 = vmatpush.bf16.msra.mxu1 %v5283_v24 }
 0x2af   : > { %3756 = vmatpush.msra.mxu3 %v3623_v37  ;;  %v2536_v37 = vld [vmem:[#allocation2 + $0x13c] sm:$0xff] }
 0x2b0   : > { %v2002_v20 = vpop.f32.mrf.mxu2  ;;  %v2651_v46 = vpop.f32.mrf.mxu0 }
 0x2b1   : > { %v2113_v47 = vadd.f32 %v2002_v20, %v1787_v44  ;;  %v2328_v58 = vpop.f32.mrf.mxu3  ;;  %v6039_v5 = vadd.f32 %v2651_v46, %v2438_v3  ;;  %v2530_v3 = vld [vmem:[#allocation2 + $0x10c] sm:$0xff]  ;;  %v1556_v20 = vld [vmem:[#allocation2 + $0x11a] sm:$0xff]  ;;  %v1879_v46 = vld [vmem:[#allocation2 + $0x103] sm:$0xff] }
 0x2b2   : > { %v1683_v8 = vpop.f32.mrf.mxu1  ;;  %2951 = vmatpush.bf16.msra.mxu1 %v5282_v30  ;;  %v2551_v21 = vpack.c.bf16 %v2530_v3, %v2529_v60 }
 0x2b3   : > { %v2439_v36 = vadd.f32 %v2328_v58, %v2113_v47  ;;  %v1790_v15 = vadd.f32 %v1683_v8, %v1464_v45  ;;  %v5280_v47 = vld [vmem:[%s7192_s2 + $0x1c0] sm:$0xff]  ;;  %v1555_v8 = vld [vmem:[#allocation2 + $0x112] sm:$0xff] }
 0x2b4   : > { %v1575_v28 = vpack.c.bf16 %v1556_v20, %v1555_v8 }
 0x2b6   : > { %2952 = vmatpush.bf16.msra.mxu1 %v5281_v7 }
 0x2b8   : > { %v2004_v35 = vpop.f32.mrf.mxu2  ;;  %v2654_v44 = vpop.f32.mrf.mxu0 }
 0x2b9   : > { %v2114_v34 = vadd.f32 %v2004_v35, %v1788_v50  ;;  %v2330_v56 = vpop.f32.mrf.mxu3  ;;  %v6050_v17 = vadd.f32 %v2654_v44, %v2439_v36  ;;  %v1140_v50 = vadd.f32 %v5971_v0, %v5816_v49 }
 0x2ba   : > { %v1686_v2 = vpop.f32.mrf.mxu1  ;;  %2953 = vmatpush.bf16.msra.mxu1 %v5280_v47  ;;  %v1884_v47 = vld [vmem:[#allocation2 + $0x12b] sm:$0xff] }
 0x2bb   : > { %v2440_v11 = vadd.f32 %v2330_v56, %v2114_v34  ;;  %2693 = vmatmul.bf16.gmra.mxu0 %v2550_v1  ;;  %v1791_v40 = vadd.f32 %v1686_v2, %v1465_v31  ;;  %v1466_v27 = vadd.f32 %v5849_v39, %v1140_v50  ;;  %v7231_v34 = vld [vmem:[#allocation8_spill] sm:$0xff]  ;;  %v1882_v31 = vld [vmem:[#allocation2 + $0x11b] sm:$0xff] }
 0x2bd   : > { %2046 = vmatmul.bf16.gmra.mxu2 %v1899_v14  ;;  %1725 = vmatmul.bf16.gmra.mxu1 %v1574_v32  ;;  %v1557_v32 = vld [vmem:[#allocation2 + $0x122] sm:$0xff] }
 0x2be   : > { %2372 = vmatmul.bf16.gmra.mxu3 %v2550_v1  ;;  %v2532_v1 = vld [vmem:[#allocation2 + $0x11c] sm:$0xff] }
 0x2bf   : > { %v2552_v2 = vpack.c.bf16 %v2532_v1, %v2531_v12  ;;  %v6111_v1 = vld [vmem:[%s7193_s3 + $0xe8] sm:$0xff] }
 0x2c0   : > { %v2007_v42 = vpop.f32.mrf.mxu2  ;;  %v2656_v54 = vpop.f32.mrf.mxu0 }
 0x2c1   : > { %v2115_v43 = vadd.f32 %v2007_v42, %v1789_v4  ;;  %v2333_v52 = vpop.f32.mrf.mxu3  ;;  %v6061_v18 = vadd.f32 %v2656_v54, %v2440_v11  ;;  %v1880_v4 = vld [vmem:[#allocation2 + $0x10b] sm:$0xff] }
 0x2c2   : > { %v1688_v0 = vpop.f32.mrf.mxu1  ;;  %v1900_v45 = vpack.c.bf16 %v1880_v4, %v1879_v46  ;;  %v3621_v54 = vld [vmem:[%s7194_s4 + $0x10] sm:$0xff]  ;;  %v2533_v46 = vld [vmem:[#allocation2 + $0x124] sm:$0xff] }
 0x2c3   : > { %v6067_v49 = vadd.f32 %v2333_v52, %v2115_v43  ;;  %v1792_v22 = vadd.f32 %v1688_v0, %v1466_v27  ;;  %v3634_v43 = vld [vmem:[%s7194_s4 + $0x78] sm:$0xff]  ;;  %v3619_v52 = vld [vmem:[%s7194_s4] sm:$0xff]  ;;  %v1576_v0 = vpack.c.bf16 %v1558_v25, %v1557_v32  ;;  %3757 = vmatpush.msra.mxu3 %v3621_v54  ;;  %v3154_v32 = vld [vmem:[#allocation2 + $0x2e] sm:$0xff] }
 0x2c4   : > { %v7232_v27 = vld [vmem:[#allocation9_spill] sm:$0xff]  ;;  %3876 = vmatpush.msrb.mxu0 %v3634_v43 }
 0x2c5   : > { %3758 = vmatpush.msra.mxu3 %v3619_v52  ;;  %v2535_v25 = vld [vmem:[#allocation2 + $0x134] sm:$0xff]  ;;  %v2830_v43 = vld [vmem:[#allocation2 + $0x3d] sm:$0xff]  ;;  %v3153_v52 = vld [vmem:[#allocation2 + $0x26] sm:$0xff] }
 0x2c6   : > { %v2554_v54 = vpack.c.bf16 %v2536_v37, %v2535_v25 }
 0x2c8   : > { %v2009_v51 = vpop.f32.mrf.mxu2 }
 0x2c9   : > { %v2116_v61 = vadd.f32 %v2009_v51, %v1790_v15  ;;  %v2335_v39 = vpop.f32.mrf.mxu3 }
 0x2ca   : > { %v1691_v36 = vpop.f32.mrf.mxu1 }
 0x2cb   : > { %v6075_v58 = vadd.f32 %v2335_v39, %v2116_v61  ;;  %2698 = vmatmul.bf16.gmra.mxu0 %v2551_v21  ;;  %v1793_v53 = vadd.f32 %v1691_v36, %v7230_v16  ;;  %v7233_v61 = vld [vmem:[#allocation10_spill] sm:$0xff]  ;;  %v2828_v16 = vld [vmem:[#allocation2 + $0x2d] sm:$0xff] }
 0x2cd   : > { %2051 = vmatmul.bf16.gmra.mxu2 %v1900_v45  ;;  %1730 = vmatmul.bf16.gmra.mxu1 %v1575_v28  ;;  %v1883_v28 = vld [vmem:[#allocation2 + $0x123] sm:$0xff] }
 0x2ce   : > { %2377 = vmatmul.bf16.gmra.mxu3 %v2551_v21  ;;  %v2534_v21 = vld [vmem:[#allocation2 + $0x12c] sm:$0xff] }
 0x2cf   : > { %v2553_v8 = vpack.c.bf16 %v2534_v21, %v2533_v46  ;;  %v6129_v46 = vld [vmem:[%s5550_s7 + $0x1b] sm:$0xff] }
 0x2d0   : > { %v2012_v15 = vpop.f32.mrf.mxu2 }
 0x2d1   : > { %v2117_v9 = vadd.f32 %v2012_v15, %v1791_v40  ;;  %v2338_v35 = vpop.f32.mrf.mxu3  ;;  %v1881_v40 = vld [vmem:[#allocation2 + $0x113] sm:$0xff] }
 0x2d2   : > { %v1693_v57 = vpop.f32.mrf.mxu1  ;;  %v1901_v24 = vpack.c.bf16 %v1882_v31, %v1881_v40 }
 0x2d3   : > { %v6078_v44 = vadd.f32 %v2338_v35, %v2117_v9  ;;  %v1794_v56 = vadd.f32 %v1693_v57, %v7231_v34  ;;  %v1902_v9 = vpack.c.bf16 %v1884_v47, %v1883_v28  ;;  %v2827_v35 = vld [vmem:[#allocation2 + $0x25] sm:$0xff] }
 0x2d4   : > { %v7234_v57 = vld [vmem:[#allocation11_spill] sm:$0xff]  ;;  %v2863_v34 = vpack.c.bf16 %v2828_v16, %v2827_v35 }
 0x2d8   : > { %v2014_v41 = vpop.f32.mrf.mxu2 }
 0x2d9   : > { %v2118_v11 = vadd.f32 %v2014_v41, %v1792_v22  ;;  %v2340_v14 = vpop.f32.mrf.mxu3  ;;  %v3582_v22 = vld [vmem:[%s7193_s3 + $0xf8] sm:$0xff] }
 0x2da   : > { %v1696_v42 = vpop.f32.mrf.mxu1  ;;  %4118 = vmatpush.msrb.mxu2 %v3582_v22 }
 0x2db   : > { %v6087_v50 = vadd.f32 %v2340_v14, %v2118_v11  ;;  %2703 = vmatmul.bf16.gmra.mxu0 %v2552_v2  ;;  %v1795_v30 = vadd.f32 %v1696_v42, %v7232_v27  ;;  %v7235_v14 = vld [vmem:[#allocation12_spill] sm:$0xff] }
 0x2dc   : > { %4119 = vmatpush.msrb.mxu2 %v6111_v1  ;;  %v6118_v27 = vld [vmem:[%s5550_s7 + $0x13] sm:$0xff] }
 0x2dd   : > { %2056 = vmatmul.bf16.gmra.mxu2 %v1901_v24  ;;  %1735 = vmatmul.bf16.gmra.mxu1 %v1576_v0 }
 0x2de   : > { %2382 = vmatmul.bf16.gmra.mxu3 %v2552_v2 }
 0x2e0   : > { %v2017_v3 = vpop.f32.mrf.mxu2 }
 0x2e1   : > { %v2119_v7 = vadd.f32 %v2017_v3, %v1793_v53  ;;  %v2343_v51 = vpop.f32.mrf.mxu3  ;;  %v2829_v3 = vld [vmem:[#allocation2 + $0x35] sm:$0xff] }
 0x2e2   : > { %v1698_v4 = vpop.f32.mrf.mxu1 }
 0x2e3   : > { %v6102_v60 = vadd.f32 %v2343_v51, %v2119_v7  ;;  %v1796_v39 = vadd.f32 %v1698_v4, %v7233_v61  ;;  %v7237_v7 = vld [vmem:[#allocation13_spill] sm:$0xff]  ;;  %v2864_v4 = vpack.c.bf16 %v2830_v43, %v2829_v3  ;;  %v3632_v61 = vld [vmem:[%s7194_s4 + $0x68] sm:$0xff] }
 0x2e4   : > { %3877 = vmatpush.msrb.mxu0 %v3632_v61  ;;  %v6158_v43 = vld [vmem:[%s7193_s3 + $0xc8] sm:$0xff] }
 0x2e5   : > { %v3158_v3 = vld [vmem:[#allocation2 + $0x4e] sm:$0xff]  ;;  %v3157_v61 = vld [vmem:[#allocation2 + $0x46] sm:$0xff] }
 0x2e8   : > { %v2019_v20 = vpop.f32.mrf.mxu2 }
 0x2e9   : > { %v2120_v45 = vadd.f32 %v2019_v20, %v1794_v56  ;;  %v2345_v36 = vpop.f32.mrf.mxu3 }
 0x2ea   : > { %v1701_v53 = vpop.f32.mrf.mxu1 }
 0x2eb   : > { %v6105_v15 = vadd.f32 %v2345_v36, %v2120_v45  ;;  %2708 = vmatmul.bf16.gmra.mxu0 %v2553_v8  ;;  %v1797_v62 = vadd.f32 %v1701_v53, %v7234_v57  ;;  %v6136_v36 = vld [vmem:[%s7193_s3 + $0xd8] sm:$0xff]  ;;  %v2832_v57 = vld [vmem:[#allocation2 + $0x4d] sm:$0xff] }
 0x2ec   : > { %4120 = vmatpush.msrb.mxu2 %v6136_v36 }
 0x2ed   : > { %2061 = vmatmul.bf16.gmra.mxu2 %v1902_v9  ;;  %2954 = vmatmul.bf16.vlgmr.msra.gmra.mxu1 %v2863_v34  ;;  %v3156_v9 = vld [vmem:[#allocation2 + $0x3e] sm:$0xff] }
 0x2ee   : > { %2387 = vmatmul.bf16.gmra.mxu3 %v2553_v8  ;;  %v7239_v8 = vld [vmem:[#allocation14_spill] sm:$0xff]  ;;  %4121 = vmatpush.msrb.mxu2 %v6158_v43 }
 0x2ef   : > { %v6143_v34 = vld [vmem:[%s5550_s7 + $0x23] sm:$0xff] }
 0x2f0   : > { %v2022_v56 = vpop.f32.mrf.mxu2 }
 0x2f1   : > { %v2121_v41 = vadd.f32 %v2022_v56, %v1795_v30  ;;  %v2348_v12 = vpop.f32.mrf.mxu3  ;;  %v3189_v30 = vpack.c.bf16 %v3154_v32, %v3153_v52  ;;  %v7243_v52 = vld [vmem:[#allocation16_spill] sm:$0xff] }
 0x2f2   : > { %v1703_v11 = vpop.f32.mrf.mxu1 }
 0x2f3   : > { %v6114_v31 = vadd.f32 %v2348_v12, %v2121_v41  ;;  %v1798_v2 = vadd.f32 %v1703_v11, %v7235_v14  ;;  %v2831_v11 = vld [vmem:[#allocation2 + $0x45] sm:$0xff] }
 0x2f4   : > { %v7241_v14 = vld [vmem:[#allocation15_spill] sm:$0xff]  ;;  %v2865_v37 = vpack.c.bf16 %v2832_v57, %v2831_v11  ;;  %v3630_v11 = vld [vmem:[%s7194_s4 + $0x58] sm:$0xff] }
 0x2f5   : > { %3878 = vmatpush.msrb.mxu0 %v3630_v11  ;;  %v7251_v11 = vld [vmem:[#allocation20_spill] sm:$0xff] }
 0x2f8   : > { %v2024_v40 = vpop.f32.mrf.mxu2 }
 0x2f9   : > { %v2122_v24 = vadd.f32 %v2024_v40, %v1796_v39  ;;  %v2350_v42 = vpop.f32.mrf.mxu3 }
 0x2fa   : > { %v1706_v22 = vpop.f32.mrf.mxu1 }
 0x2fb   : > { %v6120_v0 = vadd.f32 %v2350_v42, %v2122_v24  ;;  %2713 = vmatmul.bf16.gmra.mxu0 %v2554_v54  ;;  %v1799_v51 = vadd.f32 %v1706_v22, %v7237_v7  ;;  %v6151_v24 = vld [vmem:[%s5550_s7 + $0x2b] sm:$0xff] }
 0x2fd   : > { %7236 = vst [vmem:[#allocation7_spill] sm:$0xff] %v6120_v0  ;;  %3280 = vmatmul.bf16.vlgmr.msra.gmra.mxu2 %v3189_v30  ;;  %2959 = vmatmul.bf16.gmra.mxu1 %v2864_v4  ;;  %v2834_v4 = vld [vmem:[#allocation2 + $0x5d] sm:$0xff]  ;;  %v2845_v0 = vld [vmem:[#allocation2 + $0xb5] sm:$0xff] }
 0x2fe   : > { %5147 = vmatmul.msk.f32.vlgmr.msra.gmra.mxu3 %vm272_vm0, %v6118_v27 }
 0x300   : > { %v2027_v39 = vpop.f32.mrf.mxu2 }
 0x301   : > { %v2123_v21 = vadd.f32 %v2027_v39, %v1797_v62  ;;  %v2353_v20 = vpop.f32.mrf.mxu3  ;;  %v3155_v62 = vld [vmem:[#allocation2 + $0x36] sm:$0xff] }
 0x302   : > { %v1708_v45 = vpop.f32.mrf.mxu1  ;;  %v3190_v41 = vpack.c.bf16 %v3156_v9, %v3155_v62  ;;  %v6165_v39 = vld [vmem:[%s5550_s7 + $0x33] sm:$0xff]  ;;  %v6173_v62 = vld [vmem:[%s5550_s7 + $0x3b] sm:$0xff] }
 0x303   : > { %v6131_v47 = vadd.f32 %v2353_v20, %v2123_v21  ;;  %v1800_v16 = vadd.f32 %v1708_v45, %v7239_v8  ;;  %v3191_v20 = vpack.c.bf16 %v3158_v3, %v3157_v61  ;;  %v2833_v8 = vld [vmem:[#allocation2 + $0x55] sm:$0xff]  ;;  %v6190_v3 = vld [vmem:[%s5550_s7 + $0x43] sm:$0xff] }
 0x304   : > { %v2835_v61 = vld [vmem:[#allocation2 + $0x65] sm:$0xff] }
 0x305   : > { %7238 = vst [vmem:[#allocation8_spill] sm:$0xff] %v6131_v47 }
 0x306   : > { %5148 = vmatmul.msk.f32.gmra.mxu3 %vm272_vm0, %v6129_v46 }
 0x308   : > { %v2029_v28 = vpop.f32.mrf.mxu2 }
 0x309   : > { %v2124_v53 = vadd.f32 %v2029_v28, %v1798_v2  ;;  %v2355_v35 = vpop.f32.mrf.mxu3  ;;  %v7245_v28 = vld [vmem:[#allocation17_spill] sm:$0xff] }
 0x30a   : > { %v1711_v12 = vpop.f32.mrf.mxu1 }
 0x30b   : > { %v6145_v56 = vadd.f32 %v2355_v35, %v2124_v53  ;;  %v1801_v25 = vadd.f32 %v1711_v12, %v7241_v14  ;;  %v2866_v53 = vpack.c.bf16 %v2834_v4, %v2833_v8  ;;  %v7247_v14 = vld [vmem:[#allocation18_spill] sm:$0xff] }
 0x30d   : > { %7240 = vst [vmem:[#allocation9_spill] sm:$0xff] %v6145_v56  ;;  %3285 = vmatmul.bf16.gmra.mxu2 %v3190_v41  ;;  %2964 = vmatmul.bf16.gmra.mxu1 %v2865_v37  ;;  %v3626_v56 = vld [vmem:[%s7194_s4 + $0x38] sm:$0xff] }
 0x30e   : > { %5149 = vmatmul.msk.f32.gmra.mxu3 %vm272_vm0, %v6143_v34 }
 0x310   : > { %v2032_v2 = vpop.f32.mrf.mxu2 }
 0x311   : > { %v2125_v40 = vadd.f32 %v2032_v2, %v1799_v51  ;;  %v2358_v32 = vpop.f32.mrf.mxu3 }
 0x312   : > { %v1713_v54 = vpop.f32.mrf.mxu1 }
 0x313   : > { %v6153_v42 = vadd.f32 %v2358_v32, %v2125_v40  ;;  %v1802_v30 = vadd.f32 %v1713_v54, %v7243_v52  ;;  %v3160_v40 = vld [vmem:[#allocation2 + $0x5e] sm:$0xff]  ;;  %v2836_v52 = vld [vmem:[#allocation2 + $0x6d] sm:$0xff] }
 0x314   : > { %v2867_v8 = vpack.c.bf16 %v2836_v52, %v2835_v61  ;;  %v2838_v52 = vld [vmem:[#allocation2 + $0x7d] sm:$0xff] }
 0x315   : > { %7242 = vst [vmem:[#allocation10_spill] sm:$0xff] %v6153_v42 }
 0x316   : > { %5150 = vmatmul.msk.f32.gmra.mxu3 %vm272_vm0, %v6151_v24 }
 0x318   : > { %v2034_v22 = vpop.f32.mrf.mxu2 }
 0x319   : > { %v2126_v7 = vadd.f32 %v2034_v22, %v1800_v16  ;;  %v2360_v51 = vpop.f32.mrf.mxu3  ;;  %v3159_v22 = vld [vmem:[#allocation2 + $0x56] sm:$0xff] }
 0x31a   : > { %v1716_v45 = vpop.f32.mrf.mxu1 }
 0x31b   : > { %v6167_v21 = vadd.f32 %v2360_v51, %v2126_v7  ;;  %v1803_v9 = vadd.f32 %v1716_v45, %v7245_v28  ;;  %v3192_v51 = vpack.c.bf16 %v3160_v40, %v3159_v22  ;;  %v3162_v40 = vld [vmem:[#allocation2 + $0x6e] sm:$0xff]  ;;  %v3161_v22 = vld [vmem:[#allocation2 + $0x66] sm:$0xff] }
 0x31c   : > { %v3193_v61 = vpack.c.bf16 %v3162_v40, %v3161_v22 }
 0x31d   : > { %7244 = vst [vmem:[#allocation11_spill] sm:$0xff] %v6167_v21  ;;  %3290 = vmatmul.bf16.gmra.mxu2 %v3191_v20  ;;  %2969 = vmatmul.bf16.gmra.mxu1 %v2866_v53  ;;  %v7249_v20 = vld [vmem:[#allocation19_spill] sm:$0xff] }
 0x31e   : > { %5151 = vmatmul.msk.f32.gmra.mxu3 %vm272_vm0, %v6165_v39  ;;  %v3165_v21 = vld [vmem:[#allocation2 + $0x86] sm:$0xff] }
 0x320   : > { %v2037_v16 = vpop.f32.mrf.mxu2 }
 0x321   : > { %v2127_v35 = vadd.f32 %v2037_v16, %v1801_v25  ;;  %v2363_v57 = vpop.f32.mrf.mxu3  ;;  %v6186_v25 = vld [vmem:[%s7193_s3 + $0xb8] sm:$0xff]  ;;  %v6197_v16 = vpop.f32.mrf.mxu0 }
 0x322   : > { %v1718_v12 = vpop.f32.mrf.mxu1  ;;  %4122 = vmatpush.msrb.mxu2 %v6186_v25 }
 0x323   : > { %v6175_v41 = vadd.f32 %v2363_v57, %v2127_v35  ;;  %v1804_v37 = vadd.f32 %v1718_v12, %v7247_v14  ;;  %v6200_v35 = vld [vmem:[%s5550_s7 + $0x4b] sm:$0xff] }
 0x325   : > { %7246 = vst [vmem:[#allocation12_spill] sm:$0xff] %v6175_v41 }
 0x326   : > { %5152 = vmatmul.msk.f32.gmra.mxu3 %vm272_vm0, %v6173_v62 }
 0x328   : > { %v2039_v2 = vpop.f32.mrf.mxu2 }
 0x329   : > { %v2128_v32 = vadd.f32 %v2039_v2, %v1802_v30  ;;  %v2365_v54 = vpop.f32.mrf.mxu3  ;;  %v6210_v2 = vld [vmem:[%s7193_s3 + $0xa8] sm:$0xff] }
 0x32a   : > { %v1721_v4 = vpop.f32.mrf.mxu1  ;;  %4123 = vmatpush.msrb.mxu2 %v6210_v2 }
 0x32b   : > { %v6192_v7 = vadd.f32 %v2365_v54, %v2128_v32  ;;  %v1805_v45 = vadd.f32 %v1721_v4, %v7249_v20 }
 0x32d   : > { %7248 = vst [vmem:[#allocation13_spill] sm:$0xff] %v6192_v7  ;;  %3295 = vmatmul.bf16.gmra.mxu2 %v3192_v51  ;;  %2974 = vmatmul.bf16.gmra.mxu1 %v2867_v8  ;;  %v6214_v51 = vld [vmem:[%s5550_s7 + $0x53] sm:$0xff] }
 0x32e   : > { %5153 = vmatmul.msk.f32.gmra.mxu3 %vm272_vm0, %v6190_v3  ;;  %v2837_v8 = vld [vmem:[#allocation2 + $0x75] sm:$0xff] }
 0x330   : > { %v2042_v30 = vpop.f32.mrf.mxu2 }
 0x331   : > { %v2129_v28 = vadd.f32 %v2042_v30, %v1803_v9  ;;  %v2368_v53 = vpop.f32.mrf.mxu3  ;;  %v6218_v30 = vpop.f32.mrf.mxu0 }
 0x332   : > { %v1723_v12 = vpop.f32.mrf.mxu1 }
 0x333   : > { %v6202_v57 = vadd.f32 %v2368_v53, %v2129_v28  ;;  %v1806_v14 = vadd.f32 %v1723_v12, %v7251_v11  ;;  %v7253_v28 = vld [vmem:[#allocation21_spill] sm:$0xff]  ;;  %v2868_v12 = vpack.c.bf16 %v2838_v52, %v2837_v8  ;;  %v3628_v52 = vld [vmem:[%s7194_s4 + $0x48] sm:$0xff] }
 0x334   : > { %3879 = vmatpush.msrb.mxu0 %v3628_v52  ;;  %v7256_v52 = vld [vmem:[#allocation22_spill] sm:$0xff] }
 0x335   : > { %7250 = vst [vmem:[#allocation14_spill] sm:$0xff] %v6202_v57  ;;  %v6224_v57 = vld [vmem:[%s5550_s7 + $0x5b] sm:$0xff] }
 0x336   : > { %5154 = vmatmul.msk.f32.gmra.mxu3 %vm272_vm0, %v6200_v35  ;;  %3880 = vmatpush.msrb.mxu0 %v3626_v56 }
 0x338   : > { %v2044_v9 = vpop.f32.mrf.mxu2 }
 0x339   : > { %v2130_v32 = vadd.f32 %v2044_v9, %v1804_v37  ;;  %v2370_v54 = vpop.f32.mrf.mxu3  ;;  %v6234_v22 = vpop.f32.mrf.mxu0 }
 0x33a   : > { %v1726_v20 = vpop.f32.mrf.mxu1 }
 0x33b   : > { %v6216_v4 = vadd.f32 %v2370_v54, %v2130_v32  ;;  %v1807_v53 = vadd.f32 %v1726_v20, %v7253_v28  ;;  %v2840_v28 = vld [vmem:[#allocation2 + $0x8d] sm:$0xff] }
 0x33d   : > { %7252 = vst [vmem:[#allocation15_spill] sm:$0xff] %v6216_v4  ;;  %3300 = vmatmul.bf16.gmra.mxu2 %v3193_v61  ;;  %2979 = vmatmul.bf16.gmra.mxu1 %v2868_v12  ;;  %v3164_v61 = vld [vmem:[#allocation2 + $0x7e] sm:$0xff]  ;;  %v3163_v12 = vld [vmem:[#allocation2 + $0x76] sm:$0xff] }
 0x33e   : > { %5155 = vmatmul.msk.f32.gmra.mxu3 %vm272_vm0, %v6214_v51 }
 0x340   : > { %v2047_v37 = vpop.f32.mrf.mxu2 }
 0x341   : > { %v2131_v11 = vadd.f32 %v2047_v37, %v1805_v45  ;;  %v2373_v9 = vpop.f32.mrf.mxu3  ;;  %v6237_v37 = vld [vmem:[%s5550_s7 + $0x63] sm:$0xff] }
 0x342   : > { %v1728_v40 = vpop.f32.mrf.mxu1 }
 0x343   : > { %v6226_v32 = vadd.f32 %v2373_v9, %v2131_v11  ;;  %v1808_v54 = vadd.f32 %v1728_v40, %v5933_v6  ;;  %v3194_v11 = vpack.c.bf16 %v3164_v61, %v3163_v12  ;;  %v2839_v40 = vld [vmem:[#allocation2 + $0x85] sm:$0xff] }
 0x344   : > { %v2869_v7 = vpack.c.bf16 %v2840_v28, %v2839_v40 }
 0x345   : > { %7254 = vst [vmem:[#allocation16_spill] sm:$0xff] %v6226_v32  ;;  %v6244_v32 = vld [vmem:[%s7193_s3 + $0x98] sm:$0xff] }
 0x346   : > { %5156 = vmatmul.msk.f32.gmra.mxu3 %vm272_vm0, %v6224_v57  ;;  %4124 = vmatpush.msrb.mxu2 %v6244_v32 }
 0x348   : > { %v2049_v45 = vpop.f32.mrf.mxu2 }
 0x349   : > { %v2132_v20 = vadd.f32 %v2049_v45, %v1806_v14  ;;  %v2375_v8 = vpop.f32.mrf.mxu3  ;;  %v6250_v14 = vpop.f32.mrf.mxu0 }
 0x34a   : > { %v1731_v9 = vpop.f32.mrf.mxu1 }
 0x34b   : > { %v6239_v6 = vadd.f32 %v2375_v8, %v2132_v20  ;;  %v1809_v4 = vadd.f32 %v1731_v9, %v7256_v52  ;;  %v6253_v8 = vld [vmem:[%s5550_s7 + $0x6b] sm:$0xff]  ;;  %v2842_v52 = vld [vmem:[#allocation2 + $0x9d] sm:$0xff] }
 0x34c   : > { %v3166_v9 = vld [vmem:[#allocation2 + $0x8e] sm:$0xff] }
 0x34d   : > { %7255 = vst [vmem:[#allocation17_spill] sm:$0xff] %v6239_v6  ;;  %3305 = vmatmul.bf16.gmra.mxu2 %v3194_v11  ;;  %2984 = vmatmul.bf16.gmra.mxu1 %v2869_v7 }
 0x34e   : > { %5157 = vmatmul.msk.f32.gmra.mxu3 %vm272_vm0, %v6237_v37 }
 0x350   : > { %v2052_v45 = vpop.f32.mrf.mxu2 }
 0x351   : > { %v2133_v61 = vadd.f32 %v2052_v45, %v1807_v53  ;;  %v2378_v20 = vpop.f32.mrf.mxu3  ;;  %v6260_v41 = vpop.f32.mrf.mxu0  ;;  %v6263_v53 = vld [vmem:[%s5550_s7 + $0x73] sm:$0xff] }
 0x352   : > { %v1733_v6 = vpop.f32.mrf.mxu1 }
 0x353   : > { %v6255_v12 = vadd.f32 %v2378_v20, %v2133_v61  ;;  %v1810_v28 = vadd.f32 %v1733_v6, %v5950_v38  ;;  %v3195_v61 = vpack.c.bf16 %v3166_v9, %v3165_v21  ;;  %v6270_v38 = vld [vmem:[%s7193_s3 + $0x88] sm:$0xff]  ;;  %v6277_v9 = vld [vmem:[%s5550_s7 + $0x7b] sm:$0xff] }
 0x354   : > { %4125 = vmatpush.msrb.mxu2 %v6270_v38 }
 0x355   : > { %7257 = vst [vmem:[#allocation18_spill] sm:$0xff] %v6255_v12  ;;  %v2841_v12 = vld [vmem:[#allocation2 + $0x95] sm:$0xff] }
 0x356   : > { %5158 = vmatmul.msk.f32.gmra.mxu3 %vm272_vm0, %v6253_v8  ;;  %v2870_v6 = vpack.c.bf16 %v2842_v52, %v2841_v12  ;;  %v3581_v12 = vld [vmem:[%s7193_s3 + $0xf0] sm:$0xff]  ;;  %v3168_v52 = vld [vmem:[#allocation2 + $0x9e] sm:$0xff] }
 0x357   : > { %5305 = vmatpush.msrb.mxu3 %v3581_v12  ;;  %3993 = vmatpush.msrb.mxu1 %v3581_v12 }
 0x358   : > { %v2054_v11 = vpop.f32.mrf.mxu2 }
 0x359   : > { %v2134_v40 = vadd.f32 %v2054_v11, %v1808_v54  ;;  %v2380_v7 = vpop.f32.mrf.mxu3  ;;  %v6281_v42 = vpop.f32.mrf.mxu0 }
 0x35a   : > { %v1736_v20 = vpop.f32.mrf.mxu1 }
 0x35b   : > { %v6265_v45 = vadd.f32 %v2380_v7, %v2134_v40  ;;  %v1811_v54 = vadd.f32 %v1736_v20, %v5960_v59 }
 0x35d   : > { %7258 = vst [vmem:[#allocation19_spill] sm:$0xff] %v6265_v45  ;;  %3310 = vmatmul.bf16.gmra.mxu2 %v3195_v61  ;;  %2989 = vmatmul.bf16.gmra.mxu1 %v2870_v6  ;;  %v2844_v6 = vld [vmem:[#allocation2 + $0xad] sm:$0xff] }
 0x35e   : > { %5159 = vmatmul.msk.f32.gmra.mxu3 %vm272_vm0, %v6263_v53 }
 0x360   : > { %v2057_v11 = vpop.f32.mrf.mxu2 }
 0x361   : > { %v2135_v40 = vadd.f32 %v2057_v11, %v1809_v4  ;;  %v2383_v21 = vpop.f32.mrf.mxu3  ;;  %v3167_v11 = vld [vmem:[#allocation2 + $0x96] sm:$0xff] }
 0x362   : > { %v1738_v45 = vpop.f32.mrf.mxu1 }
 0x363   : > { %v6279_v7 = vadd.f32 %v2383_v21, %v2135_v40  ;;  %v1812_v59 = vadd.f32 %v1738_v45, %v5967_v26  ;;  %v6290_v40 = vld [vmem:[%s5550_s7 + $0x83] sm:$0xff]  ;;  %v3196_v26 = vpack.c.bf16 %v3168_v52, %v3167_v11  ;;  %v6308_v52 = vpop.f32.mrf.mxu0 }
 0x364   : > { %7261 = vst [vmem:[#allocation22_spill] sm:$0xff] %v6308_v52 }
 0x365   : > { %7259 = vst [vmem:[#allocation20_spill] sm:$0xff] %v6279_v7  ;;  %v2843_v7 = vld [vmem:[#allocation2 + $0xa5] sm:$0xff] }
 0x366   : > { %5160 = vmatmul.msk.f32.gmra.mxu3 %vm272_vm0, %v6277_v9  ;;  %v2871_v47 = vpack.c.bf16 %v2844_v6, %v2843_v7 }
 0x368   : > { %v2059_v4 = vpop.f32.mrf.mxu2 }
 0x369   : > { %v2136_v61 = vadd.f32 %v2059_v4, %v1810_v28  ;;  %v2385_v20 = vpop.f32.mrf.mxu3  ;;  %v6303_v28 = vld [vmem:[%s7193_s3 + $0x78] sm:$0xff]  ;;  %v3624_v4 = vld [vmem:[%s7194_s4 + $0x28] sm:$0xff] }
 0x36a   : > { %v2955_v45 = vpop.f32.mrf.mxu1  ;;  %4126 = vmatpush.msrb.mxu2 %v6303_v28  ;;  %3881 = vmatpush.msrb.mxu0 %v3624_v4 }
 0x36b   : > { %v6292_v21 = vadd.f32 %v2385_v20, %v2136_v61  ;;  %v3081_v12 = vadd.f32 %v2955_v45, %v5976_v10  ;;  %v6312_v61 = vld [vmem:[%s5550_s7 + $0x8b] sm:$0xff]  ;;  %v3622_v20 = vld [vmem:[%s7194_s4 + $0x18] sm:$0xff]  ;;  %v6330_v45 = vpop.f32.mrf.mxu0 }
 0x36c   : > { %3882 = vmatpush.msrb.mxu0 %v3622_v20  ;;  %v3169_v20 = vld [vmem:[#allocation2 + $0xa6] sm:$0xff] }
 0x36d   : > { %7260 = vst [vmem:[#allocation21_spill] sm:$0xff] %v6292_v21  ;;  %3315 = vmatmul.bf16.gmra.mxu2 %v3196_v26  ;;  %2994 = vmatmul.bf16.gmra.mxu1 %v2871_v47  ;;  %v3620_v47 = vld [vmem:[%s7194_s4 + $0x8] sm:$0xff] }
 0x36e   : > { %5161 = vmatmul.msk.f32.gmra.mxu3 %vm272_vm0, %v6290_v40  ;;  %3883 = vmatpush.msrb.mxu0 %v3620_v47 }
 0x36f   : > { %5183 = vmatmul.msk.f32.vlgmr.msrb.gmra.mxu0 %vm272_vm0, %v6118_v27 }
 0x370   : > { %v2062_v10 = vpop.f32.mrf.mxu2 }
 0x371   : > { %v2137_v56 = vadd.f32 %v2062_v10, %v1811_v54  ;;  %v2388_v7 = vpop.f32.mrf.mxu3  ;;  %v3579_v54 = vld [vmem:[%s7193_s3 + $0xe0] sm:$0xff]  ;;  %v3170_v10 = vld [vmem:[#allocation2 + $0xae] sm:$0xff] }
 0x372   : > { %v2957_v11 = vpop.f32.mrf.mxu1  ;;  %5306 = vmatpush.msrb.mxu3 %v3579_v54  ;;  %3994 = vmatpush.msrb.mxu1 %v3579_v54 }
 0x373   : > { %v6317_v6 = vadd.f32 %v2388_v7, %v2137_v56  ;;  %v3082_v26 = vadd.f32 %v2957_v11, %v5987_v63  ;;  %v2846_v63 = vld [vmem:[#allocation2 + $0xbd] sm:$0xff]  ;;  %v6333_v11 = vld [vmem:[%s5550_s7 + $0x93] sm:$0xff] }
 0x374   : > { %v2872_v52 = vpack.c.bf16 %v2846_v63, %v2845_v0  ;;  %v6352_v0 = vpop.f32.mrf.mxu0  ;;  %v3171_v63 = vld [vmem:[#allocation2 + $0xb6] sm:$0xff] }
 0x375   : > { %7262 = vst [vmem:[#allocation23_spill] sm:$0xff] %v6317_v6  ;;  %v3197_v6 = vpack.c.bf16 %v3170_v10, %v3169_v20  ;;  %v6367_v20 = vld [vmem:[%s5550_s7 + $0xa3] sm:$0xff] }
 0x376   : > { %5162 = vmatmul.msk.f32.gmra.mxu3 %vm272_vm0, %v6312_v61  ;;  %7265 = vst [vmem:[#allocation26_spill] sm:$0xff] %v6352_v0 }
 0x377   : > { %5184 = vmatmul.msk.f32.gmra.mxu0 %vm272_vm0, %v6129_v46 }
 0x378   : > { %v2064_v4 = vpop.f32.mrf.mxu2 }
 0x379   : > { %v2138_v56 = vadd.f32 %v2064_v4, %v1812_v59  ;;  %v2390_v7 = vpop.f32.mrf.mxu3  ;;  %v6343_v59 = vld [vmem:[%s7193_s3 + $0x68] sm:$0xff] }
 0x37a   : > { %v2960_v21 = vpop.f32.mrf.mxu1  ;;  %4127 = vmatpush.msrb.mxu2 %v6343_v59 }
 0x37b   : > { %v6335_v47 = vadd.f32 %v2390_v7, %v2138_v56  ;;  %v3083_v27 = vadd.f32 %v2960_v21, %v5995_v29  ;;  %v6355_v21 = vld [vmem:[%s5550_s7 + $0x9b] sm:$0xff]  ;;  %v2848_v7 = vld [vmem:[#allocation2 + $0xcd] sm:$0xff] }
 0x37d   : > { %7263 = vst [vmem:[#allocation24_spill] sm:$0xff] %v6335_v47  ;;  %3320 = vmatmul.bf16.gmra.mxu2 %v3197_v6  ;;  %2999 = vmatmul.bf16.gmra.mxu1 %v2872_v52  ;;  %v3172_v52 = vld [vmem:[#allocation2 + $0xbe] sm:$0xff] }
 0x37e   : > { %5163 = vmatmul.msk.f32.gmra.mxu3 %vm272_vm0, %v6333_v11 }
 0x37f   : > { %5185 = vmatmul.msk.f32.gmra.mxu0 %vm272_vm0, %v6143_v34 }
 0x380   : > { %v3281_v54 = vpop.f32.mrf.mxu2 }
 0x381   : > { %v6348_v4 = vadd.f32 %v3281_v54, %v3081_v12  ;;  %v6350_v29 = vpop.f32.mrf.mxu3  ;;  %v3198_v54 = vpack.c.bf16 %v3172_v52, %v3171_v63 }
 0x382   : > { %7264 = vst [vmem:[#allocation25_spill] sm:$0xff] %v6350_v29  ;;  %v2962_v6 = vpop.f32.mrf.mxu1  ;;  %v6372_v29 = vpop.f32.mrf.mxu0 }
 0x383   : > { %v3084_v10 = vadd.f32 %v2962_v6, %v6000_v55  ;;  %v2847_v55 = vld [vmem:[#allocation2 + $0xc5] sm:$0xff]  ;;  %v3577_v6 = vld [vmem:[%s7193_s3 + $0xd0] sm:$0xff]  ;;  %7267 = vst [vmem:[#allocation28_spill] sm:$0xff] %v6372_v29 }
 0x384   : > { %5307 = vmatpush.msrb.mxu3 %v3577_v6  ;;  %3995 = vmatpush.msrb.mxu1 %v3577_v6  ;;  %v2849_v29 = vld [vmem:[#allocation2 + $0xd5] sm:$0xff] }
 0x386   : > { %5164 = vmatmul.msk.f32.gmra.mxu3 %vm272_vm0, %v6355_v21 }
 0x387   : > { %5186 = vmatmul.msk.f32.gmra.mxu0 %vm272_vm0, %v6151_v24 }
 0x388   : > { %v3283_v46 = vpop.f32.mrf.mxu2 }
 0x389   : > { %v6362_v56 = vadd.f32 %v3283_v46, %v3082_v26  ;;  %v6364_v12 = vpop.f32.mrf.mxu3  ;;  %v2873_v26 = vpack.c.bf16 %v2848_v7, %v2847_v55 }
 0x38a   : > { %7266 = vst [vmem:[#allocation27_spill] sm:$0xff] %v6364_v12  ;;  %v2965_v47 = vpop.f32.mrf.mxu1  ;;  %v6384_v12 = vld [vmem:[%s5550_s7 + $0xab] sm:$0xff]  ;;  %v6395_v24 = vpop.f32.mrf.mxu0 }
 0x38b   : > { %v3085_v34 = vadd.f32 %v2965_v47, %v6005_v19  ;;  %v6389_v47 = vld [vmem:[%s7193_s3 + $0x58] sm:$0xff]  ;;  %7269 = vst [vmem:[#allocation30_spill] sm:$0xff] %v6395_v24  ;;  %v3575_v24 = vld [vmem:[%s7193_s3 + $0xc0] sm:$0xff] }
 0x38c   : > { %4128 = vmatpush.msrb.mxu2 %v6389_v47  ;;  %5308 = vmatpush.msrb.mxu3 %v3575_v24 }
 0x38d   : > { %3325 = vmatmul.bf16.gmra.mxu2 %v3198_v54  ;;  %3004 = vmatmul.bf16.gmra.mxu1 %v2873_v26  ;;  %v3174_v54 = vld [vmem:[#allocation2 + $0xce] sm:$0xff]  ;;  %v2850_v26 = vld [vmem:[#allocation2 + $0xdd] sm:$0xff] }
 0x38e   : > { %5165 = vmatmul.msk.f32.gmra.mxu3 %vm272_vm0, %v6367_v20  ;;  %v2874_v0 = vpack.c.bf16 %v2850_v26, %v2849_v29  ;;  %3996 = vmatpush.msrb.mxu1 %v3575_v24  ;;  %v6426_v24 = vld [vmem:[%s7193_s3 + $0x48] sm:$0xff] }
 0x38f   : > { %5187 = vmatmul.msk.f32.gmra.mxu0 %vm272_vm0, %v6165_v39  ;;  %4129 = vmatpush.msrb.mxu2 %v6426_v24 }
 0x390   : > { %v3286_v46 = vpop.f32.mrf.mxu2 }
 0x391   : > { %v6379_v52 = vadd.f32 %v3286_v46, %v3083_v27  ;;  %v6381_v63 = vpop.f32.mrf.mxu3  ;;  %v3173_v46 = vld [vmem:[#allocation2 + $0xc6] sm:$0xff] }
 0x392   : > { %7268 = vst [vmem:[#allocation29_spill] sm:$0xff] %v6381_v63  ;;  %v2967_v19 = vpop.f32.mrf.mxu1  ;;  %v6404_v63 = vld [vmem:[%s5550_s7 + $0xb3] sm:$0xff] }
 0x393   : > { %v3086_v7 = vadd.f32 %v2967_v19, %v6016_v48  ;;  %v3199_v48 = vpack.c.bf16 %v3174_v54, %v3173_v46 }
 0x396   : > { %5166 = vmatmul.msk.f32.gmra.mxu3 %vm272_vm0, %v6384_v12 }
 0x397   : > { %5188 = vmatmul.msk.f32.gmra.mxu0 %vm272_vm0, %v6173_v62 }
 0x398   : > { %v3288_v27 = vpop.f32.mrf.mxu2 }
 0x399   : > { %v6399_v55 = vadd.f32 %v3288_v27, %v3084_v10  ;;  %v6401_v6 = vpop.f32.mrf.mxu3  ;;  %v6414_v10 = vpop.f32.mrf.mxu0 }
 0x39a   : > { %7271 = vst [vmem:[#allocation32_spill] sm:$0xff] %v6401_v6  ;;  %v2970_v19 = vpop.f32.mrf.mxu1  ;;  %v6441_v6 = vld [vmem:[%s5550_s7 + $0xc3] sm:$0xff] }
 0x39b   : > { %7270 = vst [vmem:[#allocation31_spill] sm:$0xff] %v6399_v55  ;;  %v3087_v39 = vadd.f32 %v2970_v19, %v6024_v23  ;;  %v6421_v23 = vld [vmem:[%s5550_s7 + $0xbb] sm:$0xff]  ;;  %v2852_v19 = vld [vmem:[#allocation2 + $0xed] sm:$0xff] }
 0x39c   : > { %7272 = vst [vmem:[#allocation33_spill] sm:$0xff] %v6414_v10  ;;  %v2851_v10 = vld [vmem:[#allocation2 + $0xe5] sm:$0xff] }
 0x39d   : > { %3330 = vmatmul.bf16.gmra.mxu2 %v3199_v48  ;;  %3009 = vmatmul.bf16.gmra.mxu1 %v2874_v0  ;;  %v2875_v55 = vpack.c.bf16 %v2852_v19, %v2851_v10  ;;  %v6456_v10 = vld [vmem:[%s5550_s7 + $0xcb] sm:$0xff] }
 0x39e   : > { %5167 = vmatmul.msk.f32.gmra.mxu3 %vm272_vm0, %v6404_v63 }
 0x39f   : > { %5189 = vmatmul.msk.f32.gmra.mxu0 %vm272_vm0, %v6190_v3  ;;  %v3573_v3 = vld [vmem:[%s7193_s3 + $0xb0] sm:$0xff] }
 0x3a0   : > { %v3291_v27 = vpop.f32.mrf.mxu2  ;;  %5309 = vmatpush.msrb.mxu3 %v3573_v3  ;;  %3997 = vmatpush.msrb.mxu1 %v3573_v3  ;;  %v3177_v3 = vld [vmem:[#allocation2 + $0xe6] sm:$0xff] }
 0x3a1   : > { %v6416_v54 = vadd.f32 %v3291_v27, %v3085_v34  ;;  %v6418_v46 = vpop.f32.mrf.mxu3  ;;  %v3176_v34 = vld [vmem:[#allocation2 + $0xde] sm:$0xff]  ;;  %v6438_v27 = vpop.f32.mrf.mxu0 }
 0x3a2   : > { %7274 = vst [vmem:[#allocation35_spill] sm:$0xff] %v6418_v46  ;;  %v2972_v29 = vpop.f32.mrf.mxu1  ;;  %v3175_v46 = vld [vmem:[#allocation2 + $0xd6] sm:$0xff] }
 0x3a3   : > { %7273 = vst [vmem:[#allocation34_spill] sm:$0xff] %v6416_v54  ;;  %v3088_v0 = vadd.f32 %v2972_v29, %v6029_v33  ;;  %v3200_v33 = vpack.c.bf16 %v3176_v34, %v3175_v46 }
 0x3a4   : > { %7276 = vst [vmem:[#allocation37_spill] sm:$0xff] %v6438_v27 }
 0x3a6   : > { %5168 = vmatmul.msk.f32.gmra.mxu3 %vm272_vm0, %v6421_v23 }
 0x3a7   : > { %5190 = vmatmul.msk.f32.gmra.mxu0 %vm272_vm0, %v6200_v35  ;;  %v6466_v35 = vld [vmem:[%s7193_s3 + $0x38] sm:$0xff] }
 0x3a8   : > { %v3293_v62 = vpop.f32.mrf.mxu2  ;;  %4130 = vmatpush.msrb.mxu2 %v6466_v35 }
 0x3a9   : > { %v6434_v26 = vadd.f32 %v3293_v62, %v3086_v7  ;;  %v6436_v48 = vpop.f32.mrf.mxu3  ;;  %v6458_v34 = vpop.f32.mrf.mxu0 }
 0x3aa   : > { %7275 = vst [vmem:[#allocation36_spill] sm:$0xff] %v6436_v48  ;;  %v2975_v29 = vpop.f32.mrf.mxu1  ;;  %v2853_v48 = vld [vmem:[#allocation2 + $0xf5] sm:$0xff] }
 0x3ab   : > { %v3089_v54 = vadd.f32 %v2975_v29, %v6034_v13  ;;  %7278 = vst [vmem:[#allocation39_spill] sm:$0xff] %v6458_v34 }
 0x3ad   : > { %3335 = vmatmul.bf16.gmra.mxu2 %v3200_v33  ;;  %3014 = vmatmul.bf16.gmra.mxu1 %v2875_v55 }
 0x3ae   : > { %5169 = vmatmul.msk.f32.gmra.mxu3 %vm272_vm0, %v6441_v6 }
 0x3af   : > { %5191 = vmatmul.msk.f32.gmra.mxu0 %vm272_vm0, %v6214_v51  ;;  %v3571_v51 = vld [vmem:[%s7193_s3 + $0xa0] sm:$0xff] }
 0x3b0   : > { %v3296_v7 = vpop.f32.mrf.mxu2  ;;  %5310 = vmatpush.msrb.mxu3 %v3571_v51  ;;  %3998 = vmatpush.msrb.mxu1 %v3571_v51  ;;  %v2856_v51 = vld [vmem:[#allocation2 + $0x10d] sm:$0xff] }
 0x3b1   : > { %v6451_v46 = vadd.f32 %v3296_v7, %v3087_v39  ;;  %v6453_v13 = vpop.f32.mrf.mxu3  ;;  %v3178_v39 = vld [vmem:[#allocation2 + $0xee] sm:$0xff] }
 0x3b2   : > { %7277 = vst [vmem:[#allocation38_spill] sm:$0xff] %v6453_v13  ;;  %v2977_v62 = vpop.f32.mrf.mxu1  ;;  %v6476_v7 = vld [vmem:[%s5550_s7 + $0xd3] sm:$0xff] }
 0x3b3   : > { %v3090_v19 = vadd.f32 %v2977_v62, %v6039_v5  ;;  %v2854_v5 = vld [vmem:[#allocation2 + $0xfd] sm:$0xff]  ;;  %v3201_v62 = vpack.c.bf16 %v3178_v39, %v3177_v3 }
 0x3b4   : > { %v2876_v27 = vpack.c.bf16 %v2854_v5, %v2853_v48  ;;  %v6493_v48 = vld [vmem:[%s5550_s7 + $0xdb] sm:$0xff] }
 0x3b5   : > { %v3180_v3 = vld [vmem:[#allocation2 + $0xfe] sm:$0xff] }
 0x3b6   : > { %5170 = vmatmul.msk.f32.gmra.mxu3 %vm272_vm0, %v6456_v10 }
 0x3b7   : > { %5192 = vmatmul.msk.f32.gmra.mxu0 %vm272_vm0, %v6224_v57  ;;  %v6501_v57 = vld [vmem:[%s7193_s3 + $0x28] sm:$0xff] }
 0x3b8   : > { %v3298_v55 = vpop.f32.mrf.mxu2  ;;  %4131 = vmatpush.msrb.mxu2 %v6501_v57 }
 0x3b9   : > { %v6471_v33 = vadd.f32 %v3298_v55, %v3088_v0  ;;  %v6473_v29 = vpop.f32.mrf.mxu3  ;;  %v6484_v0 = vpop.f32.mrf.mxu0 }
 0x3ba   : > { %7279 = vst [vmem:[#allocation40_spill] sm:$0xff] %v6473_v29  ;;  %v2980_v13 = vpop.f32.mrf.mxu1 }
 0x3bb   : > { %v3091_v34 = vadd.f32 %v2980_v13, %v6050_v17  ;;  %7280 = vst [vmem:[#allocation41_spill] sm:$0xff] %v6484_v0  ;;  %v2855_v0 = vld [vmem:[#allocation2 + $0x105] sm:$0xff] }
 0x3bd   : > { %3340 = vmatmul.bf16.gmra.mxu2 %v3201_v62  ;;  %3019 = vmatmul.bf16.gmra.mxu1 %v2876_v27 }
 0x3be   : > { %5171 = vmatmul.msk.f32.gmra.mxu3 %vm272_vm0, %v6476_v7 }
 0x3bf   : > { %5193 = vmatmul.msk.f32.gmra.mxu0 %vm272_vm0, %v6237_v37 }
 0x3c0   : > { %v3301_v55 = vpop.f32.mrf.mxu2 }
 0x3c1   : > { %v6488_v39 = vadd.f32 %v3301_v55, %v3089_v54  ;;  %v6490_v17 = vpop.f32.mrf.mxu3  ;;  %v6506_v54 = vpop.f32.mrf.mxu0  ;;  %v3179_v55 = vld [vmem:[#allocation2 + $0xf6] sm:$0xff] }
 0x3c2   : > { %7282 = vst [vmem:[#allocation43_spill] sm:$0xff] %v6490_v17  ;;  %v2982_v13 = vpop.f32.mrf.mxu1  ;;  %v3202_v17 = vpack.c.bf16 %v3180_v3, %v3179_v55  ;;  %v6526_v3 = vld [vmem:[%s5550_s7 + $0xeb] sm:$0xff] }
 0x3c3   : > { %7281 = vst [vmem:[#allocation42_spill] sm:$0xff] %v6488_v39  ;;  %v3092_v5 = vadd.f32 %v2982_v13, %v6061_v18  ;;  %v6513_v13 = vld [vmem:[%s5550_s7 + $0xe3] sm:$0xff]  ;;  %v2877_v39 = vpack.c.bf16 %v2856_v51, %v2855_v0  ;;  %v3569_v0 = vld [vmem:[%s7193_s3 + $0x90] sm:$0xff] }
 0x3c4   : > { %7283 = vst [vmem:[#allocation44_spill] sm:$0xff] %v6506_v54  ;;  %5311 = vmatpush.msrb.mxu3 %v3569_v0  ;;  %3999 = vmatpush.msrb.mxu1 %v3569_v0  ;;  %v2858_v51 = vld [vmem:[#allocation2 + $0x11d] sm:$0xff]  ;;  %v2857_v0 = vld [vmem:[#allocation2 + $0x115] sm:$0xff] }
 0x3c5   : > { %v6547_v54 = vld [vmem:[%s7193_s3 + $0x18] sm:$0xff] }
 0x3c6   : > { %5172 = vmatmul.msk.f32.gmra.mxu3 %vm272_vm0, %v6493_v48  ;;  %4132 = vmatpush.msrb.mxu2 %v6547_v54 }
 0x3c7   : > { %5194 = vmatmul.msk.f32.gmra.mxu0 %vm272_vm0, %v6253_v8 }
 0x3c8   : > { %v3303_v27 = vpop.f32.mrf.mxu2 }
 0x3c9   : > { %v6508_v62 = vadd.f32 %v3303_v27, %v3090_v19  ;;  %v6510_v18 = vpop.f32.mrf.mxu3 }
 0x3ca   : > { %7285 = vst [vmem:[#allocation46_spill] sm:$0xff] %v6510_v18  ;;  %v2985_v29 = vpop.f32.mrf.mxu1  ;;  %v6523_v18 = vpop.f32.mrf.mxu0 }
 0x3cb   : > { %7284 = vst [vmem:[#allocation45_spill] sm:$0xff] %v6508_v62  ;;  %v2878_v62 = vpack.c.bf16 %v2858_v51, %v2857_v0  ;;  %v2768_v0 = vadd.f32 %v6218_v30, %v6075_v58  ;;  %v3557_v58 = vld [vmem:[%s7193_s3 + $0x30] sm:$0xff] }
 0x3cc   : > { %7288 = vst [vmem:[#allocation49_spill] sm:$0xff] %v6523_v18 }
 0x3cd   : > { %3345 = vmatmul.bf16.gmra.mxu2 %v3202_v17  ;;  %3024 = vmatmul.bf16.gmra.mxu1 %v2877_v39 }
 0x3ce   : > { %5173 = vmatmul.msk.f32.gmra.mxu3 %vm272_vm0, %v6513_v13 }
 0x3cf   : > { %5195 = vmatmul.msk.f32.gmra.mxu0 %vm272_vm0, %v6263_v53 }
 0x3d0   : > { %v3306_v37 = vpop.f32.mrf.mxu2 }
 0x3d1   : > { %v6519_v19 = vadd.f32 %v3306_v37, %v3091_v34  ;;  %v6521_v27 = vpop.f32.mrf.mxu3  ;;  %v3182_v34 = vld [vmem:[#allocation2 + $0x10e] sm:$0xff]  ;;  %v3181_v37 = vld [vmem:[#allocation2 + $0x106] sm:$0xff] }
 0x3d2   : > { %7287 = vst [vmem:[#allocation48_spill] sm:$0xff] %v6521_v27  ;;  %v2987_v55 = vpop.f32.mrf.mxu1  ;;  %v6540_v27 = vld [vmem:[%s5550_s7 + $0xf3] sm:$0xff]  ;;  %v3203_v18 = vpack.c.bf16 %v3182_v34, %v3181_v37  ;;  %v6549_v53 = vpop.f32.mrf.mxu0 }
 0x3d3   : > { %7286 = vst [vmem:[#allocation47_spill] sm:$0xff] %v6519_v19  ;;  %v3561_v37 = vld [vmem:[%s7193_s3 + $0x50] sm:$0xff] }
 0x3d6   : > { %5174 = vmatmul.msk.f32.gmra.mxu3 %vm272_vm0, %v6526_v3 }
 0x3d7   : > { %5196 = vmatmul.msk.f32.gmra.mxu0 %vm272_vm0, %v6277_v9  ;;  %v3563_v9 = vld [vmem:[%s7193_s3 + $0x60] sm:$0xff] }
 0x3d8   : > { %v3308_v8 = vpop.f32.mrf.mxu2 }
 0x3d9   : > { %v6535_v39 = vadd.f32 %v3308_v8, %v3092_v5  ;;  %v6537_v17 = vpop.f32.mrf.mxu3  ;;  %v2767_v5 = vadd.f32 %v6197_v16, %v6067_v49  ;;  %v3567_v8 = vld [vmem:[%s7193_s3 + $0x80] sm:$0xff]  ;;  %v3565_v49 = vld [vmem:[%s7193_s3 + $0x70] sm:$0xff] }
 0x3da   : > { %7289 = vst [vmem:[#allocation50_spill] sm:$0xff] %v6537_v17  ;;  %v6542_v19 = vpop.f32.mrf.mxu1  ;;  %5312 = vmatpush.msrb.mxu3 %v3567_v8  ;;  %4000 = vmatpush.msrb.mxu1 %v3567_v8  ;;  %v3559_v8 = vld [vmem:[%s7193_s3 + $0x40] sm:$0xff] }
 0x3db   : > { %v3093_v34 = vadd.f32 %v2985_v29, %v2767_v5  ;;  %v6581_v5 = vpop.f32.mrf.mxu0  ;;  %v6596_v17 = vld [vmem:[%s5550_s7 + $0x103] sm:$0xff] }
 0x3dc   : > { %4001 = vmatpush.msrb.mxu1 %v3565_v49  ;;  %5313 = vmatpush.msrb.mxu3 %v3565_v49  ;;  %7291 = vst [vmem:[#allocation52_spill] sm:$0xff] %v6581_v5  ;;  %v3184_v49 = vld [vmem:[#allocation2 + $0x11e] sm:$0xff] }
 0x3dd   : > { %3350 = vmatmul.bf16.gmra.mxu2 %v3203_v18  ;;  %3029 = vmatmul.bf16.gmra.mxu1 %v2878_v62  ;;  %v6569_v62 = vld [vmem:[%s5550_s7 + $0xfb] sm:$0xff]  ;;  %v2859_v5 = vld [vmem:[#allocation2 + $0x125] sm:$0xff] }
 0x3de   : > { %5175 = vmatmul.msk.f32.gmra.mxu3 %vm272_vm0, %v6540_v27  ;;  %4002 = vmatpush.msrb.mxu1 %v3563_v9 }
 0x3df   : > { %5314 = vmatpush.msrb.mxu3 %v3563_v9  ;;  %5197 = vmatmul.msk.f32.gmra.mxu0 %vm272_vm0, %v6290_v40  ;;  %v3183_v40 = vld [vmem:[#allocation2 + $0x116] sm:$0xff] }
 0x3e0   : > { %v3311_v51 = vpop.f32.mrf.mxu2  ;;  %4003 = vmatpush.msrb.mxu1 %v3561_v37 }
 0x3e1   : > { %v6564_v16 = vadd.f32 %v3311_v51, %v3093_v34  ;;  %v6566_v18 = vpop.f32.mrf.mxu3  ;;  %5315 = vmatpush.msrb.mxu3 %v3561_v37  ;;  %v3094_v34 = vadd.f32 %v2987_v55, %v2768_v0  ;;  %v3555_v55 = vld [vmem:[%s7193_s3 + $0x20] sm:$0xff]  ;;  %v3204_v37 = vpack.c.bf16 %v3184_v49, %v3183_v40  ;;  %v2769_v49 = vadd.f32 %v6234_v22, %v6078_v44 }
 0x3e2   : > { %7290 = vst [vmem:[#allocation51_spill] sm:$0xff] %v6566_v18  ;;  %v2992_v29 = vpop.f32.mrf.mxu1  ;;  %4004 = vmatpush.msrb.mxu1 %v3559_v8  ;;  %v2860_v18 = vld [vmem:[#allocation2 + $0x12d] sm:$0xff] }
 0x3e3   : > { %5316 = vmatpush.msrb.mxu3 %v3559_v8  ;;  %v6604_v8 = vld [vmem:[%s7193_s3 + $0x8] sm:$0xff] }
 0x3e4   : > { %4005 = vmatpush.msrb.mxu1 %v3557_v58  ;;  %4133 = vmatpush.msrb.mxu2 %v6604_v8 }
 0x3e5   : > { %5317 = vmatpush.msrb.mxu3 %v3557_v58  ;;  %v6620_v58 = vpop.f32.mrf.mxu0 }
 0x3e6   : > { %5176 = vmatmul.msk.f32.gmra.mxu3 %vm272_vm0, %v6569_v62  ;;  %4006 = vmatpush.msrb.mxu1 %v3555_v55 }
 0x3e7   : > { %5318 = vmatpush.msrb.mxu3 %v3555_v55  ;;  %5198 = vmatmul.msk.f32.gmra.mxu0 %vm272_vm0, %v6312_v61  ;;  %v6627_v55 = vld [vmem:[%s5550_s7 + $0x10b] sm:$0xff]  ;;  %v5379_v61 = vld [vmem:[%s7193_s3 + $0xf8] sm:$0xff] }
 0x3e8   : > { %v3313_v51 = vpop.f32.mrf.mxu2 }
 0x3e9   : > { %v6591_v30 = vadd.f32 %v3313_v51, %v3094_v34  ;;  %v6593_v9 = vpop.f32.mrf.mxu3  ;;  %v2879_v34 = vpack.c.bf16 %v2860_v18, %v2859_v5  ;;  %v3553_v51 = vld [vmem:[%s7193_s3 + $0x10] sm:$0xff]  ;;  %v3551_v18 = vld [vmem:[%s7193_s3] sm:$0xff]  ;;  %v3095_v5 = vadd.f32 %v6542_v19, %v2769_v49  ;;  %v2770_v19 = vadd.f32 %v6250_v14, %v6087_v50 }
 0x3ea   : > { %v2995_v0 = vpop.f32.mrf.mxu1  ;;  %4007 = vmatpush.msrb.mxu1 %v3553_v51  ;;  %5319 = vmatpush.msrb.mxu3 %v3553_v51  ;;  %v3186_v49 = vld [vmem:[#allocation2 + $0x12e] sm:$0xff]  ;;  %v3185_v14 = vld [vmem:[#allocation2 + $0x126] sm:$0xff] }
 0x3ec   : > { %4008 = vmatpush.msrb.mxu1 %v3551_v18  ;;  %5320 = vmatpush.msrb.mxu3 %v3551_v18 }
 0x3ed   : > { %3355 = vmatmul.bf16.gmra.mxu2 %v3204_v37  ;;  %3034 = vmatmul.bf16.gmra.mxu1 %v2879_v34  ;;  %v3096_v34 = vadd.f32 %v2992_v29, %v2770_v19  ;;  %v6645_v50 = vpop.f32.mrf.mxu0 }
 0x3ee   : > { %5177 = vmatmul.msk.f32.gmra.mxu3 %vm272_vm0, %v6596_v17 }
 0x3ef   : > { %5321 = vmatpush.msra.mxu3 %v5379_v61  ;;  %5199 = vmatmul.msk.f32.gmra.mxu0 %vm272_vm0, %v6333_v11  ;;  %v6648_v61 = vld [vmem:[%s5550_s7 + $0x113] sm:$0xff] }
 0x3f0   : > { %v3316_v40 = vpop.f32.mrf.mxu2 }
 0x3f1   : > { %v6622_v44 = vadd.f32 %v3316_v40, %v3095_v5  ;;  %v6624_v22 = vpop.f32.mrf.mxu3  ;;  %5322 = vmatpush.msra.mxu3 %v6111_v1  ;;  %v2861_v1 = vld [vmem:[#allocation2 + $0x135] sm:$0xff]  ;;  %v2862_v40 = vld [vmem:[#allocation2 + $0x13d] sm:$0xff] }
 0x3f2   : > { %7292 = vst [vmem:[#allocation53_spill] sm:$0xff] %v6624_v22  ;;  %v2997_v37 = vpop.f32.mrf.mxu1  ;;  %v2880_v29 = vpack.c.bf16 %v2862_v40, %v2861_v1  ;;  %v6683_v40 = vld [vmem:[%s5550_s7 + $0x123] sm:$0xff]  ;;  %v3526_v22 = vmax.f32 %v6535_v39, 0.0 }
 0x3f3   : > { %5323 = vmatpush.msra.mxu3 %v6136_v36  ;;  %v3205_v36 = vpack.c.bf16 %v3186_v49, %v3185_v14  ;;  %v3188_v49 = vld [vmem:[#allocation2 + $0x13e] sm:$0xff] }
 0x3f5   : > { %5324 = vmatpush.msra.mxu3 %v6158_v43  ;;  %v2771_v43 = vadd.f32 %v6260_v41, %v6102_v60  ;;  %v6665_v60 = vld [vmem:[%s5550_s7 + $0x11b] sm:$0xff] }
 0x3f6   : > { %5178 = vmatmul.msk.f32.gmra.mxu3 %vm272_vm0, %v6627_v55 }
 0x3f7   : > { %5325 = vmatpush.msra.mxu3 %v6186_v25  ;;  %5200 = vmatmul.msk.f32.gmra.mxu0 %vm272_vm0, %v6355_v21  ;;  %v3097_v19 = vadd.f32 %v2995_v0, %v2771_v43  ;;  %v2772_v21 = vadd.f32 %v6281_v42, %v6105_v15  ;;  %v3187_v0 = vld [vmem:[#allocation2 + $0x136] sm:$0xff]  ;;  %v7298_v43 = vld [vmem:[#allocation7_spill] sm:$0xff] }
 0x3f8   : > { %v3318_v51 = vpop.f32.mrf.mxu2  ;;  %v3206_v15 = vpack.c.bf16 %v3188_v49, %v3187_v0 }
 0x3f9   : > { %v6641_v18 = vadd.f32 %v3318_v51, %v3096_v34  ;;  %v6643_v5 = vpop.f32.mrf.mxu3  ;;  %5326 = vmatpush.msra.mxu3 %v6210_v2  ;;  %v6668_v2 = vpop.f32.mrf.mxu0 }
 0x3fa   : > { %7293 = vst [vmem:[#allocation54_spill] sm:$0xff] %v6643_v5  ;;  %v3000_v11 = vpop.f32.mrf.mxu1 }
 0x3fb   : > { %5327 = vmatpush.msra.mxu3 %v6244_v32  ;;  %v3098_v32 = vadd.f32 %v2997_v37, %v2772_v21  ;;  %v7299_v21 = vld [vmem:[#allocation8_spill] sm:$0xff] }
 0x3fd   : > { %3360 = vmatmul.bf16.gmra.mxu2 %v3205_v36  ;;  %3039 = vmatmul.bf16.gmra.mxu1 %v2880_v29  ;;  %v3516_v29 = vmax.f32 %v6362_v56, 0.0 }
 0x3fe   : > { %5179 = vmatmul.msk.f32.gmra.mxu3 %vm272_vm0, %v6648_v61 }
 0x3ff   : > { %5328 = vmatpush.msra.mxu3 %v6270_v38  ;;  %5201 = vmatmul.msk.f32.gmra.mxu0 %vm272_vm0, %v6367_v20  ;;  %v3515_v20 = vmax.f32 %v6348_v4, 0.0 }
 0x400   : > { %v3321_v25 = vpop.f32.mrf.mxu2 }
 0x401   : > { %v6659_v34 = vadd.f32 %v3321_v25, %v3097_v19  ;;  %v6661_v51 = vpop.f32.mrf.mxu3  ;;  %5329 = vmatpush.msra.mxu3 %v6303_v28 }
 0x402   : > { %7294 = vst [vmem:[#allocation55_spill] sm:$0xff] %v6661_v51  ;;  %v3002_v41 = vpop.f32.mrf.mxu1  ;;  %v7319_v51 = vld [vmem:[#allocation47_spill] sm:$0xff] }
 0x403   : > { %5330 = vmatpush.msra.mxu3 %v6343_v59  ;;  %v7296_v59 = vld [vmem:[#allocation22_spill] sm:$0xff]  ;;  %v3525_v5 = vmax.f32 %v7319_v51, 0.0 }
 0x404   : > { %v2773_v37 = vadd.f32 %v7296_v59, %v6114_v31  ;;  %v6703_v31 = vld [vmem:[%s5550_s7 + $0x12b] sm:$0xff]  ;;  %s215_s7 = sand.u32 1, %s5434_s19  }
 0x405   : > { %5331 = vmatpush.msra.mxu3 %v6389_v47  ;;  %v6692_v47 = vpop.f32.mrf.mxu0  ;;  %s4688_s12 = sshll.u32 %s215_s7, 9  ;;  %s4607_s22 = scalar_lea.sflag [#allocation5], %s215_s7 }
 0x406   : > { %5180 = vmatmul.msk.f32.gmra.mxu3 %vm272_vm0, %v6665_v60  ;;  %s6923_s13 = scalar_lea.vmem [#allocation4], %s4688_s12 }
 0x407   : > { %5332 = vmatpush.msra.mxu3 %v6426_v24  ;;  %5202 = vmatmul.msk.f32.gmra.mxu0 %vm272_vm0, %v6384_v12  ;;  %v3099_v24 = vadd.f32 %v3000_v11, %v2773_v37  ;;  %v2774_v12 = vadd.f32 %v6330_v45, %v7298_v43  ;;  %v3517_v45 = vmax.f32 %v6379_v52, 0.0  ;;  %v7301_v37 = vld [vmem:[#allocation31_spill] sm:$0xff]  ;;  %v7303_v43 = vld [vmem:[#allocation28_spill] sm:$0xff]  ;;  %s4619_s23 = sshll.u32 %s6923_s13, 4  ;;  %s4620_s23 = int_to_ptr.vmem [resolvable:$true] %s4619_s23 }
 0x408   : > { %v3323_v38 = vpop.f32.mrf.mxu2 }
 0x409   : > { %v6678_v28 = vadd.f32 %v3323_v38, %v3098_v32  ;;  %v6680_v1 = vpop.f32.mrf.mxu3  ;;  %5333 = vmatpush.msra.mxu3 %v6466_v35  ;;  %v7300_v32 = vld [vmem:[#allocation26_spill] sm:$0xff] }
 0x40a   : > { %7295 = vst [vmem:[#allocation56_spill] sm:$0xff] %v6680_v1  ;;  %v3005_v42 = vpop.f32.mrf.mxu1  ;;  %v2775_v38 = vadd.f32 %v7300_v32, %v7299_v21  ;;  %v7317_v1 = vld [vmem:[#allocation15_spill] sm:$0xff] }
 0x40b   : > { %5334 = vmatpush.msra.mxu3 %v6501_v57  ;;  %v3100_v57 = vadd.f32 %v3002_v41, %v2774_v12 }
 0x40d   : > { %3365 = vmatmul.bf16.gmra.mxu2 %v3206_v15  ;;  %4009 = vmatmul.f32.vlgmr.msrb.gmra.mxu1 %v3515_v20  ;;  %v6713_v11 = vpop.f32.mrf.mxu0 }
 0x40e   : > { %5181 = vmatmul.msk.f32.gmra.mxu3 %vm272_vm0, %v6683_v40 }
 0x40f   : > { %5335 = vmatpush.msra.mxu3 %v6547_v54  ;;  %5203 = vmatmul.msk.f32.gmra.mxu0 %vm272_vm0, %v6404_v63  ;;  %v3101_v63 = vadd.f32 %v3005_v42, %v2775_v38  ;;  %v7304_v38 = vld [vmem:[#allocation34_spill] sm:$0xff] }
 0x410   : > { %v3326_v14 = vpop.f32.mrf.mxu2 }
 0x411   : > { %v6697_v4 = vadd.f32 %v3326_v14, %v3099_v24  ;;  %v6699_v35 = vpop.f32.mrf.mxu3  ;;  %5336 = vmatpush.msra.mxu3 %v6604_v8  ;;  %v3518_v24 = vmax.f32 %v7301_v37, 0.0  ;;  %v7302_v14 = vld [vmem:[#allocation9_spill] sm:$0xff]  ;;  %v7306_v37 = vld [vmem:[#allocation30_spill] sm:$0xff] }
 0x412   : > { %7297 = vst [vmem:[#allocation22_spill] sm:$0xff] %v6699_v35  ;;  %v3007_v36 = vpop.f32.mrf.mxu1 }
 0x415   : > { %4012 = vmatmul.f32.gmra.mxu1 %v3516_v29  ;;  %v6727_v41 = vpop.f32.mrf.mxu0 }
 0x416   : > { %5182 = vmatmul.msk.f32.gmra.mxu3 %vm272_vm0, %v6703_v31 }
 0x417   : > { %5204 = vmatmul.msk.f32.gmra.mxu0 %vm272_vm0, %v6421_v23 }
 0x418   : > { %v3328_v54 = vpop.f32.mrf.mxu2 }
 0x419   : > { %v6715_v19 = vadd.f32 %v3328_v54, %v3100_v57  ;;  %v6717_v25 = vpop.f32.mrf.mxu3 }
 0x41a   : > { %v3010_v8 = vpop.f32.mrf.mxu1 }
 0x41b   : > { %v7200_v56 = vmax.f32 %v6715_v19, 0.0 }
 0x41d   : > { %4134 = vmatmul.f32.vlgmr.msrb.gmra.mxu2 %v3515_v20  ;;  %4015 = vmatmul.f32.gmra.mxu1 %v3517_v45  ;;  %v2776_v20 = vadd.f32 %v7303_v43, %v7302_v14  ;;  %v6745_v54 = vpop.f32.mrf.mxu0 }
 0x41e   : > { %4066 = vmatmul.f32.vlgmr.msrb.gmra.mxu3 %v7200_v56  ;;  %v7314_v56 = vld [vmem:[#allocation14_spill] sm:$0xff] }
 0x41f   : > { %5205 = vmatmul.msk.f32.gmra.mxu0 %vm272_vm0, %v6441_v6  ;;  %v3102_v23 = vadd.f32 %v3007_v36, %v2776_v20 }
 0x420   : > { %v3331_v0 = vpop.f32.mrf.mxu2 }
 0x421   : > { %v6729_v49 = vadd.f32 %v3331_v0, %v3101_v63  ;;  %v6731_v15 = vpop.f32.mrf.mxu3  ;;  %v3519_v63 = vmax.f32 %v7304_v38, 0.0  ;;  %v7305_v0 = vld [vmem:[#allocation10_spill] sm:$0xff] }
 0x422   : > { %v3012_v59 = vpop.f32.mrf.mxu1 }
 0x423   : > { %v7197_v52 = vmax.f32 %v6729_v49, 0.0 }
 0x425   : > { %4137 = vmatmul.f32.gmra.mxu2 %v3516_v29  ;;  %4018 = vmatmul.f32.gmra.mxu1 %v3518_v24  ;;  %v2777_v29 = vadd.f32 %v7306_v37, %v7305_v0  ;;  %v6761_v38 = vpop.f32.mrf.mxu0  ;;  %v7307_v0 = vld [vmem:[#allocation11_spill] sm:$0xff]  ;;  %v7308_v37 = vld [vmem:[#allocation33_spill] sm:$0xff] }
 0x426   : > { %4069 = vmatmul.f32.gmra.mxu3 %v7197_v52 }
 0x427   : > { %5206 = vmatmul.msk.f32.gmra.mxu0 %vm272_vm0, %v6456_v10  ;;  %v3103_v6 = vadd.f32 %v3010_v8, %v2777_v29 }
 0x428   : > { %v3333_v42 = vpop.f32.mrf.mxu2 }
 0x429   : > { %v6741_v12 = vadd.f32 %v3333_v42, %v3102_v23  ;;  %v6743_v57 = vpop.f32.mrf.mxu3  ;;  %v3520_v42 = vmax.f32 %v6434_v26, 0.0 }
 0x42a   : > { %v3015_v32 = vpop.f32.mrf.mxu1 }
 0x42b   : > { %v7196_v21 = vmax.f32 %v6741_v12, 0.0 }
 0x42d   : > { %4140 = vmatmul.f32.gmra.mxu2 %v3517_v45  ;;  %4021 = vmatmul.f32.gmra.mxu1 %v3519_v63  ;;  %v2778_v45 = vadd.f32 %v7308_v37, %v7307_v0  ;;  %v7309_v0 = vld [vmem:[#allocation12_spill] sm:$0xff]  ;;  %v7310_v37 = vld [vmem:[#allocation37_spill] sm:$0xff] }
 0x42e   : > { %4072 = vmatmul.f32.gmra.mxu3 %v7196_v21  ;;  %v3521_v21 = vmax.f32 %v6451_v46, 0.0  ;;  %v2779_v52 = vadd.f32 %v7310_v37, %v7309_v0  ;;  %v3522_v0 = vmax.f32 %v6471_v33, 0.0  ;;  %v7311_v37 = vld [vmem:[#allocation13_spill] sm:$0xff] }
 0x42f   : > { %5207 = vmatmul.msk.f32.gmra.mxu0 %vm272_vm0, %v6476_v7  ;;  %v3104_v10 = vadd.f32 %v3012_v59, %v2778_v45 }
 0x430   : > { %v3336_v36 = vpop.f32.mrf.mxu2  ;;  %v3105_v7 = vadd.f32 %v3015_v32, %v2779_v52 }
 0x431   : > { %v6755_v14 = vadd.f32 %v3336_v36, %v3103_v6  ;;  %v6757_v43 = vpop.f32.mrf.mxu3 }
 0x432   : > { %v3017_v23 = vpop.f32.mrf.mxu1 }
 0x433   : > { %v7199_v20 = vmax.f32 %v6755_v14, 0.0 }
 0x435   : > { %4143 = vmatmul.f32.gmra.mxu2 %v3518_v24  ;;  %4024 = vmatmul.f32.gmra.mxu1 %v3520_v42  ;;  %v6779_v24 = vpop.f32.mrf.mxu0 }
 0x436   : > { %4075 = vmatmul.f32.gmra.mxu3 %v7199_v20 }
 0x437   : > { %5208 = vmatmul.msk.f32.gmra.mxu0 %vm272_vm0, %v6493_v48 }
 0x438   : > { %v3338_v8 = vpop.f32.mrf.mxu2 }
 0x439   : > { %v6769_v29 = vadd.f32 %v3338_v8, %v3104_v10  ;;  %v6771_v6 = vpop.f32.mrf.mxu3 }
 0x43a   : > { %v3020_v36 = vpop.f32.mrf.mxu1 }
 0x43b   : > { %v7198_v26 = vmax.f32 %v6769_v29, 0.0 }
 0x43d   : > { %4146 = vmatmul.f32.gmra.mxu2 %v3519_v63  ;;  %4027 = vmatmul.f32.gmra.mxu1 %v3521_v21  ;;  %v6795_v52 = vpop.f32.mrf.mxu0 }
 0x43e   : > { %4078 = vmatmul.f32.gmra.mxu3 %v7198_v26  ;;  %v7312_v26 = vld [vmem:[#allocation39_spill] sm:$0xff] }
 0x43f   : > { %v2780_v63 = vadd.f32 %v7312_v26, %v7311_v37  ;;  %5209 = vmatmul.msk.f32.gmra.mxu0 %vm272_vm0, %v6513_v13  ;;  %v7313_v26 = vld [vmem:[#allocation42_spill] sm:$0xff] }
 0x440   : > { %v3341_v59 = vpop.f32.mrf.mxu2  ;;  %v3523_v37 = vmax.f32 %v7313_v26, 0.0 }
 0x441   : > { %v6783_v45 = vadd.f32 %v3341_v59, %v3105_v7  ;;  %v6785_v10 = vpop.f32.mrf.mxu3  ;;  %v3106_v48 = vadd.f32 %v3017_v23, %v2780_v63 }
 0x442   : > { %v3022_v8 = vpop.f32.mrf.mxu1 }
 0x443   : > { %v7201_v46 = vmax.f32 %v6783_v45, 0.0 }
 0x445   : > { %4149 = vmatmul.f32.gmra.mxu2 %v3520_v42  ;;  %4030 = vmatmul.f32.gmra.mxu1 %v3522_v0 }
 0x446   : > { %4081 = vmatmul.f32.gmra.mxu3 %v7201_v46  ;;  %v7315_v46 = vld [vmem:[#allocation41_spill] sm:$0xff] }
 0x447   : > { %v2781_v42 = vadd.f32 %v7315_v46, %v7314_v56  ;;  %5210 = vmatmul.msk.f32.gmra.mxu0 %vm272_vm0, %v6526_v3  ;;  %v7316_v56 = vld [vmem:[#allocation45_spill] sm:$0xff] }
 0x448   : > { %v3343_v32 = vpop.f32.mrf.mxu2  ;;  %v3524_v46 = vmax.f32 %v7316_v56, 0.0 }
 0x449   : > { %v6797_v7 = vadd.f32 %v3343_v32, %v3106_v48  ;;  %v6799_v59 = vpop.f32.mrf.mxu3  ;;  %v3107_v13 = vadd.f32 %v3020_v36, %v2781_v42  ;;  %v6813_v32 = vpop.f32.mrf.mxu0 }
 0x44a   : > { %v3025_v20 = vpop.f32.mrf.mxu1 }
 0x44b   : > { %v7202_v33 = vmax.f32 %v6797_v7, 0.0 }
 0x44d   : > { %4152 = vmatmul.f32.gmra.mxu2 %v3521_v21  ;;  %4033 = vmatmul.f32.gmra.mxu1 %v3523_v37 }
 0x44e   : > { %4084 = vmatmul.f32.gmra.mxu3 %v7202_v33  ;;  %v7318_v33 = vld [vmem:[#allocation44_spill] sm:$0xff] }
 0x44f   : > { %v2782_v21 = vadd.f32 %v7318_v33, %v7317_v1  ;;  %5211 = vmatmul.msk.f32.gmra.mxu0 %vm272_vm0, %v6540_v27  ;;  %v7320_v33 = vld [vmem:[#allocation16_spill] sm:$0xff] }
 0x450   : > { %v3346_v23 = vpop.f32.mrf.mxu2 }
 0x451   : > { %v6809_v63 = vadd.f32 %v3346_v23, %v3107_v13  ;;  %v6811_v48 = vpop.f32.mrf.mxu3  ;;  %v3108_v3 = vadd.f32 %v3022_v8, %v2782_v21  ;;  %v6829_v1 = vpop.f32.mrf.mxu0 }
 0x452   : > { %v3027_v35 = vpop.f32.mrf.mxu1 }
 0x453   : > { %v7203_v26 = vmax.f32 %v6809_v63, 0.0 }
 0x455   : > { %4155 = vmatmul.f32.gmra.mxu2 %v3522_v0  ;;  %4036 = vmatmul.f32.gmra.mxu1 %v3524_v46 }
 0x456   : > { %4087 = vmatmul.f32.gmra.mxu3 %v7203_v26  ;;  %v7321_v26 = vld [vmem:[#allocation49_spill] sm:$0xff] }
 0x457   : > { %v2783_v0 = vadd.f32 %v7321_v26, %v7320_v33  ;;  %5212 = vmatmul.msk.f32.gmra.mxu0 %vm272_vm0, %v6569_v62  ;;  %v7322_v26 = vld [vmem:[#allocation17_spill] sm:$0xff] }
 0x458   : > { %v3348_v36 = vpop.f32.mrf.mxu2  ;;  %v2784_v33 = vadd.f32 %v6549_v53, %v7322_v26  ;;  %v3527_v53 = vmax.f32 %v6564_v16, 0.0  ;;  %v7323_v26 = vld [vmem:[#allocation18_spill] sm:$0xff] }
 0x459   : > { %v6823_v42 = vadd.f32 %v3348_v36, %v3108_v3  ;;  %v6825_v13 = vpop.f32.mrf.mxu3  ;;  %v3109_v27 = vadd.f32 %v3025_v20, %v2783_v0 }
 0x45a   : > { %v3030_v56 = vpop.f32.mrf.mxu1  ;;  %v3110_v62 = vadd.f32 %v3027_v35, %v2784_v33 }
 0x45b   : > { %v7205_v23 = vmax.f32 %v6823_v42, 0.0 }
 0x45d   : > { %4158 = vmatmul.f32.gmra.mxu2 %v3523_v37  ;;  %4039 = vmatmul.f32.gmra.mxu1 %v3525_v5  ;;  %v6847_v37 = vpop.f32.mrf.mxu0 }
 0x45e   : > { %4090 = vmatmul.f32.gmra.mxu3 %v7205_v23 }
 0x45f   : > { %5213 = vmatmul.msk.f32.gmra.mxu0 %vm272_vm0, %v6596_v17 }
 0x460   : > { %v3351_v8 = vpop.f32.mrf.mxu2 }
 0x461   : > { %v6837_v21 = vadd.f32 %v3351_v8, %v3109_v27  ;;  %v6839_v3 = vpop.f32.mrf.mxu3 }
 0x462   : > { %v3032_v36 = vpop.f32.mrf.mxu1 }
 0x463   : > { %v7204_v51 = vmax.f32 %v6837_v21, 0.0 }
 0x465   : > { %4161 = vmatmul.f32.gmra.mxu2 %v3524_v46  ;;  %4042 = vmatmul.f32.gmra.mxu1 %v3526_v22  ;;  %v6863_v35 = vpop.f32.mrf.mxu0 }
 0x466   : > { %4093 = vmatmul.f32.gmra.mxu3 %v7204_v51  ;;  %v7324_v51 = vld [vmem:[#allocation52_spill] sm:$0xff] }
 0x467   : > { %v2785_v46 = vadd.f32 %v7324_v51, %v7323_v26  ;;  %5214 = vmatmul.msk.f32.gmra.mxu0 %vm272_vm0, %v6627_v55  ;;  %v3528_v51 = vmax.f32 %v6591_v30, 0.0  ;;  %v7325_v26 = vld [vmem:[#allocation19_spill] sm:$0xff] }
 0x468   : > { %v3353_v20 = vpop.f32.mrf.mxu2 }
 0x469   : > { %v6851_v0 = vadd.f32 %v3353_v20, %v3110_v62  ;;  %v6853_v27 = vpop.f32.mrf.mxu3  ;;  %v3111_v17 = vadd.f32 %v3030_v56, %v2785_v46 }
 0x46a   : > { %v3035_v8 = vpop.f32.mrf.mxu1 }
 0x46b   : > { %v7206_v39 = vmax.f32 %v6851_v0, 0.0 }
 0x46d   : > { %4164 = vmatmul.f32.gmra.mxu2 %v3525_v5  ;;  %4045 = vmatmul.f32.gmra.mxu1 %v3527_v53  ;;  %v2786_v5 = vadd.f32 %v6620_v58, %v7325_v26  ;;  %v3529_v58 = vmax.f32 %v6622_v44, 0.0  ;;  %v7326_v26 = vld [vmem:[#allocation20_spill] sm:$0xff] }
 0x46e   : > { %4096 = vmatmul.f32.gmra.mxu3 %v7206_v39 }
 0x46f   : > { %5215 = vmatmul.msk.f32.gmra.mxu0 %vm272_vm0, %v6648_v61  ;;  %v3112_v55 = vadd.f32 %v3032_v36, %v2786_v5 }
 0x470   : > { %v3356_v33 = vpop.f32.mrf.mxu2 }
 0x471   : > { %v6865_v62 = vadd.f32 %v3356_v33, %v3111_v17  ;;  %v6867_v20 = vpop.f32.mrf.mxu3  ;;  %v6881_v33 = vpop.f32.mrf.mxu0 }
 0x472   : > { %v3037_v23 = vpop.f32.mrf.mxu1 }
 0x473   : > { %v7209_v16 = vmax.f32 %v6865_v62, 0.0 }
 0x475   : > { %4167 = vmatmul.f32.gmra.mxu2 %v3526_v22  ;;  %4048 = vmatmul.f32.gmra.mxu1 %v3528_v51  ;;  %v2787_v22 = vadd.f32 %v6645_v50, %v7326_v26  ;;  %v3530_v50 = vmax.f32 %v6641_v18, 0.0 }
 0x476   : > { %4099 = vmatmul.f32.gmra.mxu3 %v7209_v16 }
 0x477   : > { %5216 = vmatmul.msk.f32.gmra.mxu0 %vm272_vm0, %v6665_v60  ;;  %v3113_v61 = vadd.f32 %v3035_v8, %v2787_v22 }
 0x478   : > { %v3358_v56 = vpop.f32.mrf.mxu2 }
 0x479   : > { %v6877_v46 = vadd.f32 %v3358_v56, %v3112_v55  ;;  %v6879_v17 = vpop.f32.mrf.mxu3  ;;  %v6897_v26 = vpop.f32.mrf.mxu0 }
 0x47a   : > { %v3040_v39 = vpop.f32.mrf.mxu1 }
 0x47b   : > { %v7207_v30 = vmax.f32 %v6877_v46, 0.0 }
 0x47d   : > { %4170 = vmatmul.f32.gmra.mxu2 %v3527_v53  ;;  %4051 = vmatmul.f32.gmra.mxu1 %v3529_v58  ;;  %v7327_v53 = vld [vmem:[#allocation21_spill] sm:$0xff] }
 0x47e   : > { %4102 = vmatmul.f32.gmra.mxu3 %v7207_v30  ;;  %v2788_v30 = vadd.f32 %v6668_v2, %v7327_v53  ;;  %v7328_v53 = vld [vmem:[#allocation25_spill] sm:$0xff] }
 0x47f   : > { %5217 = vmatmul.msk.f32.gmra.mxu0 %vm272_vm0, %v6683_v40 }
 0x480   : > { %v3361_v36 = vpop.f32.mrf.mxu2  ;;  %v3114_v60 = vadd.f32 %v3037_v23, %v2788_v30 }
 0x481   : > { %v6891_v5 = vadd.f32 %v3361_v36, %v3113_v61  ;;  %v6893_v55 = vpop.f32.mrf.mxu3  ;;  %v3531_v36 = vmax.f32 %v6659_v34, 0.0  ;;  %v6919_v40 = vpop.f32.mrf.mxu0 }
 0x482   : > { %v3042_v56 = vpop.f32.mrf.mxu1 }
 0x483   : > { %v7208_v44 = vmax.f32 %v6891_v5, 0.0 }
 0x485   : > { %4173 = vmatmul.f32.gmra.mxu2 %v3528_v51  ;;  %4054 = vmatmul.f32.gmra.mxu1 %v3530_v50 }
 0x486   : > { %4105 = vmatmul.f32.gmra.mxu3 %v7208_v44  ;;  %v7329_v44 = vld [vmem:[#allocation23_spill] sm:$0xff] }
 0x487   : > { %v2789_v16 = vadd.f32 %v6692_v47, %v7329_v44  ;;  %5218 = vmatmul.msk.f32.gmra.mxu0 %vm272_vm0, %v6703_v31 }
 0x488   : > { %v3363_v8 = vpop.f32.mrf.mxu2 }
 0x489   : > { %v6906_v22 = vadd.f32 %v3363_v8, %v3114_v60  ;;  %v6908_v61 = vpop.f32.mrf.mxu3  ;;  %v3115_v30 = vadd.f32 %v3040_v39, %v2789_v16  ;;  %v3532_v8 = vmax.f32 %v6678_v28, 0.0 }
 0x48a   : > { %v4010_v2 = vpop.f32.mrf.mxu1 }
 0x48b   : > { %v7210_v18 = vmax.f32 %v6906_v22, 0.0  ;;  %v4011_v51 = vadd.f32 %v4010_v2, %v7328_v53  ;;  %v7330_v2 = vld [vmem:[#allocation27_spill] sm:$0xff] }
 0x48d   : > { %4176 = vmatmul.f32.gmra.mxu2 %v3529_v58  ;;  %v4243_v23 = vmax.f32 %v4011_v51, 0.0  ;;  %4057 = vmatmul.f32.gmra.mxu1 %v3531_v36  ;;  %v7331_v51 = vld [vmem:[#allocation24_spill] sm:$0xff] }
 0x48e   : > { %4108 = vmatmul.f32.gmra.mxu3 %v7210_v18  ;;  %v2790_v31 = vadd.f32 %v6713_v11, %v7331_v51 }
 0x48f   : > { %4315 = vst [vmem:[%s6923_s13] sm:$0xff] %v4243_v23 }
 0x490   : > { %v3366_v60 = vpop.f32.mrf.mxu2  ;;  %v3116_v16 = vadd.f32 %v3042_v56, %v2790_v31 }
 0x491   : > { %v6926_v34 = vadd.f32 %v3366_v60, %v3115_v30  ;;  %v6928_v47 = vpop.f32.mrf.mxu3 }
 0x492   : > { %v4013_v44 = vpop.f32.mrf.mxu1 }
 0x493   : > { %v7211_v58 = vmax.f32 %v6926_v34, 0.0  ;;  %v4014_v53 = vadd.f32 %v4013_v44, %v7330_v2  ;;  %v3533_v44 = vmax.f32 %v6697_v4, 0.0  ;;  %v7332_v2 = vld [vmem:[#allocation29_spill] sm:$0xff] }
 0x495   : > { %4179 = vmatmul.f32.gmra.mxu2 %v3530_v50  ;;  %v4245_v39 = vmax.f32 %v4014_v53, 0.0  ;;  %4060 = vmatmul.f32.gmra.mxu1 %v3532_v8 }
 0x496   : > { %4111 = vmatmul.f32.gmra.mxu3 %v7211_v58 }
 0x497   : > { %4317 = vst [vmem:[%s6923_s13 + $0x10] sm:$0xff] %v4245_v39 }
 0x498   : > { %v3368_v23 = vpop.f32.mrf.mxu2 }
 0x499   : > { %v3442_v30 = vadd.f32 %v3368_v23, %v3116_v16  ;;  %v6938_v60 = vpop.f32.mrf.mxu3 }
 0x49a   : > { %v4016_v28 = vpop.f32.mrf.mxu1 }
 0x49b   : > { %v3550_v18 = vmax.f32 %v3442_v30, 0.0  ;;  %v4017_v50 = vadd.f32 %v4016_v28, %v7332_v2  ;;  %v7333_v30 = vld [vmem:[#allocation32_spill] sm:$0xff] }
 0x49d   : > { %4182 = vmatmul.f32.gmra.mxu2 %v3531_v36  ;;  %4063 = vmatmul.f32.gmra.mxu1 %v3533_v44  ;;  %v4247_v23 = vmax.f32 %v4017_v50, 0.0 }
 0x49e   : > { %4114 = vmatmul.f32.gmra.mxu3 %v3550_v18 }
 0x49f   : > { %v4326_v36 = vrot.slane %v4247_v23, 2 }
 0x4a0   : > { %v4135_v11 = vpop.f32.mrf.mxu2 }
 0x4a1   : > { %v4067_v53 = vpop.f32.mrf.mxu3  ;;  %v4136_v56 = vadd.f32 %v4135_v11, %v6727_v41 }
 0x4a2   : > { %v4068_v51 = vadd.f32 %v4067_v53, %v6717_v25  ;;  %v4019_v39 = vpop.f32.mrf.mxu1 }
 0x4a3   : > { %v4244_v31 = vmax.f32 %v4136_v56, 0.0  ;;  %v4020_v58 = vadd.f32 %v4019_v39, %v7333_v30  ;;  %v7334_v56 = vld [vmem:[#allocation35_spill] sm:$0xff] }
 0x4a4   : > { %v4281_v16 = vmax.f32 %v4068_v51, 0.0 }
 0x4a5   : > { %4316 = vst [vmem:[%s6923_s13 + $0x8] sm:$0xff] %v4244_v31  ;;  %4185 = vmatmul.f32.gmra.mxu2 %v3532_v8  ;;  %v4249_v4 = vmax.f32 %v4020_v58, 0.0 }
 0x4a6   : > { %4239 = vmatmul.f32.vlgmr.msra.gmra.mxu3 %v3550_v18  ;;  %4464 = vst [vmem:[%s6923_s13 + $0x110] sm:$0xff] %v4281_v16 }
 0x4a7   : > { %v4327_v2 = vrot.slane %v4249_v4, 2 }
 0x4a8   : > { %v4138_v28 = vpop.f32.mrf.mxu2 }
 0x4a9   : > { %v4070_v41 = vpop.f32.mrf.mxu3  ;;  %v4139_v25 = vadd.f32 %v4138_v28, %v6745_v54  ;;  %v4328_v11 = vsel %vm4325_vm1, %v4326_v36, %v4327_v2  ;;  %v7335_v36 = vld [vmem:[#allocation36_spill] sm:$0xff] }
 0x4aa   : > { %4340 = vst [vmem:[%s6923_s13 + $0x20] sm:$0xff] %v4328_v11  ;;  %v4022_v50 = vpop.f32.mrf.mxu1  ;;  %v4071_v18 = vadd.f32 %v4070_v41, %v6731_v15 }
 0x4ab   : > { %v4246_v53 = vmax.f32 %v4139_v25, 0.0  ;;  %v4023_v51 = vadd.f32 %v4022_v50, %v7334_v56 }
 0x4ac   : > { %v4283_v16 = vmax.f32 %v4071_v18, 0.0 }
 0x4ad   : > { %4318 = vst [vmem:[%s6923_s13 + $0x18] sm:$0xff] %v4246_v53  ;;  %4188 = vmatmul.f32.gmra.mxu2 %v3533_v44  ;;  %v4251_v58 = vmax.f32 %v4023_v51, 0.0  ;;  %v7336_v44 = vmax.f32 %v6715_v19, 0.0 }
 0x4ae   : > { %v4472_v15 = vrot.slane %v4283_v16, 2  ;;  %v7337_v16 = vld [vmem:[#allocation38_spill] sm:$0xff] }
 0x4af   : > { %v4332_v31 = vrot.slane %v4251_v58, 2  ;;  %v4349_v53 = vrot.slane %v4251_v58, 4 }
 0x4b0   : > { %v4141_v8 = vpop.f32.mrf.mxu2 }
 0x4b1   : > { %v4073_v39 = vpop.f32.mrf.mxu3  ;;  %v4333_v54 = vsel %vm4325_vm1, %v4327_v2, %v4332_v31  ;;  %v4142_v25 = vadd.f32 %v4141_v8, %v6761_v38 }
 0x4b2   : > { %v4074_v23 = vadd.f32 %v4073_v39, %v6743_v57  ;;  %4342 = vst [vmem:[%s6923_s13 + $0x30] sm:$0xff] %v4333_v54  ;;  %v4025_v30 = vpop.f32.mrf.mxu1 }
 0x4b3   : > { %v4026_v28 = vadd.f32 %v4025_v30, %v7335_v36  ;;  %v4248_v56 = vmax.f32 %v4142_v25, 0.0  ;;  %v7338_v30 = vmax.f32 %v6729_v49, 0.0 }
 0x4b4   : > { %v4285_v4 = vmax.f32 %v4074_v23, 0.0 }
 0x4b5   : > { %4191 = vmatmul.f32.gmra.mxu2 %v7336_v44  ;;  %v4253_v11 = vmax.f32 %v4026_v28, 0.0  ;;  %v4329_v58 = vrot.slane %v4248_v56, 2 }
 0x4b6   : > { %v4473_v41 = vrot.slane %v4285_v4, 2 }
 0x4b7   : > { %v4350_v2 = vrot.slane %v4253_v11, 4 }
 0x4b8   : > { %v4474_v57 = vsel %vm4325_vm1, %v4472_v15, %v4473_v41  ;;  %v4144_v50 = vpop.f32.mrf.mxu2 }
 0x4b9   : > { %4486 = vst [vmem:[%s6923_s13 + $0x120] sm:$0xff] %v4474_v57  ;;  %v4076_v51 = vpop.f32.mrf.mxu3  ;;  %v4145_v18 = vadd.f32 %v4144_v50, %v6779_v24  ;;  %v4351_v19 = vsel %vm4348_vm2, %v4349_v53, %v4350_v2  ;;  %v6977_v50 = vpop.f32.mrf.mxu0 }
 0x4ba   : > { %v4077_v38 = vadd.f32 %v4076_v51, %v6757_v43  ;;  %4363 = vst [vmem:[%s6923_s13 + $0x40] sm:$0xff] %v4351_v19  ;;  %v4028_v31 = vpop.f32.mrf.mxu1 }
 0x4bb   : > { %v4250_v8 = vmax.f32 %v4145_v18, 0.0  ;;  %v4029_v23 = vadd.f32 %v4028_v31, %v7337_v16 }
 0x4bc   : > { %v4287_v39 = vmax.f32 %v4077_v38, 0.0  ;;  %v7340_v38 = vmax.f32 %v6741_v12, 0.0 }
 0x4bd   : > { %v4330_v54 = vrot.slane %v4250_v8, 2  ;;  %4194 = vmatmul.f32.gmra.mxu2 %v7338_v30  ;;  %v4255_v36 = vmax.f32 %v4029_v23, 0.0 }
 0x4be   : > { %v4478_v4 = vrot.slane %v4287_v39, 2  ;;  %v4494_v19 = vrot.slane %v4287_v39, 4 }
 0x4bf   : > { %v4331_v24 = vsel %vm4325_vm1, %v4329_v58, %v4330_v54  ;;  %v4355_v25 = vrot.slane %v4255_v36, 4  ;;  %v4372_v31 = vrot.slane %v4255_v36, 6 }
 0x4c0   : > { %v4479_v43 = vsel %vm4325_vm1, %v4473_v41, %v4478_v4  ;;  %4341 = vst [vmem:[%s6923_s13 + $0x28] sm:$0xff] %v4331_v24  ;;  %v4147_v28 = vpop.f32.mrf.mxu2  ;;  %v7339_v41 = vld [vmem:[#allocation40_spill] sm:$0xff] }
 0x4c1   : > { %4488 = vst [vmem:[%s6923_s13 + $0x130] sm:$0xff] %v4479_v43  ;;  %v4079_v44 = vpop.f32.mrf.mxu3  ;;  %v4148_v15 = vadd.f32 %v4147_v28, %v6795_v52  ;;  %v4356_v57 = vsel %vm4348_vm2, %v4350_v2, %v4355_v25  ;;  %v7341_v43 = vld [vmem:[#allocation43_spill] sm:$0xff] }
 0x4c2   : > { %v4080_v11 = vadd.f32 %v4079_v44, %v6771_v6  ;;  %4365 = vst [vmem:[%s6923_s13 + $0x50] sm:$0xff] %v4356_v57  ;;  %v4031_v53 = vpop.f32.mrf.mxu1  ;;  %v7342_v44 = vmax.f32 %v6755_v14, 0.0 }
 0x4c3   : > { %v4252_v49 = vmax.f32 %v4148_v15, 0.0  ;;  %v4032_v51 = vadd.f32 %v4031_v53, %v7339_v41  ;;  %v6993_v15 = vpop.f32.mrf.mxu0 }
 0x4c4   : > { %v4289_v56 = vmax.f32 %v4080_v11, 0.0 }
 0x4c5   : > { %v4334_v18 = vrot.slane %v4252_v49, 2  ;;  %4197 = vmatmul.f32.gmra.mxu2 %v7340_v38  ;;  %v4257_v6 = vmax.f32 %v4032_v51, 0.0  ;;  %v4352_v25 = vrot.slane %v4252_v49, 4 }
 0x4c6   : > { %v4495_v52 = vrot.slane %v4289_v56, 4 }
 0x4c7   : > { %v4335_v8 = vsel %vm4325_vm1, %v4330_v54, %v4334_v18  ;;  %v4373_v23 = vrot.slane %v4257_v6, 6  ;;  %v7343_v6 = vld [vmem:[#allocation46_spill] sm:$0xff] }
 0x4c8   : > { %v4496_v2 = vsel %vm4348_vm2, %v4494_v19, %v4495_v52  ;;  %4343 = vst [vmem:[%s6923_s13 + $0x38] sm:$0xff] %v4335_v8  ;;  %v4150_v16 = vpop.f32.mrf.mxu2 }
 0x4c9   : > { %4508 = vst [vmem:[%s6923_s13 + $0x140] sm:$0xff] %v4496_v2  ;;  %v4082_v58 = vpop.f32.mrf.mxu3  ;;  %v4151_v30 = vadd.f32 %v4150_v16, %v6813_v32  ;;  %v4374_v39 = vsel %vm4371_vm3, %v4372_v31, %v4373_v23  ;;  %v7344_v2 = vmax.f32 %v6769_v29, 0.0 }
 0x4ca   : > { %v4083_v12 = vadd.f32 %v4082_v58, %v6785_v10  ;;  %4386 = vst [vmem:[%s6923_s13 + $0x60] sm:$0xff] %v4374_v39  ;;  %v4034_v54 = vpop.f32.mrf.mxu1 }
 0x4cb   : > { %v4254_v4 = vmax.f32 %v4151_v30, 0.0  ;;  %v4035_v28 = vadd.f32 %v4034_v54, %v7341_v43  ;;  %v7345_v43 = vld [vmem:[#allocation48_spill] sm:$0xff] }
 0x4cc   : > { %v4291_v24 = vmax.f32 %v4083_v12, 0.0 }
 0x4cd   : > { %v4353_v36 = vrot.slane %v4254_v4, 4  ;;  %4200 = vmatmul.f32.gmra.mxu2 %v7342_v44  ;;  %v4259_v11 = vmax.f32 %v4035_v28, 0.0  ;;  %v7346_v44 = vmax.f32 %v6783_v45, 0.0 }
 0x4ce   : > { %v4500_v32 = vrot.slane %v4291_v24, 4  ;;  %v4516_v31 = vrot.slane %v4291_v24, 6 }
 0x4cf   : > { %v4354_v10 = vsel %vm4348_vm2, %v4352_v25, %v4353_v36  ;;  %v4378_v56 = vrot.slane %v4259_v11, 6 }
 0x4d0   : > { %v4501_v57 = vsel %vm4348_vm2, %v4495_v52, %v4500_v32  ;;  %4364 = vst [vmem:[%s6923_s13 + $0x48] sm:$0xff] %v4354_v10  ;;  %v4153_v53 = vpop.f32.mrf.mxu2 }
 0x4d1   : > { %4510 = vst [vmem:[%s6923_s13 + $0x150] sm:$0xff] %v4501_v57  ;;  %v4085_v41 = vpop.f32.mrf.mxu3  ;;  %v4154_v49 = vadd.f32 %v4153_v53, %v6829_v1  ;;  %v4379_v51 = vsel %vm4371_vm3, %v4373_v23, %v4378_v56 }
 0x4d2   : > { %v4086_v14 = vadd.f32 %v4085_v41, %v6799_v59  ;;  %4388 = vst [vmem:[%s6923_s13 + $0x70] sm:$0xff] %v4379_v51  ;;  %v4037_v38 = vpop.f32.mrf.mxu1  ;;  %v7007_v59 = vpop.f32.mrf.mxu0 }
 0x4d3   : > { %v4256_v18 = vmax.f32 %v4154_v49, 0.0  ;;  %v4038_v52 = vadd.f32 %v4037_v38, %v7343_v6 }
 0x4d4   : > { %v4293_v19 = vmax.f32 %v4086_v14, 0.0 }
 0x4d5   : > { %v4357_v8 = vrot.slane %v4256_v18, 4  ;;  %4203 = vmatmul.f32.gmra.mxu2 %v7344_v2  ;;  %v4261_v1 = vmax.f32 %v4038_v52, 0.0  ;;  %v4375_v25 = vrot.slane %v4256_v18, 6  ;;  %v7347_v18 = vmax.f32 %v6797_v7, 0.0 }
 0x4d6   : > { %v4517_v16 = vrot.slane %v4293_v19, 6 }
 0x4d7   : > { %v4358_v58 = vsel %vm4348_vm2, %v4353_v36, %v4357_v8  ;;  %4390 = vst [vmem:[%s6923_s13 + $0x80] sm:$0xff] %v4261_v1 }
 0x4d8   : > { %v4518_v23 = vsel %vm4371_vm3, %v4516_v31, %v4517_v16  ;;  %4366 = vst [vmem:[%s6923_s13 + $0x58] sm:$0xff] %v4358_v58  ;;  %v4156_v30 = vpop.f32.mrf.mxu2  ;;  %v7349_v58 = vld [vmem:[#allocation51_spill] sm:$0xff] }
 0x4d9   : > { %4530 = vst [vmem:[%s6923_s13 + $0x160] sm:$0xff] %v4518_v23  ;;  %v4088_v12 = vpop.f32.mrf.mxu3  ;;  %v4157_v39 = vadd.f32 %v4156_v30, %v6847_v37  ;;  %v7350_v30 = vmax.f32 %v6809_v63, 0.0  ;;  %v7351_v63 = vmax.f32 %v6823_v42, 0.0 }
 0x4da   : > { %v4089_v29 = vadd.f32 %v4088_v12, %v6811_v48  ;;  %v4040_v54 = vpop.f32.mrf.mxu1  ;;  %v7023_v56 = vpop.f32.mrf.mxu0 }
 0x4db   : > { %v4258_v4 = vmax.f32 %v4157_v39, 0.0  ;;  %v4041_v28 = vadd.f32 %v4040_v54, %v7345_v43 }
 0x4dc   : > { %v4295_v24 = vmax.f32 %v4089_v29, 0.0 }
 0x4dd   : > { %v4376_v36 = vrot.slane %v4258_v4, 6  ;;  %4206 = vmatmul.f32.gmra.mxu2 %v7346_v44  ;;  %v4263_v11 = vmax.f32 %v4041_v28, 0.0 }
 0x4de   : > { %v4522_v32 = vrot.slane %v4295_v24, 6 }
 0x4df   : > { %v4377_v37 = vsel %vm4371_vm3, %v4375_v25, %v4376_v36  ;;  %4392 = vst [vmem:[%s6923_s13 + $0x90] sm:$0xff] %v4263_v11 }
 0x4e0   : > { %v4523_v10 = vsel %vm4371_vm3, %v4517_v16, %v4522_v32  ;;  %4387 = vst [vmem:[%s6923_s13 + $0x68] sm:$0xff] %v4377_v37  ;;  %v4159_v48 = vpop.f32.mrf.mxu2 }
 0x4e1   : > { %4532 = vst [vmem:[%s6923_s13 + $0x170] sm:$0xff] %v4523_v10  ;;  %v4091_v57 = vpop.f32.mrf.mxu3  ;;  %v4160_v53 = vadd.f32 %v4159_v48, %v6863_v35  ;;  %v7348_v35 = vld [vmem:[#allocation50_spill] sm:$0xff] }
 0x4e2   : > { %v4092_v41 = vadd.f32 %v4091_v57, %v6825_v13  ;;  %v4043_v49 = vpop.f32.mrf.mxu1  ;;  %v7035_v16 = vpop.f32.mrf.mxu0 }
 0x4e3   : > { %v4260_v45 = vmax.f32 %v4160_v53, 0.0  ;;  %v4044_v6 = vadd.f32 %v4043_v49, %v7348_v35  ;;  %v7352_v53 = vld [vmem:[#allocation53_spill] sm:$0xff] }
 0x4e4   : > { %v4297_v14 = vmax.f32 %v4092_v41, 0.0 }
 0x4e5   : > { %v4380_v51 = vrot.slane %v4260_v45, 6  ;;  %4209 = vmatmul.f32.gmra.mxu2 %v7347_v18  ;;  %v4265_v1 = vmax.f32 %v4044_v6, 0.0  ;;  %v7353_v45 = vmax.f32 %v6837_v21, 0.0 }
 0x4e6   : > { %4534 = vst [vmem:[%s6923_s13 + $0x180] sm:$0xff] %v4297_v14 }
 0x4e7   : > { %v4381_v38 = vsel %vm4371_vm3, %v4376_v36, %v4380_v51  ;;  %v4400_v39 = vrot.slane %v4265_v1, 2 }
 0x4e8   : > { %4389 = vst [vmem:[%s6923_s13 + $0x78] sm:$0xff] %v4381_v38  ;;  %v4162_v19 = vpop.f32.mrf.mxu2 }
 0x4e9   : > { %v4094_v52 = vpop.f32.mrf.mxu3  ;;  %v4163_v13 = vadd.f32 %v4162_v19, %v6881_v33 }
 0x4ea   : > { %v4095_v8 = vadd.f32 %v4094_v52, %v6839_v3  ;;  %v4046_v31 = vpop.f32.mrf.mxu1  ;;  %v7049_v25 = vpop.f32.mrf.mxu0 }
 0x4eb   : > { %v4262_v2 = vmax.f32 %v4163_v13, 0.0  ;;  %v4047_v23 = vadd.f32 %v4046_v31, %v7349_v58  ;;  %v7354_v31 = vld [vmem:[#allocation54_spill] sm:$0xff] }
 0x4ec   : > { %v4299_v7 = vmax.f32 %v4095_v8, 0.0 }
 0x4ed   : > { %4391 = vst [vmem:[%s6923_s13 + $0x88] sm:$0xff] %v4262_v2  ;;  %4212 = vmatmul.f32.gmra.mxu2 %v7350_v30  ;;  %v4267_v12 = vmax.f32 %v4047_v23, 0.0  ;;  %v7355_v23 = vmax.f32 %v6851_v0, 0.0 }
 0x4ee   : > { %4536 = vst [vmem:[%s6923_s13 + $0x190] sm:$0xff] %v4299_v7 }
 0x4ef   : > { %v4401_v29 = vrot.slane %v4267_v12, 2 }
 0x4f0   : > { %v4165_v33 = vpop.f32.mrf.mxu2 }
 0x4f1   : > { %v4097_v3 = vpop.f32.mrf.mxu3  ;;  %v4166_v4 = vadd.f32 %v4165_v33, %v6897_v26  ;;  %v4402_v54 = vsel %vm4325_vm1, %v4400_v39, %v4401_v29 }
 0x4f2   : > { %4414 = vst [vmem:[%s6923_s13 + $0xa0] sm:$0xff] %v4402_v54  ;;  %v4049_v43 = vpop.f32.mrf.mxu1  ;;  %v4098_v36 = vadd.f32 %v4097_v3, %v6853_v27  ;;  %v7059_v51 = vpop.f32.mrf.mxu0 }
 0x4f3   : > { %v4264_v24 = vmax.f32 %v4166_v4, 0.0  ;;  %v4050_v28 = vadd.f32 %v4049_v43, %v6593_v9 }
 0x4f4   : > { %v4301_v37 = vmax.f32 %v4098_v36, 0.0 }
 0x4f5   : > { %4393 = vst [vmem:[%s6923_s13 + $0x98] sm:$0xff] %v4264_v24  ;;  %4215 = vmatmul.f32.gmra.mxu2 %v7351_v63  ;;  %v4269_v44 = vmax.f32 %v4050_v28, 0.0  ;;  %v7356_v63 = vld [vmem:[#allocation55_spill] sm:$0xff] }
 0x4f6   : > { %v4544_v27 = vrot.slane %v4301_v37, 2 }
 0x4f7   : > { %v4406_v11 = vrot.slane %v4269_v44, 2  ;;  %v4422_v18 = vrot.slane %v4269_v44, 4 }
 0x4f8   : > { %v4168_v32 = vpop.f32.mrf.mxu2 }
 0x4f9   : > { %v4100_v26 = vpop.f32.mrf.mxu3  ;;  %v4407_v48 = vsel %vm4325_vm1, %v4401_v29, %v4406_v11  ;;  %v4169_v41 = vadd.f32 %v4168_v32, %v6919_v40  ;;  %v7357_v32 = vmax.f32 %v6865_v62, 0.0 }
 0x4fa   : > { %v4101_v10 = vadd.f32 %v4100_v26, %v6867_v20  ;;  %4416 = vst [vmem:[%s6923_s13 + $0xb0] sm:$0xff] %v4407_v48  ;;  %v4052_v9 = vpop.f32.mrf.mxu1  ;;  %v7075_v4 = vpop.f32.mrf.mxu0 }
 0x4fb   : > { %v4053_v42 = vadd.f32 %v4052_v9, %v7352_v53  ;;  %v4266_v35 = vmax.f32 %v4169_v41, 0.0 }
 0x4fc   : > { %v4303_v57 = vmax.f32 %v4101_v10, 0.0 }
 0x4fd   : > { %4218 = vmatmul.f32.gmra.mxu2 %v7353_v45  ;;  %v4271_v14 = vmax.f32 %v4053_v42, 0.0  ;;  %v4403_v1 = vrot.slane %v4266_v35, 2 }
 0x4fe   : > { %v4545_v49 = vrot.slane %v4303_v57, 2 }
 0x4ff   : > { %v4423_v19 = vrot.slane %v4271_v14, 4  ;;  %v7358_v14 = vld [vmem:[#allocation56_spill] sm:$0xff] }
 0x500   : > { %v4546_v20 = vsel %vm4325_vm1, %v4544_v27, %v4545_v49  ;;  %v4171_v38 = vpop.f32.mrf.mxu2 }
 0x501   : > { %4558 = vst [vmem:[%s6923_s13 + $0x1a0] sm:$0xff] %v4546_v20  ;;  %v4103_v6 = vpop.f32.mrf.mxu3  ;;  %v4172_v40 = vadd.f32 %v4171_v38, %v6977_v50  ;;  %v4424_v52 = vsel %vm4348_vm2, %v4422_v18, %v4423_v19 }
 0x502   : > { %v4104_v21 = vadd.f32 %v4103_v6, %v6879_v17  ;;  %4436 = vst [vmem:[%s6923_s13 + $0xc0] sm:$0xff] %v4424_v52  ;;  %v4055_v8 = vpop.f32.mrf.mxu1  ;;  %v7091_v27 = vpop.f32.mrf.mxu0 }
 0x503   : > { %v4268_v13 = vmax.f32 %v4172_v40, 0.0  ;;  %v4056_v7 = vadd.f32 %v4055_v8, %v7354_v31 }
 0x504   : > { %v4305_v2 = vmax.f32 %v4104_v21, 0.0 }
 0x505   : > { %v4404_v58 = vrot.slane %v4268_v13, 2  ;;  %4221 = vmatmul.f32.gmra.mxu2 %v7355_v23  ;;  %v4273_v12 = vmax.f32 %v4056_v7, 0.0 }
 0x506   : > { %v4550_v30 = vrot.slane %v4305_v2, 2 }
 0x507   : > { %v4405_v50 = vsel %vm4325_vm1, %v4403_v1, %v4404_v58  ;;  %v4428_v33 = vrot.slane %v4273_v12, 4  ;;  %v4444_v10 = vrot.slane %v4273_v12, 6  ;;  %v7360_v1 = vld [vmem:[#allocation22_spill] sm:$0xff] }
 0x508   : > { %v4551_v17 = vsel %vm4325_vm1, %v4545_v49, %v4550_v30  ;;  %4415 = vst [vmem:[%s6923_s13 + $0xa8] sm:$0xff] %v4405_v50  ;;  %v4174_v39 = vpop.f32.mrf.mxu2  ;;  %v7361_v30 = vmax.f32 %v6891_v5, 0.0 }
 0x509   : > { %4560 = vst [vmem:[%s6923_s13 + $0x1b0] sm:$0xff] %v4551_v17  ;;  %v4106_v29 = vpop.f32.mrf.mxu3  ;;  %v4175_v3 = vadd.f32 %v4174_v39, %v6993_v15  ;;  %v4429_v54 = vsel %vm4348_vm2, %v4423_v19, %v4428_v33  ;;  %v4566_v15 = vrot.slane %v4305_v2, 4  ;;  %v7359_v19 = vmax.f32 %v6877_v46, 0.0 }
 0x50a   : > { %v4107_v0 = vadd.f32 %v4106_v29, %v6893_v55  ;;  %4438 = vst [vmem:[%s6923_s13 + $0xd0] sm:$0xff] %v4429_v54  ;;  %v4058_v43 = vpop.f32.mrf.mxu1  ;;  %v3948_v12 = vpop.f32.mrf.mxu0 }
 0x50b   : > { %v4270_v24 = vmax.f32 %v4175_v3, 0.0  ;;  %v4059_v36 = vadd.f32 %v4058_v43, %v7356_v63 }
 0x50c   : > { %v4307_v28 = vmax.f32 %v4107_v0, 0.0 }
 0x50d   : > { %v4408_v44 = vrot.slane %v4270_v24, 2  ;;  %4224 = vmatmul.f32.gmra.mxu2 %v7357_v32  ;;  %v4275_v26 = vmax.f32 %v4059_v36, 0.0  ;;  %v4425_v18 = vrot.slane %v4270_v24, 4 }
 0x50e   : > { %v4567_v11 = vrot.slane %v4307_v28, 4  ;;  %v7362_v28 = vmax.f32 %v6906_v22, 0.0 }
 0x50f   : > { %v4409_v37 = vsel %vm4325_vm1, %v4404_v58, %v4408_v44  ;;  %v4445_v9 = vrot.slane %v4275_v26, 6  ;;  %v7363_v26 = vmax.f32 %v6926_v34, 0.0 }
 0x510   : > { %v4568_v55 = vsel %vm4348_vm2, %v4566_v15, %v4567_v11  ;;  %4417 = vst [vmem:[%s6923_s13 + $0xb8] sm:$0xff] %v4409_v37  ;;  %v4177_v48 = vpop.f32.mrf.mxu2 }
 0x511   : > { %4580 = vst [vmem:[%s6923_s13 + $0x1c0] sm:$0xff] %v4568_v55  ;;  %v4109_v57 = vpop.f32.mrf.mxu3  ;;  %v4178_v53 = vadd.f32 %v4177_v48, %v7007_v59  ;;  %v4446_v42 = vsel %vm4371_vm3, %v4444_v10, %v4445_v9 }
 0x512   : > { %v4110_v62 = vadd.f32 %v4109_v57, %v6908_v61  ;;  %4458 = vst [vmem:[%s6923_s13 + $0xe0] sm:$0xff] %v4446_v42  ;;  %v4061_v45 = vpop.f32.mrf.mxu1  ;;  %v3951_v44 = vpop.f32.mrf.mxu0 }
 0x513   : > { %v4272_v41 = vmax.f32 %v4178_v53, 0.0  ;;  %v4062_v20 = vadd.f32 %v4061_v45, %v7358_v14 }
 0x514   : > { %v4309_v49 = vmax.f32 %v4110_v62, 0.0 }
 0x515   : > { %v4426_v38 = vrot.slane %v4272_v41, 4  ;;  %4227 = vmatmul.f32.gmra.mxu2 %v7359_v19  ;;  %v4277_v35 = vmax.f32 %v4062_v20, 0.0 }
 0x516   : > { %v4572_v59 = vrot.slane %v4309_v49, 4  ;;  %v4588_v50 = vrot.slane %v4309_v49, 6 }
 0x517   : > { %v4427_v61 = vsel %vm4348_vm2, %v4425_v18, %v4426_v38  ;;  %v4450_v21 = vrot.slane %v4277_v35, 6 }
 0x518   : > { %v4573_v6 = vsel %vm4348_vm2, %v4567_v11, %v4572_v59  ;;  %4437 = vst [vmem:[%s6923_s13 + $0xc8] sm:$0xff] %v4427_v61  ;;  %v4180_v40 = vpop.f32.mrf.mxu2 }
 0x519   : > { %4582 = vst [vmem:[%s6923_s13 + $0x1d0] sm:$0xff] %v4573_v6  ;;  %v4112_v52 = vpop.f32.mrf.mxu3  ;;  %v4181_v13 = vadd.f32 %v4180_v40, %v7023_v56  ;;  %v4451_v2 = vsel %vm4371_vm3, %v4445_v9, %v4450_v21 }
 0x51a   : > { %v4113_v8 = vadd.f32 %v4112_v52, %v6928_v47  ;;  %4460 = vst [vmem:[%s6923_s13 + $0xf0] sm:$0xff] %v4451_v2  ;;  %v4064_v31 = vpop.f32.mrf.mxu1  ;;  %v3954_v10 = vpop.f32.mrf.mxu0 }
 0x51b   : > { %v4274_v46 = vmax.f32 %v4181_v13, 0.0  ;;  %v4065_v58 = vadd.f32 %v4064_v31, %v7360_v1 }
 0x51c   : > { %v4311_v7 = vmax.f32 %v4113_v8, 0.0 }
 0x51d   : > { %v4430_v23 = vrot.slane %v4274_v46, 4  ;;  %4230 = vmatmul.f32.gmra.mxu2 %v7361_v30  ;;  %v4279_v17 = vmax.f32 %v4065_v58, 0.0  ;;  %v4447_v24 = vrot.slane %v4274_v46, 6 }
 0x51e   : > { %v4589_v56 = vrot.slane %v4311_v7, 6 }
 0x51f   : > { %v4431_v47 = vsel %vm4348_vm2, %v4426_v38, %v4430_v23  ;;  %4462 = vst [vmem:[%s6923_s13 + $0x100] sm:$0xff] %v4279_v17 }
 0x520   : > { %v4590_v39 = vsel %vm4371_vm3, %v4588_v50, %v4589_v56  ;;  %4439 = vst [vmem:[%s6923_s13 + $0xd8] sm:$0xff] %v4431_v47  ;;  %v4183_v33 = vpop.f32.mrf.mxu2 }
 0x521   : > { %4602 = vst [vmem:[%s6923_s13 + $0x1e0] sm:$0xff] %v4590_v39  ;;  %v4115_v29 = vpop.f32.mrf.mxu3  ;;  %v4184_v3 = vadd.f32 %v4183_v33, %v7035_v16 }
 0x522   : > { %v4116_v0 = vadd.f32 %v4115_v29, %v6938_v60 }
 0x523   : > { %v4276_v5 = vmax.f32 %v4184_v3, 0.0 }
 0x524   : > { %v4313_v54 = vmax.f32 %v4116_v0, 0.0 }
 0x525   : > { %v4448_v43 = vrot.slane %v4276_v5, 6  ;;  %4233 = vmatmul.f32.gmra.mxu2 %v7362_v28 }
 0x526   : > { %v4594_v63 = vrot.slane %v4313_v54, 6 }
 0x527   : > { %v4449_v36 = vsel %vm4371_vm3, %v4447_v24, %v4448_v43 }
 0x528   : > { %v4595_v32 = vsel %vm4371_vm3, %v4589_v56, %v4594_v63  ;;  %4459 = vst [vmem:[%s6923_s13 + $0xe8] sm:$0xff] %v4449_v36  ;;  %v4186_v16 = vpop.f32.mrf.mxu2 }
 0x529   : > { %4604 = vst [vmem:[%s6923_s13 + $0x1f0] sm:$0xff] %v4595_v32  ;;  %v4187_v60 = vadd.f32 %v4186_v16, %v7049_v25  ;;  %v3957_v25 = vpop.f32.mrf.mxu0 }
 0x52b   : > { %v4278_v15 = vmax.f32 %v4187_v60, 0.0 }
 0x52d   : > { %v4452_v11 = vrot.slane %v4278_v15, 6  ;;  %4236 = vmatmul.f32.gmra.mxu2 %v7363_v26 }
 0x52f   : > { %v4453_v22 = vsel %vm4371_vm3, %v4448_v43, %v4452_v11 }
 0x530   : > { %4461 = vst [vmem:[%s6923_s13 + $0xf8] sm:$0xff] %v4453_v22  ;;  %v4189_v37 = vpop.f32.mrf.mxu2 }
 0x531   : > { %v4190_v55 = vadd.f32 %v4189_v37, %v7059_v51  ;;  %v3960_v42 = vpop.f32.mrf.mxu0 }
 0x533   : > { %v4280_v48 = vmax.f32 %v4190_v55, 0.0 }
 0x535   : > { %4463 = vst [vmem:[%s6923_s13 + $0x108] sm:$0xff] %v4280_v48 }
 0x538   : > { %v4192_v9 = vpop.f32.mrf.mxu2 }
 0x539   : > { %v4193_v57 = vadd.f32 %v4192_v9, %v7075_v4  ;;  %v3963_v38 = vpop.f32.mrf.mxu0 }
 0x53b   : > { %v4282_v53 = vmax.f32 %v4193_v57, 0.0 }
 0x53d   : > { %4465 = vst [vmem:[%s6923_s13 + $0x118] sm:$0xff] %v4282_v53 }
 0x540   : > { %v4195_v62 = vpop.f32.mrf.mxu2 }
 0x541   : > { %v4196_v34 = vadd.f32 %v4195_v62, %v7091_v27  ;;  %v3966_v40 = vpop.f32.mrf.mxu0 }
 0x543   : > { %v4284_v45 = vmax.f32 %v4196_v34, 0.0 }
 0x545   : > { %v4475_v51 = vrot.slane %v4284_v45, 2 }
 0x548   : > { %v4198_v41 = vpop.f32.mrf.mxu2 }
 0x549   : > { %v4199_v49 = vadd.f32 %v4198_v41, %v3948_v12  ;;  %v3969_v7 = vpop.f32.mrf.mxu0 }
 0x54b   : > { %v4286_v14 = vmax.f32 %v4199_v49, 0.0 }
 0x54d   : > { %v4476_v20 = vrot.slane %v4286_v14, 2 }
 0x54f   : > { %v4477_v18 = vsel %vm4325_vm1, %v4475_v51, %v4476_v20 }
 0x550   : > { %4487 = vst [vmem:[%s6923_s13 + $0x128] sm:$0xff] %v4477_v18  ;;  %v4201_v4 = vpop.f32.mrf.mxu2 }
 0x551   : > { %v4202_v19 = vadd.f32 %v4201_v4, %v3951_v44  ;;  %v3972_v17 = vpop.f32.mrf.mxu0  ;;  %v4240_v4 = vpop.f32.mrf.mxu3 }
 0x553   : > { %v4288_v59 = vmax.f32 %v4202_v19, 0.0 }
 0x555   : > { %v4480_v35 = vrot.slane %v4288_v59, 2  ;;  %v4497_v52 = vrot.slane %v4288_v59, 4 }
 0x557   : > { %v4481_v61 = vsel %vm4325_vm1, %v4476_v20, %v4480_v35 }
 0x558   : > { %4489 = vst [vmem:[%s6923_s13 + $0x138] sm:$0xff] %v4481_v61  ;;  %v4204_v27 = vpop.f32.mrf.mxu2 }
 0x559   : > { %v4205_v6 = vadd.f32 %v4204_v27, %v3954_v10  ;;  %v3975_v5 = vpop.f32.mrf.mxu0 }
 0x55b   : > { %v4290_v21 = vmax.f32 %v4205_v6, 0.0 }
 0x55d   : > { %v4498_v13 = vrot.slane %v4290_v21, 4 }
 0x55f   : > { %v4499_v8 = vsel %vm4348_vm2, %v4497_v52, %v4498_v13 }
 0x560   : > { %4509 = vst [vmem:[%s6923_s13 + $0x148] sm:$0xff] %v4499_v8  ;;  %v4207_v2 = vpop.f32.mrf.mxu2 }
 0x561   : > { %v4208_v46 = vadd.f32 %v4207_v2, %v3957_v25  ;;  %v3978_v36 = vpop.f32.mrf.mxu0 }
 0x563   : > { %v4292_v31 = vmax.f32 %v4208_v46, 0.0 }
 0x565   : > { %v4502_v1 = vrot.slane %v4292_v31, 4  ;;  %v4519_v50 = vrot.slane %v4292_v31, 6 }
 0x567   : > { %v4503_v58 = vsel %vm4348_vm2, %v4498_v13, %v4502_v1 }
 0x568   : > { %4511 = vst [vmem:[%s6923_s13 + $0x158] sm:$0xff] %v4503_v58  ;;  %v4210_v23 = vpop.f32.mrf.mxu2 }
 0x569   : > { %v4211_v30 = vadd.f32 %v4210_v23, %v3960_v42  ;;  %v3981_v16 = vpop.f32.mrf.mxu0 }
 0x56b   : > { %v4294_v12 = vmax.f32 %v4211_v30, 0.0 }
 0x56d   : > { %v4520_v56 = vrot.slane %v4294_v12, 6 }
 0x56f   : > { %v4521_v47 = vsel %vm4371_vm3, %v4519_v50, %v4520_v56 }
 0x570   : > { %4531 = vst [vmem:[%s6923_s13 + $0x168] sm:$0xff] %v4521_v47  ;;  %v4213_v39 = vpop.f32.mrf.mxu2 }
 0x571   : > { %v4214_v33 = vadd.f32 %v4213_v39, %v3963_v38  ;;  %v3984_v10 = vpop.f32.mrf.mxu0 }
 0x573   : > { %v4296_v29 = vmax.f32 %v4214_v33, 0.0 }
 0x575   : > { %v4524_v3 = vrot.slane %v4296_v29, 6 }
 0x577   : > { %v4525_v0 = vsel %vm4371_vm3, %v4520_v56, %v4524_v3 }
 0x578   : > { %4533 = vst [vmem:[%s6923_s13 + $0x178] sm:$0xff] %v4525_v0  ;;  %v4216_v54 = vpop.f32.mrf.mxu2 }
 0x579   : > { %v4217_v24 = vadd.f32 %v4216_v54, %v3966_v40  ;;  %v3987_v34 = vpop.f32.mrf.mxu0 }
 0x57b   : > { %v4298_v43 = vmax.f32 %v4217_v24, 0.0 }
 0x57d   : > { %4535 = vst [vmem:[%s6923_s13 + $0x188] sm:$0xff] %v4298_v43 }
 0x580   : > { %v4219_v28 = vpop.f32.mrf.mxu2 }
 0x581   : > { %v4220_v63 = vadd.f32 %v4219_v28, %v3969_v7  ;;  %v3990_v38 = vpop.f32.mrf.mxu0 }
 0x582   : > { %v4241_v59 = vadd.f32 %v4240_v4, %v3990_v38 }
 0x583   : > { %v4300_v44 = vmax.f32 %v4220_v63, 0.0 }
 0x584   : > { %v4314_v6 = vmax.f32 %v4241_v59, 0.0 }
 0x585   : > { %4537 = vst [vmem:[%s6923_s13 + $0x198] sm:$0xff] %v4300_v44 }
 0x586   : > { %v4596_v52 = vrot.slane %v4314_v6, 6 }
 0x588   : > { %v4222_v32 = vpop.f32.mrf.mxu2 }
 0x589   : > { %v4223_v60 = vadd.f32 %v4222_v32, %v3972_v17 }
 0x58b   : > { %v4302_v11 = vmax.f32 %v4223_v60, 0.0 }
 0x58d   : > { %v4547_v37 = vrot.slane %v4302_v11, 2 }
 0x590   : > { %v4225_v15 = vpop.f32.mrf.mxu2 }
 0x591   : > { %v4226_v26 = vadd.f32 %v4225_v15, %v3975_v5 }
 0x593   : > { %v4304_v22 = vmax.f32 %v4226_v26, 0.0 }
 0x595   : > { %v4548_v55 = vrot.slane %v4304_v22, 2 }
 0x597   : > { %v4549_v48 = vsel %vm4325_vm1, %v4547_v37, %v4548_v55 }
 0x598   : > { %4559 = vst [vmem:[%s6923_s13 + $0x1a8] sm:$0xff] %v4549_v48  ;;  %v4228_v9 = vpop.f32.mrf.mxu2 }
 0x599   : > { %v4229_v57 = vadd.f32 %v4228_v9, %v3978_v36 }
 0x59b   : > { %v4306_v53 = vmax.f32 %v4229_v57, 0.0 }
 0x59d   : > { %v4552_v25 = vrot.slane %v4306_v53, 2  ;;  %v4569_v49 = vrot.slane %v4306_v53, 4 }
 0x59f   : > { %v4553_v62 = vsel %vm4325_vm1, %v4548_v55, %v4552_v25 }
 0x5a0   : > { %4561 = vst [vmem:[%s6923_s13 + $0x1b8] sm:$0xff] %v4553_v62  ;;  %v4231_v42 = vpop.f32.mrf.mxu2 }
 0x5a1   : > { %v4232_v41 = vadd.f32 %v4231_v42, %v3981_v16 }
 0x5a3   : > { %v4308_v45 = vmax.f32 %v4232_v41, 0.0 }
 0x5a5   : > { %v4570_v14 = vrot.slane %v4308_v45, 4 }
 0x5a7   : > { %v4571_v51 = vsel %vm4348_vm2, %v4569_v49, %v4570_v14 }
 0x5a8   : > { %4581 = vst [vmem:[%s6923_s13 + $0x1c8] sm:$0xff] %v4571_v51  ;;  %v4234_v20 = vpop.f32.mrf.mxu2 }
 0x5a9   : > { %v4235_v18 = vadd.f32 %v4234_v20, %v3984_v10 }
 0x5ab   : > { %v4310_v19 = vmax.f32 %v4235_v18, 0.0 }
 0x5ad   : > { %v4574_v35 = vrot.slane %v4310_v19, 4  ;;  %v4591_v13 = vrot.slane %v4310_v19, 6 }
 0x5af   : > { %v4575_v61 = vsel %vm4348_vm2, %v4570_v14, %v4574_v35 }
 0x5b0   : > { %4583 = vst [vmem:[%s6923_s13 + $0x1d8] sm:$0xff] %v4575_v61  ;;  %v4237_v27 = vpop.f32.mrf.mxu2 }
 0x5b1   : > { %v4238_v40 = vadd.f32 %v4237_v27, %v3987_v34 }
 0x5b3   : > { %v4312_v21 = vmax.f32 %v4238_v40, 0.0 }
 0x5b5   : > { %v4592_v8 = vrot.slane %v4312_v21, 6 }
 0x5b7   : > { %v4593_v2 = vsel %vm4371_vm3, %v4591_v13, %v4592_v8  ;;  %v4597_v46 = vsel %vm4371_vm3, %v4592_v8, %v4596_v52 }
 0x5b8   : > { %4603 = vst [vmem:[%s6923_s13 + $0x1e8] sm:$0xff] %v4593_v2 }
 0x5b9   : > { %4605 = vst [vmem:[%s6923_s13 + $0x1f8] sm:$0xff] %v4597_v46 }
 0x5ba   : > { %5407 = shalt.err (!%p5404_p3)
}
 0x5bb   : > { %s5444_s7 = smov 256   ;;  %s5445_s12 = smov 16  }
 0x5bc   : > { %5338 = dma.vmem_to_hbm [thread:$0]  (%p5514_p5), %s4620_s23, 8192, %s4622_s25, %s4607_s22, %s5444_s7, %s5444_s7, %s5445_s12  }
 0x5bd PF: > { %p5344_p4 = scmp.ge.s32.totalorder %s5442_s21, 2  ;;  %s4636_s13 = sand.u32 1, %s5430_s18  }
 0x5be   : > { %s4637_s14 = scalar_lea.sflag [#allocation5], %s4636_s13 }
 0x5bf   : > { %p5341_p7 = pnand %p5344_p4, %p5518_p6 }
 0x5c1   : > { %p5342_p8 = pneg %p5341_p7 }
 0x5c3   : > { %5425 = dma.done.wait (%p5342_p8), %s4637_s14, 8192  }
 0x5c4   : > { %5427 = vsyncadd (%p5342_p8), %s4637_s14, 4294959104  ;;  %p15_p9 = scmp.ge.s32.totalorder %s5501_s24, 4   ;;  %s7364_s18 = smov %s5434_s19 }
 0x5c5   : > { %s7365_s19 = smov %s5438_s20  ;;  %s7366_s20 = smov %s5512_s27 }
 0x5c6   : > { %s7367_s21 = smov %s5501_s24  ;;  %17 = sbr.rel (!%p15_p9) target bundleno = 3 (0x3), region = 83 }
 0x5cb   :  { %4643 = vsyncpa [#allocation5], 1 }
 0x5cc   :  { %4645 = vsyncpa [#allocation5 + $0x1], 1 }

</bundles_post_ra>
